<compile_context>
chip_gen: v7x
topology: tpu7x:2x2x1
jax: 0.10.0
libtpu: 0.0.40
codegen_flags: <defaults>
</compile_context>

<pallas_src>
import jax
import jax.numpy as jnp
import numpy as np
from jax.experimental import pallas as pl
from jax.experimental.pallas import tpu as pltpu


def _coattention_kernel(q_ref, d_ref, wqcat_ref, wdT_ref,
                        whq_ref, whd_ref, lwq_ref, lwd_ref, lb_ref, out_ref):
    # Block shapes:
    #   q_ref : (Bb, Sq, E)        d_ref : (Bb, Sd, E)
    #   wqcat_ref: (E, E + L)      wdT_ref: (E, L)
    #   whq_ref/whd_ref: (1, L)    lwq_ref/lwd_ref: (L, E)   lb_ref: (1, E)
    #   out_ref: (Bb, E)
    Bb, Sq, E = q_ref.shape
    Sd = d_ref.shape[1]
    Lh = wdT_ref.shape[1]

    q = q_ref[...]                       # [Bb, Sq, E]
    d = d_ref[...]                       # [Bb, Sd, E]

    # ---- weight projections, fused across the whole batch block (M = Bb*S rows).
    #      The two q-side projections share the same LHS, so they go through the MXU
    #      once against the lane-concatenated [E, E+L] weight, then get lane-sliced. ----
    q2 = q.reshape(Bb * Sq, E)
    d2 = d.reshape(Bb * Sd, E)
    qWA = jnp.dot(q2, wqcat_ref[...], preferred_element_type=jnp.float32)   # [Bb*Sq, E+L]
    qW1 = qWA[:, :E].reshape(Bb, Sq, E)                                      # q @ W1
    A   = qWA[:, E:].reshape(Bb, Sq, Lh)                                     # (Wq q^T)^T
    Bd  = jnp.dot(d2, wdT_ref[...],
                  preferred_element_type=jnp.float32).reshape(Bb, Sd, Lh)    # (Wd d^T)^T

    # ---- affinity L = tanh(q W1 d^T): one MXU pass + one tanh.  The transposed copy
    #      is a single XLU transpose so every batched dot below stays canonical. ----
    Laff = jnp.tanh(jnp.einsum('bse,bte->bst', qW1, d,
                               preferred_element_type=jnp.float32))           # [Bb,Sq,Sd]
    LaffT = jnp.swapaxes(Laff, 1, 2)                                          # [Bb,Sd,Sq]

    # ---- Hq^T = tanh(A + L @ Bd), Hd^T = tanh(Bd + L^T @ A)  (kept seq-major) ----
    HqT = jnp.tanh(A + jnp.einsum('bst,btl->bsl', Laff, Bd,
                                  preferred_element_type=jnp.float32))        # [Bb,Sq,L]
    HdT = jnp.tanh(Bd + jnp.einsum('bts,bsl->btl', LaffT, A,
                                   preferred_element_type=jnp.float32))       # [Bb,Sd,L]

    # ---- attention scores: VPU multiply + lane reduce (no N=1 MXU matmul) ----
    sq = jnp.sum(HqT * whq_ref[...].reshape(1, 1, Lh), axis=-1, keepdims=True)  # [Bb,Sq,1]
    sd = jnp.sum(HdT * whd_ref[...].reshape(1, 1, Lh), axis=-1, keepdims=True)  # [Bb,Sd,1]

    # TODO(synk): F.softmax() with no dim on a 3-D tensor legacy-defaults to dim=0
    # (normalising across the batch); we normalise over the sequence axis, which is
    # the evident attention semantics of the module (the reference below matches).
    def _softmax_over_seq(s):
        m = jnp.max(s, axis=1, keepdims=True)
        e = jnp.exp(s - m)
        # approx=True: the divide lands on the otherwise-idle EUP slot.
        return e * pl.reciprocal(jnp.sum(e, axis=1, keepdims=True), approx=True)

    aq = _softmax_over_seq(sq)           # [Bb, Sq, 1]
    ad = _softmax_over_seq(sd)           # [Bb, Sd, 1]

    # ---- pooled co-attention: broadcast multiply + sublane reduce (no M=1 matmul) ----
    co_q = jnp.sum(aq * q, axis=1)       # [Bb, E]
    co_d = jnp.sum(ad * d, axis=1)       # [Bb, E]

    # ---- final linear; weight pre-split so no lane-axis concat is needed in-kernel ----
    out = (jnp.dot(co_q, lwq_ref[...], preferred_element_type=jnp.float32)
           + jnp.dot(co_d, lwd_ref[...], preferred_element_type=jnp.float32)
           + lb_ref[...])
    out_ref[...] = out.astype(out_ref.dtype)


def _tpu_hw_info():
    """(physical VMEM bytes, #TensorCores per chip), with conservative fallbacks."""
    vmem_physical = 64 << 20          # v7x has the smallest per-TC VMEM -> safe default
    num_cores = 1
    try:
        info = pltpu.get_tpu_info()
        for name in ("vmem_capacity_bytes", "vmem_bytes", "vmem_size_bytes"):
            v = getattr(info, name, None)
            if v:
                vmem_physical = int(v)
                break
        nc = getattr(info, "num_cores", None)
        if nc:
            num_cores = int(nc)
    except Exception:
        pass
    try:
        if "v7" in jax.devices()[0].device_kind.lower():
            num_cores = max(num_cores, 2)
    except Exception:
        pass
    return vmem_physical, num_cores


def _rup(x, m):
    return -(-x // m) * m


def _block_vmem_bytes(b, Sq, Sd, E, L):
    """Conservative f32 footprint of one grid step: every array's minor dims rounded
    up to (8, 128), pipelined inputs/output counted twice (double-buffering), plus the
    live intermediates (compiler may reuse some of these; this is an upper bound)."""
    f32 = 4
    p2 = lambda r, c: _rup(r, 8) * _rup(c, 128) * f32
    p3 = lambda n, r, c: n * p2(r, c)
    io = 2 * (p3(b, Sq, E) + p3(b, Sd, E)) + 2 * p2(b, E)              # q/d slabs + out, x2 buffers
    weights = 2 * (p2(E, E + L) + p2(E, L) + 2 * p2(1, L)
                   + 2 * p2(L, E) + p2(1, E))                          # grid-invariant, x2 buffers
    inter = (p2(b * Sq, E + L)                                         # fused q projection result
             + p3(b, Sq, E) + p3(b, Sq, L) + p3(b, Sd, L)              # qW1, A, Bd
             + p3(b, Sq, Sd) + p3(b, Sd, Sq)                           # Laff, LaffT
             + p3(b, Sq, L) + p3(b, Sd, L)                             # HqT, HdT
             + 2 * (p3(b, Sq, 1) + p3(b, Sd, 1))                       # scores + attn weights
             + 3 * p2(b, E))                                           # co_q, co_d, out temp
    return io + weights + inter


def _choose_b_blk(B, Sq, Sd, E, L, vmem_limit_bytes, num_cores):
    """Largest batch tile that fits ~70% of the scoped VMEM limit while keeping enough
    grid steps to pipeline: >= 2 steps per TensorCore on multi-core chips (v7x), >= 3
    steps on single-TC chips.  The (b_blk, E) output block requires b_blk % 8 == 0 or
    b_blk == B."""
    budget = int(0.7 * vmem_limit_bytes)
    min_steps = 2 * num_cores if num_cores >= 2 else 3
    cands = [c for c in range(B, 0, -1) if B % c == 0 and (c % 8 == 0 or c == B)]
    fits = [c for c in cands if _block_vmem_bytes(c, Sq, Sd, E, L) <= budget]
    pool = fits if fits else [min(cands)]
    for want in (min_steps, 2, 1):
        ok = [c for c in pool if B // c >= want]
        if ok:
            return ok[0]          # pool is descending -> largest tile with enough steps
    return pool[0]


def co_attention(query, doc, W1, Wq, Wd, whq, whd, lin_w, lin_b, *, b_blk=None):
    """query: [B, Sq, E], doc: [B, Sd, E]; W1: [E, E]; Wq, Wd: [L, E]; whq, whd: [1, L];
    lin_w: [2L, E] -- qd_linear weight stored [in, out] (= nn.Linear.weight.T) with the
    pooled-query half first; lin_b: [E].  Returns [B, E]."""
    B, Sq, E = query.shape
    Bd_, Sd, Ed = doc.shape
    Lh = Wq.shape[0]
    assert Bd_ == B and Ed == E
    assert W1.shape == (E, E) and Wq.shape == (Lh, E) and Wd.shape == (Lh, E)
    # The module's concat([co_q, co_d]) -> Linear(2*latent_dim, embed_dim) only
    # shape-checks when embed_dim == latent_dim (true of the PyTorch module as written).
    assert E == Lh, "CoAttention's concat + qd_linear requires embed_dim == latent_dim"
    assert lin_w.shape == (2 * Lh, E) and lin_b.shape == (E,)

    vmem_physical, num_cores = _tpu_hw_info()
    # Scoped VMEM limit: generous on 128 MiB chips (v5e/v6e), ~75% of physical on v7x.
    vmem_limit = int(min(64 << 20, 0.75 * vmem_physical))

    if b_blk is None:
        b_blk = _choose_b_blk(B, Sq, Sd, E, Lh, vmem_limit, num_cores)
    assert B % b_blk == 0 and (b_blk % 8 == 0 or b_blk == B)

    wqcat = jnp.concatenate([W1, Wq.T], axis=1)   # [E, E+L]: fused q-side projection weight
    wdT = Wd.T                                    # [E, L]
    whq2 = whq.reshape(1, Lh)
    whd2 = whd.reshape(1, Lh)
    lwq = lin_w[:Lh, :]                           # applies to the pooled-query half of the concat
    lwd = lin_w[Lh:, :]                           # applies to the pooled-doc half
    lb2 = lin_b.reshape(1, E)

    # Note: the grid-invariant weight BlockSpecs keep default double-buffering; at
    # E = L = 32 single-buffering them (pl.Buffered(1)) would reclaim only a few KiB.
    return pl.pallas_call(
        _coattention_kernel,
        out_shape=jax.ShapeDtypeStruct((B, E), jnp.float32),
        grid=(B // b_blk,),
        in_specs=[
            pl.BlockSpec((b_blk, Sq, E), lambda b: (b, 0, 0)),   # query block
            pl.BlockSpec((b_blk, Sd, E), lambda b: (b, 0, 0)),   # doc block
            pl.BlockSpec((E, E + Lh), lambda b: (0, 0)),         # [W1 | Wq^T] fused weight
            pl.BlockSpec((E, Lh), lambda b: (0, 0)),             # Wd^T
            pl.BlockSpec((1, Lh), lambda b: (0, 0)),             # whq
            pl.BlockSpec((1, Lh), lambda b: (0, 0)),             # whd
            pl.BlockSpec((Lh, E), lambda b: (0, 0)),             # qd_linear weight (q half)
            pl.BlockSpec((Lh, E), lambda b: (0, 0)),             # qd_linear weight (d half)
            pl.BlockSpec((1, E), lambda b: (0, 0)),              # qd_linear bias
        ],
        out_specs=pl.BlockSpec((b_blk, E), lambda b: (b, 0)),    # slab-dense output block
        compiler_params=pltpu.CompilerParams(
            dimension_semantics=("parallel",),
            vmem_limit_bytes=vmem_limit,
        ),
    )(query, doc, wqcat, wdT, whq2, whd2, lwq, lwd, lb2)


def _reference(query, doc, W1, Wq, Wd, whq, whd, lin_w, lin_b):
    # Literal transcription of CoAttention.forward (softmax over the sequence axis,
    # see the TODO note in the kernel).  High precision so the comparison is tight.
    with jax.default_matmul_precision("highest"):
        qT = jnp.swapaxes(query, 2, 1)                                   # [B, E, Sq]
        dT = jnp.swapaxes(doc, 2, 1)                                     # [B, E, Sd]
        Laff = jnp.tanh(jnp.matmul(jnp.matmul(query, W1), dT))           # [B, Sq, Sd]
        LaffT = jnp.swapaxes(Laff, 2, 1)
        Hq = jnp.tanh(jnp.matmul(Wq, qT) + jnp.matmul(jnp.matmul(Wd, dT), LaffT))  # [B, L, Sq]
        Hd = jnp.tanh(jnp.matmul(Wd, dT) + jnp.matmul(jnp.matmul(Wq, qT), Laff))   # [B, L, Sd]
        Aq = jax.nn.softmax(jnp.matmul(whq, Hq), axis=-1)                # [B, 1, Sq]
        Ad = jax.nn.softmax(jnp.matmul(whd, Hd), axis=-1)                # [B, 1, Sd]
        co_q = jnp.matmul(Aq, query)[:, 0, :]                            # [B, E]
        co_d = jnp.matmul(Ad, doc)[:, 0, :]                              # [B, E]
        cat = jnp.concatenate([co_q, co_d], axis=1)                      # [B, 2L]
        return jnp.matmul(cat, lin_w) + lin_b                            # [B, E]


if __name__ == "__main__":
    # Small shapes consistent with the module (embed_dim == latent_dim is required by
    # its concat + Linear); sequence lengths are sublane-aligned and differ on purpose.
    B, Sq, Sd = 16, 16, 24
    E = L = 32

    key = jax.random.PRNGKey(0)
    kq, kd, k1, k2, k3, k4, k5, k6, k7 = jax.random.split(key, 9)

    query = jax.random.normal(kq, (B, Sq, E), dtype=jnp.float32)
    doc = jax.random.normal(kd, (B, Sd, E), dtype=jnp.float32)

    # Parameters mirror the PyTorch module: torch.rand (U[0,1)) for the raw weights,
    # nn.Linear-style U(-1/sqrt(fan_in), 1/sqrt(fan_in)) for qd_linear.
    W1 = jax.random.uniform(k1, (E, E), jnp.float32)
    Wq = jax.random.uniform(k2, (L, E), jnp.float32)
    Wd = jax.random.uniform(k3, (L, E), jnp.float32)
    whq = jax.random.uniform(k4, (1, L), jnp.float32)
    whd = jax.random.uniform(k5, (1, L), jnp.float32)
    lim = 1.0 / np.sqrt(2 * L)
    lin_w = jax.random.uniform(k6, (2 * L, E), jnp.float32, -lim, lim)   # stored as [in, out]
    lin_b = jax.random.uniform(k7, (E,), jnp.float32, -lim, lim)

    out = co_attention(query, doc, W1, Wq, Wd, whq, whd, lin_w, lin_b)
    jax.block_until_ready(out)

    ref = _reference(query, doc, W1, Wq, Wd, whq, whd, lin_w, lin_b)
    assert out.shape == (B, E)
    # Tolerance covers the different matmul association / accumulation order and the
    # approx (EUP) reciprocal in the softmax; structural errors would be >> 1e-1.
    np.testing.assert_allclose(np.asarray(out), np.asarray(ref), rtol=2e-3, atol=2e-3)

    print("KERNEL_OK")
</pallas_src>

<mosaic_0001>
module attributes {stable_mosaic.version = 11 : i64} {
  func.func @_coattention_kernel(%arg0: i32, %arg1: memref<8x16x32xf32, #tpu.memory_space<vmem>>, %arg2: memref<8x24x32xf32, #tpu.memory_space<vmem>>, %arg3: memref<32x64xf32, #tpu.memory_space<vmem>>, %arg4: memref<32x32xf32, #tpu.memory_space<vmem>>, %arg5: memref<1x32xf32, #tpu.memory_space<vmem>>, %arg6: memref<1x32xf32, #tpu.memory_space<vmem>>, %arg7: memref<32x32xf32, #tpu.memory_space<vmem>>, %arg8: memref<32x32xf32, #tpu.memory_space<vmem>>, %arg9: memref<1x32xf32, #tpu.memory_space<vmem>>, %arg10: memref<8x32xf32, #tpu.memory_space<vmem>>) attributes {dimension_semantics = [#tpu.dimension_semantics<parallel>], iteration_bounds = array<i64: 2>, scalar_prefetch = 0 : i64, scratch_operands = 0 : i64, tpu.core_type = #tpu.core_type<tc>, window_params = [{transform_indices = @transform_0, window_bounds = array<i64: 8, 16, 32>}, {transform_indices = @transform_1, window_bounds = array<i64: 8, 24, 32>}, {pipeline_mode = #tpu.pipeline_mode<synchronous>, transform_indices = @transform_2, window_bounds = array<i64: 32, 64>}, {pipeline_mode = #tpu.pipeline_mode<synchronous>, transform_indices = @transform_3, window_bounds = array<i64: 32, 32>}, {pipeline_mode = #tpu.pipeline_mode<synchronous>, transform_indices = @transform_4, window_bounds = array<i64: 1, 32>}, {pipeline_mode = #tpu.pipeline_mode<synchronous>, transform_indices = @transform_5, window_bounds = array<i64: 1, 32>}, {pipeline_mode = #tpu.pipeline_mode<synchronous>, transform_indices = @transform_6, window_bounds = array<i64: 32, 32>}, {pipeline_mode = #tpu.pipeline_mode<synchronous>, transform_indices = @transform_7, window_bounds = array<i64: 32, 32>}, {pipeline_mode = #tpu.pipeline_mode<synchronous>, transform_indices = @transform_8, window_bounds = array<i64: 1, 32>}, {transform_indices = @transform_9, window_bounds = array<i64: 8, 32>}]} {
    %c0 = arith.constant 0 : index
    %c0_0 = arith.constant 0 : index
    %c0_1 = arith.constant 0 : index
    %0 = vector.load %arg1[%c0, %c0_0, %c0_1] : memref<8x16x32xf32, #tpu.memory_space<vmem>>, vector<8x16x32xf32>
    %c0_2 = arith.constant 0 : index
    %c0_3 = arith.constant 0 : index
    %c0_4 = arith.constant 0 : index
    %1 = vector.load %arg2[%c0_2, %c0_3, %c0_4] : memref<8x24x32xf32, #tpu.memory_space<vmem>>, vector<8x24x32xf32>
    %2 = vector.shape_cast %0 : vector<8x16x32xf32> to vector<128x32xf32>
    %3 = vector.shape_cast %1 : vector<8x24x32xf32> to vector<192x32xf32>
    %c0_5 = arith.constant 0 : index
    %c0_6 = arith.constant 0 : index
    %4 = vector.load %arg3[%c0_5, %c0_6] : memref<32x64xf32, #tpu.memory_space<vmem>>, vector<32x64xf32>
    %cst = arith.constant dense<0.000000e+00> : vector<128x64xf32>
    %5 = tpu.matmul %2, %4, %cst {dimension_numbers = #tpu.dot_dimension_numbers<[1], [0], [0], [1], [0, 0, 1, 1], [], []>} : vector<128x32xf32>, vector<32x64xf32>, vector<128x64xf32> -> vector<128x64xf32>
    %6 = vector.extract_strided_slice %5 {offsets = [0, 0], sizes = [128, 32], strides = [1, 1]} : vector<128x64xf32> to vector<128x32xf32>
    %7 = vector.shape_cast %6 : vector<128x32xf32> to vector<8x16x32xf32>
    %8 = vector.extract_strided_slice %5 {offsets = [0, 32], sizes = [128, 32], strides = [1, 1]} : vector<128x64xf32> to vector<128x32xf32>
    %9 = vector.shape_cast %8 : vector<128x32xf32> to vector<8x16x32xf32>
    %c0_7 = arith.constant 0 : index
    %c0_8 = arith.constant 0 : index
    %10 = vector.load %arg4[%c0_7, %c0_8] : memref<32x32xf32, #tpu.memory_space<vmem>>, vector<32x32xf32>
    %cst_9 = arith.constant dense<0.000000e+00> : vector<192x32xf32>
    %11 = tpu.matmul %3, %10, %cst_9 {dimension_numbers = #tpu.dot_dimension_numbers<[1], [0], [0], [1], [0, 0, 1, 1], [], []>} : vector<192x32xf32>, vector<32x32xf32>, vector<192x32xf32> -> vector<192x32xf32>
    %12 = vector.shape_cast %11 : vector<192x32xf32> to vector<8x24x32xf32>
    "tpu.trace_start"() <{level = 10 : i32, message = "bse,bte->bst"}> : () -> ()
    %cst_10 = arith.constant dense<0.000000e+00> : vector<8x16x24xf32>
    %13 = tpu.matmul %7, %1, %cst_10 {dimension_numbers = #tpu.dot_dimension_numbers<[2], [2], [1], [1], [0, 0, 0, 1, 1, 1], [0], [0]>} : vector<8x16x32xf32>, vector<8x24x32xf32>, vector<8x16x24xf32> -> vector<8x16x24xf32>
    "tpu.trace_stop"() : () -> ()
    %14 = math.tanh %13 : vector<8x16x24xf32>
    %15 = tpu.transpose %14, [0, 2, 1] : vector<8x16x24xf32> -> vector<8x24x16xf32>
    "tpu.trace_start"() <{level = 10 : i32, message = "bst,btl->bsl"}> : () -> ()
    %cst_11 = arith.constant dense<0.000000e+00> : vector<8x16x32xf32>
    %16 = tpu.matmul %14, %12, %cst_11 {dimension_numbers = #tpu.dot_dimension_numbers<[2], [1], [1], [2], [0, 0, 0, 1, 1, 2], [0], [0]>} : vector<8x16x24xf32>, vector<8x24x32xf32>, vector<8x16x32xf32> -> vector<8x16x32xf32>
    "tpu.trace_stop"() : () -> ()
    %17 = arith.addf %9, %16 : vector<8x16x32xf32>
    %18 = math.tanh %17 : vector<8x16x32xf32>
    "tpu.trace_start"() <{level = 10 : i32, message = "bts,bsl->btl"}> : () -> ()
    %cst_12 = arith.constant dense<0.000000e+00> : vector<8x24x32xf32>
    %19 = tpu.matmul %15, %9, %cst_12 {dimension_numbers = #tpu.dot_dimension_numbers<[2], [1], [1], [2], [0, 0, 0, 1, 1, 2], [0], [0]>} : vector<8x24x16xf32>, vector<8x16x32xf32>, vector<8x24x32xf32> -> vector<8x24x32xf32>
    "tpu.trace_stop"() : () -> ()
    %20 = arith.addf %12, %19 : vector<8x24x32xf32>
    %21 = math.tanh %20 : vector<8x24x32xf32>
    %c0_13 = arith.constant 0 : index
    %c0_14 = arith.constant 0 : index
    %22 = vector.load %arg5[%c0_13, %c0_14] : memref<1x32xf32, #tpu.memory_space<vmem>>, vector<1x32xf32>
    %23 = vector.shape_cast %22 : vector<1x32xf32> to vector<1x1x32xf32>
    %24 = vector.broadcast %23 : vector<1x1x32xf32> to vector<8x16x32xf32>
    %25 = arith.mulf %18, %24 : vector<8x16x32xf32>
    %cst_15 = arith.constant dense<0.000000e+00> : vector<8x16xf32>
    %26 = vector.multi_reduction <add>, %25, %cst_15 [2] : vector<8x16x32xf32> to vector<8x16xf32>
    %27 = vector.shape_cast %26 : vector<8x16xf32> to vector<8x16x1xf32>
    %c0_16 = arith.constant 0 : index
    %c0_17 = arith.constant 0 : index
    %28 = vector.load %arg6[%c0_16, %c0_17] : memref<1x32xf32, #tpu.memory_space<vmem>>, vector<1x32xf32>
    %29 = vector.shape_cast %28 : vector<1x32xf32> to vector<1x1x32xf32>
    %30 = vector.broadcast %29 : vector<1x1x32xf32> to vector<8x24x32xf32>
    %31 = arith.mulf %21, %30 : vector<8x24x32xf32>
    %cst_18 = arith.constant dense<0.000000e+00> : vector<8x24xf32>
    %32 = vector.multi_reduction <add>, %31, %cst_18 [2] : vector<8x24x32xf32> to vector<8x24xf32>
    %33 = vector.shape_cast %32 : vector<8x24xf32> to vector<8x24x1xf32>
    %cst_19 = arith.constant dense<0xFF800000> : vector<8x1xf32>
    %34 = vector.multi_reduction <maximumf>, %27, %cst_19 [1] : vector<8x16x1xf32> to vector<8x1xf32>
    %35 = vector.shape_cast %34 : vector<8x1xf32> to vector<8x1x1xf32>
    %36 = vector.broadcast %35 : vector<8x1x1xf32> to vector<8x16x1xf32>
    %37 = arith.subf %27, %36 : vector<8x16x1xf32>
    %38 = math.exp %37 : vector<8x16x1xf32>
    %cst_20 = arith.constant dense<0.000000e+00> : vector<8x1xf32>
    %39 = vector.multi_reduction <add>, %38, %cst_20 [1] : vector<8x16x1xf32> to vector<8x1xf32>
    %40 = vector.shape_cast %39 : vector<8x1xf32> to vector<8x1x1xf32>
    %41 = tpu.reciprocal %40 {approx = true} : vector<8x1x1xf32> -> vector<8x1x1xf32>
    %42 = vector.broadcast %41 : vector<8x1x1xf32> to vector<8x16x1xf32>
    %43 = arith.mulf %38, %42 : vector<8x16x1xf32>
    %cst_21 = arith.constant dense<0xFF800000> : vector<8x1xf32>
    %44 = vector.multi_reduction <maximumf>, %33, %cst_21 [1] : vector<8x24x1xf32> to vector<8x1xf32>
    %45 = vector.shape_cast %44 : vector<8x1xf32> to vector<8x1x1xf32>
    %46 = vector.broadcast %45 : vector<8x1x1xf32> to vector<8x24x1xf32>
    %47 = arith.subf %33, %46 : vector<8x24x1xf32>
    %48 = math.exp %47 : vector<8x24x1xf32>
    %cst_22 = arith.constant dense<0.000000e+00> : vector<8x1xf32>
    %49 = vector.multi_reduction <add>, %48, %cst_22 [1] : vector<8x24x1xf32> to vector<8x1xf32>
    %50 = vector.shape_cast %49 : vector<8x1xf32> to vector<8x1x1xf32>
    %51 = tpu.reciprocal %50 {approx = true} : vector<8x1x1xf32> -> vector<8x1x1xf32>
    %52 = vector.broadcast %51 : vector<8x1x1xf32> to vector<8x24x1xf32>
    %53 = arith.mulf %48, %52 : vector<8x24x1xf32>
    %54 = vector.broadcast %43 : vector<8x16x1xf32> to vector<8x16x32xf32>
    %55 = arith.mulf %54, %0 : vector<8x16x32xf32>
    %cst_23 = arith.constant dense<0.000000e+00> : vector<8x32xf32>
    %56 = vector.multi_reduction <add>, %55, %cst_23 [1] : vector<8x16x32xf32> to vector<8x32xf32>
    %57 = vector.broadcast %53 : vector<8x24x1xf32> to vector<8x24x32xf32>
    %58 = arith.mulf %57, %1 : vector<8x24x32xf32>
    %cst_24 = arith.constant dense<0.000000e+00> : vector<8x32xf32>
    %59 = vector.multi_reduction <add>, %58, %cst_24 [1] : vector<8x24x32xf32> to vector<8x32xf32>
    %c0_25 = arith.constant 0 : index
    %c0_26 = arith.constant 0 : index
    %60 = vector.load %arg7[%c0_25, %c0_26] : memref<32x32xf32, #tpu.memory_space<vmem>>, vector<32x32xf32>
    %cst_27 = arith.constant dense<0.000000e+00> : vector<8x32xf32>
    %61 = tpu.matmul %56, %60, %cst_27 {dimension_numbers = #tpu.dot_dimension_numbers<[1], [0], [0], [1], [0, 0, 1, 1], [], []>} : vector<8x32xf32>, vector<32x32xf32>, vector<8x32xf32> -> vector<8x32xf32>
    %c0_28 = arith.constant 0 : index
    %c0_29 = arith.constant 0 : index
    %62 = vector.load %arg8[%c0_28, %c0_29] : memref<32x32xf32, #tpu.memory_space<vmem>>, vector<32x32xf32>
    %cst_30 = arith.constant dense<0.000000e+00> : vector<8x32xf32>
    %63 = tpu.matmul %59, %62, %cst_30 {dimension_numbers = #tpu.dot_dimension_numbers<[1], [0], [0], [1], [0, 0, 1, 1], [], []>} : vector<8x32xf32>, vector<32x32xf32>, vector<8x32xf32> -> vector<8x32xf32>
    %64 = arith.addf %61, %63 : vector<8x32xf32>
    %c0_31 = arith.constant 0 : index
    %c0_32 = arith.constant 0 : index
    %65 = vector.load %arg9[%c0_31, %c0_32] : memref<1x32xf32, #tpu.memory_space<vmem>>, vector<1x32xf32>
    %66 = vector.broadcast %65 : vector<1x32xf32> to vector<8x32xf32>
    %67 = arith.addf %64, %66 : vector<8x32xf32>
    %c0_33 = arith.constant 0 : index
    %c0_34 = arith.constant 0 : index
    %68 = vector.load %arg10[%c0_33, %c0_34] : memref<8x32xf32, #tpu.memory_space<vmem>>, vector<8x32xf32>
    tpu.vector_store %arg10[%c0_33, %c0_34], %67 {strides = array<i32>} : memref<8x32xf32, #tpu.memory_space<vmem>>, vector<8x32xf32>,
    return
  }
  func.func @transform_0(%arg0: i32) -> (i32, i32, i32) {
    %c0_i32 = arith.constant 0 : i32
    %c0_i32_0 = arith.constant 0 : i32
    %c0_i32_1 = arith.constant 0 : i32
    return %arg0, %c0_i32, %c0_i32_0 : i32, i32, i32
  }
  func.func @transform_1(%arg0: i32) -> (i32, i32, i32) {
    %c0_i32 = arith.constant 0 : i32
    %c0_i32_0 = arith.constant 0 : i32
    %c0_i32_1 = arith.constant 0 : i32
    return %arg0, %c0_i32, %c0_i32_0 : i32, i32, i32
  }
  func.func @transform_2(%arg0: i32) -> (i32, i32) {
    %c0_i32 = arith.constant 0 : i32
    %c0_i32_0 = arith.constant 0 : i32
    %c0_i32_1 = arith.constant 0 : i32
    return %c0_i32, %c0_i32_0 : i32, i32
  }
  func.func @transform_3(%arg0: i32) -> (i32, i32) {
    %c0_i32 = arith.constant 0 : i32
    %c0_i32_0 = arith.constant 0 : i32
    %c0_i32_1 = arith.constant 0 : i32
    return %c0_i32, %c0_i32_0 : i32, i32
  }
  func.func @transform_4(%arg0: i32) -> (i32, i32) {
    %c0_i32 = arith.constant 0 : i32
    %c0_i32_0 = arith.constant 0 : i32
    %c0_i32_1 = arith.constant 0 : i32
    return %c0_i32, %c0_i32_0 : i32, i32
  }
  func.func @transform_5(%arg0: i32) -> (i32, i32) {
    %c0_i32 = arith.constant 0 : i32
    %c0_i32_0 = arith.constant 0 : i32
    %c0_i32_1 = arith.constant 0 : i32
    return %c0_i32, %c0_i32_0 : i32, i32
  }
  func.func @transform_6(%arg0: i32) -> (i32, i32) {
    %c0_i32 = arith.constant 0 : i32
    %c0_i32_0 = arith.constant 0 : i32
    %c0_i32_1 = arith.constant 0 : i32
    return %c0_i32, %c0_i32_0 : i32, i32
  }
  func.func @transform_7(%arg0: i32) -> (i32, i32) {
    %c0_i32 = arith.constant 0 : i32
    %c0_i32_0 = arith.constant 0 : i32
    %c0_i32_1 = arith.constant 0 : i32
    return %c0_i32, %c0_i32_0 : i32, i32
  }
  func.func @transform_8(%arg0: i32) -> (i32, i32) {
    %c0_i32 = arith.constant 0 : i32
    %c0_i32_0 = arith.constant 0 : i32
    %c0_i32_1 = arith.constant 0 : i32
    return %c0_i32, %c0_i32_0 : i32, i32
  }
  func.func @transform_9(%arg0: i32) -> (i32, i32) {
    %c0_i32 = arith.constant 0 : i32
    %c0_i32_0 = arith.constant 0 : i32
    return %arg0, %c0_i32 : i32, i32
  }
}

</mosaic_0001>

<bundles_post_ra>
// kernel: tpu_custom_call.1
= control target key start
LH: loop header
LB: loop body
LE: loop exit
PB: predicated region body
PF: predicated region fallthrough
CT: control target
= control target key end

     0   :  { %s7513_s0 = inlined_call_operand.hbm [shape: f32[16,16,32], index: 0, kind: input, shape index: {}]   ;;  %s7514_s1 = inlined_call_operand.hbm [shape: f32[16,24,32], index: 1, kind: input, shape index: {}]   ;;  %s7515_s2 = inlined_call_operand.hbm [shape: f32[32,64], index: 2, kind: input, shape index: {}]   ;;  %s7516_s3 = inlined_call_operand.hbm [shape: f32[32,32], index: 3, kind: input, shape index: {}]   ;;  %s7517_s4 = inlined_call_operand.vmem [shape: f32[1,32], index: 4, kind: input, shape index: {}]   ;;  %s7518_s5 = inlined_call_operand.vmem [shape: f32[1,32], index: 5, kind: input, shape index: {}]   ;;  %s7519_s6 = inlined_call_operand.hbm [shape: f32[32,32], index: 6, kind: input, shape index: {}]   ;;  %s7520_s7 = inlined_call_operand.hbm [shape: f32[32,32], index: 7, kind: input, shape index: {}]   ;;  %s7521_s8 = inlined_call_operand.vmem [shape: f32[1,32], index: 8, kind: input, shape index: {}]   ;;  %s7522_s9 = inlined_call_operand.hbm [shape: f32[16,32], index: 9, kind: output, shape index: {}]  }
   0x1   :  { %7533 = sst [smem:[#allocation22_spill]] %s7513_s0 }
   0x2   :  { %7534 = sst [smem:[#allocation23_spill]] %s7515_s2 }
   0x3   :  { %7535 = sst [smem:[#allocation24_spill]] %s7516_s3 }
   0x4   :  { %7536 = sst [smem:[#allocation25_spill]] %s7519_s6 }
   0x5   :  { %7537 = sst [smem:[#allocation26_spill]] %s7522_s9 }
   0x6   :  { %14 = vsyncpa [#allocation3], 0 }
   0x7   :  { %16 = vsyncpa [#allocation3 + $0x1], 0 }
   0x8   :  { %17 = vsyncpa [#allocation6], 0 }
   0x9   :  { %19 = vsyncpa [#allocation6 + $0x1], 0 }
   0xa   :  { %20 = vsyncpa [#allocation9], 0 }
   0xb   :  { %21 = vsyncpa [#allocation12], 0 }
   0xc   :  { %22 = vsyncpa [#allocation4], 0 }
   0xd   :  { %24 = vsyncpa [#allocation4 + $0x1], 0  ;;  %s6159_s30 = smov 0   ;;  %s6161_s10 = smov 0  }
   0xe   :  { %s6163_s11 = smov 0   ;;  %s6165_s12 = smov 0  }
   0xf LB: > { %7538 = sst [smem:[#allocation20_spill]] %s6081_s30  ;;  %s6180_s13 = sadd.s32 4294967295, %s6093_s12   ;;  %s6093_s12 = sphi %s6165_s12, %s7573_s12   ;;  %s6089_s11 = sphi %s6163_s11, %s7572_s11   ;;  %s6085_s10 = sphi %s6161_s10, %s7571_s10   ;;  %s6081_s30 = sphi %s6159_s30, %s7570_s30  }
  0x10   : > { %s4625_s14 = sadd.s32 4294967294, %s6093_s12   ;;  %p50_p0 = scmp.ne.s32.totalorder %s6085_s10, %s6081_s30 }
  0x11   : > { %p7523_p1 = scmp.eq.s32.totalorder %s6180_s13, 0  ;;  %p253_p3 = scmp.eq.s32.totalorder %s4625_s14, 1 }
  0x12   : > { %p4626_p5 = scmp.ge.s32.totalorder %s6093_s12, 1  ;;  %p260_p7 = scmp.lt.s32.totalorder %s6093_s12, 3 }
  0x13   : > { %p6189_p4 = por %p7523_p1, %p50_p0  ;;  %p6194_p6 = por %p253_p3, %p50_p0 }
  0x14   : > { %p6199_p8 = pnand %p4626_p5, %p260_p7  ;;  %s6095_s18 = smov [#allocation7]  }
  0x15   : > { %s7539_s15 = scalar_select %p6189_p4, 1, 0 }
  0x16   : > { %s7540_s16 = scalar_select %p6194_p6, 1, 0 }
  0x17   : > { %s7542_s17 = scalar_select %p6199_p8, 1, 0 }
  0x18   : > { %7541 = sst [smem:[#allocation21_spill]] %s7540_s16  ;;  %s272_s19 = sshll.u32 %s6095_s18, 4  ;;  %s6203_s19 = int_to_ptr.vmem [resolvable:$true] %s272_s19 }
  0x19   : > { %p5458_p9 = pneg %p6199_p8  ;;  %s6096_s21 = smov [#allocation8]  }
  0x1a   : > { %s285_s22 = sshll.u32 %s6096_s21, 4  ;;  %s6097_s23 = smov [#allocation10]   ;;  %s6214_s22 = int_to_ptr.vmem [resolvable:$true] %s285_s22 }
  0x1b   : > { %p6210_p11 = pnand %p5458_p9, %p7523_p1  ;;  %s6216_s24 = sshll.u32 %s6097_s23, 4  ;;  %s305_s24 = int_to_ptr.vmem [resolvable:$true] %s6216_s24 }
  0x1c   : > { %s7544_s2 = sld [smem:[#allocation23_spill]] }
  0x1d   : > { %p6226_p13 = pneg %p6210_p11 }
  0x22   : > { %s5839_s27 = scalar_lea.hbm %s7544_s2, 512 }
  0x23   : > { %p5840_p12 = scmp.ne.s32.totalorder %s7544_s2, %s5839_s27  ;;  %p5846_p5 = scmp.lt.u32.totalorder %s5839_s27, %s7544_s2 }
  0x25   : > { %p5842_p0 = pnand %p6226_p13, %p5840_p12 }
  0x27   : > { %p5843_p3 = pneg %p5842_p0 }
  0x29   : > { %p5848_p7 = pnand %p5846_p5, %p5843_p3 }
  0x2b   : > { %5851 = shalt.err (!%p5848_p7)
}
  0x2c   : > { %s5852_s23 = scalar_lea.vmem %s6203_s19, 512  ;;  %p5860_p2 = scmp.lt.s32.totalorder %s6203_s19, %s6203_s19 }
  0x2d   : > { %p5853_p9 = scmp.ne.s32.totalorder %s6203_s19, %s5852_s23  ;;  %p5861_p6 = scmp.lt.s32.totalorder %s5852_s23, %s5852_s23 }
  0x2f   : > { %p5855_p10 = pnand %p5853_p9, %p6226_p13  ;;  %p5862_p12 = por %p5861_p6, %p5860_p2 }
  0x31   : > { %p5856_p1 = pneg %p5855_p10 }
  0x33   : > { %p5863_p0 = pnand %p5862_p12, %p5856_p1 }
  0x35   : > { %5866 = shalt.err (!%p5863_p0)
}
  0x36   : > { %s7529_s25 = smov 128   ;;  %s7531_s26 = smov 8  }
  0x37   : > { %5461 = dma.hbm_to_vmem [thread:$0]  (!%p6210_p11), %s7544_s2, 512, %s6203_s19, [#allocation6], %s7529_s25, %s7529_s25, %s7531_s26  }
  0x38   : > { %s7546_s3 = sld [smem:[#allocation24_spill]] }
  0x3e   : > { %s5867_s21 = scalar_lea.hbm %s7546_s3, 512 }
  0x3f   : > { %p5868_p1 = scmp.ne.s32.totalorder %s7546_s3, %s5867_s21  ;;  %p5874_p10 = scmp.lt.u32.totalorder %s5867_s21, %s7546_s3 }
  0x41   : > { %p5870_p2 = pnand %p5868_p1, %p6226_p13 }
  0x43   : > { %p5871_p6 = pneg %p5870_p2 }
  0x45   : > { %p5876_p3 = pnand %p5874_p10, %p5871_p6 }
  0x47   : > { %5879 = shalt.err (!%p5876_p3)
}
  0x48   : > { %s5880_s19 = scalar_lea.vmem %s6214_s22, 512  ;;  %p5888_p12 = scmp.lt.s32.totalorder %s6214_s22, %s6214_s22 }
  0x49   : > { %p5881_p5 = scmp.ne.s32.totalorder %s6214_s22, %s5880_s19  ;;  %p5889_p0 = scmp.lt.s32.totalorder %s5880_s19, %s5880_s19 }
  0x4b   : > { %p5883_p7 = pnand %p5881_p5, %p6226_p13  ;;  %p5890_p1 = por %p5889_p0, %p5888_p12 }
  0x4d   : > { %p5884_p9 = pneg %p5883_p7 }
  0x4f   : > { %p5891_p2 = pnand %p5890_p1, %p5884_p9 }
  0x51   : > { %5894 = shalt.err (!%p5891_p2)
}
  0x52   : > { %5464 = dma.hbm_to_vmem [thread:$0]  (!%p6210_p11), %s7546_s3, 512, %s6214_s22, [#allocation9], %s7529_s25, %s7529_s25, %s7531_s26  }
  0x53   : > { %s7547_s6 = sld [smem:[#allocation25_spill]] }
  0x59   : > { %s5895_s28 = scalar_lea.hbm %s7547_s6, 512 }
  0x5a   : > { %p5896_p6 = scmp.ne.s32.totalorder %s7547_s6, %s5895_s28  ;;  %p5902_p5 = scmp.lt.u32.totalorder %s5895_s28, %s7547_s6 }
  0x5c   : > { %p5898_p10 = pnand %p5896_p6, %p6226_p13 }
  0x5e   : > { %p5899_p3 = pneg %p5898_p10 }
  0x60   : > { %p5904_p7 = pnand %p5902_p5, %p5899_p3 }
  0x62   : > { %5907 = shalt.err (!%p5904_p7)
}
  0x63   : > { %s5908_s19 = scalar_lea.vmem %s305_s24, 512  ;;  %p5916_p1 = scmp.lt.s32.totalorder %s305_s24, %s305_s24 }
  0x64   : > { %p5909_p9 = scmp.ne.s32.totalorder %s305_s24, %s5908_s19  ;;  %p5917_p2 = scmp.lt.s32.totalorder %s5908_s19, %s5908_s19 }
  0x66   : > { %p5911_p12 = pnand %p5909_p9, %p6226_p13  ;;  %p5918_p4 = por %p5917_p2, %p5916_p1 }
  0x68   : > { %p5912_p0 = pneg %p5911_p12 }
  0x6a   : > { %p5919_p8 = pnand %p5918_p4, %p5912_p0 }
  0x6c   : > { %5922 = shalt.err (!%p5919_p8)
}
  0x6d   : > { %5467 = dma.hbm_to_vmem [thread:$0]  (!%p6210_p11), %s7547_s6, 512, %s305_s24, [#allocation9], %s7529_s25, %s7529_s25, %s7531_s26  }
  0x6e   : > { %s6100_s30 = smov [#allocation11]   ;;  %s5923_s29 = scalar_lea.hbm %s7520_s7, 512 }
  0x6f   : > { %s317_s16 = sshll.u32 %s6100_s30, 4  ;;  %p5924_p4 = scmp.ne.s32.totalorder %s7520_s7, %s5923_s29  ;;  %s318_s16 = int_to_ptr.vmem [resolvable:$true] %s317_s16 }
  0x70   : > { %p5930_p10 = scmp.lt.u32.totalorder %s5923_s29, %s7520_s7 }
  0x71   : > { %p5926_p8 = pnand %p5924_p4, %p6226_p13 }
  0x73   : > { %p5927_p6 = pneg %p5926_p8 }
  0x75   : > { %p5932_p3 = pnand %p5930_p10, %p5927_p6 }
  0x77   : > { %5935 = shalt.err (!%p5932_p3)
}
  0x78   : > { %s5936_s24 = scalar_lea.vmem %s318_s16, 512  ;;  %p5944_p12 = scmp.lt.s32.totalorder %s318_s16, %s318_s16 }
  0x79   : > { %p5937_p5 = scmp.ne.s32.totalorder %s318_s16, %s5936_s24  ;;  %p5945_p0 = scmp.lt.s32.totalorder %s5936_s24, %s5936_s24 }
  0x7b   : > { %p5939_p7 = pnand %p5937_p5, %p6226_p13  ;;  %p5946_p1 = por %p5945_p0, %p5944_p12 }
  0x7d   : > { %p5940_p9 = pneg %p5939_p7 }
  0x7f   : > { %p5947_p2 = pnand %p5946_p1, %p5940_p9 }
  0x81   : > { %5950 = shalt.err (!%p5947_p2)
}
  0x82   : > { %5470 = dma.hbm_to_vmem [thread:$0]  (!%p6210_p11), %s7520_s7, 512, %s318_s16, [#allocation12], %s7529_s25, %s7529_s25, %s7531_s26  }
  0x83   : > { %s6320_s14 = sadd.s32 1, %s6093_s12   ;;  %s37_s20 = sadd.s32 1, %s6089_s11 }
  0x84   : > { %s34_s30 = ssub.s32 %s6093_s12, %s6320_s14  ;;  %p44_p13 = scmp.ne.s32.totalorder %s6089_s11, %s6085_s10 }
  0x85   : > { %p35_p4 = scmp.eq.s32.totalorder %s34_s30, 0  ;;  %p45_p8 = scmp.eq.s32.totalorder %s6093_s12, 0 }
  0x86   : > { %p7548_p6 = scmp.eq.s32.totalorder %s6180_s13, 1  ;;  %p5486_p3 = scmp.lt.s32.totalorder %s6093_s12, 2 }
  0x87   : > { %s6336_s28 = scalar_select %p35_p4, %s6089_s11, %s37_s20  }
  0x88   : > { %p6330_p10 = por %p7548_p6, %p44_p13  ;;  %p46_p5 = por %p45_p8, %p44_p13 }
  0x89   : > { %s6339_s29 = sand.u32 1, %s6089_s11   ;;  %s4776_s18 = sshll.u32 %s6093_s12, 11 }
  0x8a   : > { %s4632_s16 = sshll.u32 %s6339_s29, 7  ;;  %s7550_s0 = sld [smem:[#allocation22_spill]] }
  0x8b   : > { %s338_s24 = scalar_lea.vmem [#allocation2], %s4632_s16  ;;  %p6350_p11 = pnand %p5486_p3, %p46_p5 }
  0x8c   : > { %s346_s22 = sshll.u32 %s338_s24, 4  ;;  %s5433_s30 = smul.u32 192, %s6339_s29  ;;  %s6348_s22 = int_to_ptr.vmem [resolvable:$true] %s346_s22 }
  0x8d   : > { %s335_s25 = scalar_lea.sflag [#allocation3], %s6339_s29  ;;  %p5953_p9 = pneg %p6350_p11 }
  0x90   : > { %s6346_s19 = scalar_lea.hbm %s7550_s0, %s4776_s18  ;;  %s5956_s23 = scalar_lea.hbm %s7550_s0, 4096 }
  0x91   : > { %s5951_s21 = scalar_lea.hbm %s6346_s19, 2048  ;;  %p5957_p1 = scmp.lt.u32.totalorder %s6346_s19, %s7550_s0 }
  0x92   : > { %p5952_p7 = scmp.ne.s32.totalorder %s6346_s19, %s5951_s21  ;;  %p5958_p2 = scmp.lt.u32.totalorder %s5956_s23, %s5951_s21 }
  0x93   : > { %p5960_p4 = scmp.lt.u32.totalorder %s5951_s21, %s6346_s19 }
  0x94   : > { %p5954_p12 = pnand %p5953_p9, %p5952_p7  ;;  %p5959_p13 = por %p5958_p2, %p5957_p1 }
  0x96   : > { %p5955_p0 = pneg %p5954_p12  ;;  %p5961_p8 = por %p5960_p4, %p5959_p13 }
  0x98   : > { %p5962_p6 = pnand %p5961_p8, %p5955_p0 }
  0x9a   : > { %5965 = shalt.err (!%p5962_p6)
}
  0x9b   : > { %s5966_s20 = scalar_lea.vmem %s6348_s22, 2048  ;;  %s6101_s16 = smov [#allocation2]  }
  0x9c   : > { %p5967_p3 = scmp.ne.s32.totalorder %s6348_s22, %s5966_s20  ;;  %s5971_s18 = sshll.u32 %s6101_s16, 4  ;;  %s5972_s18 = int_to_ptr.vmem [resolvable:$false] %s5971_s18 }
  0x9d   : > { %s5973_s26 = scalar_lea.vmem %s5972_s18, 4096  ;;  %p5974_p12 = scmp.lt.s32.totalorder %s6348_s22, %s5972_s18 }
  0x9e   : > { %p5969_p5 = pnand %p5967_p3, %p5953_p9  ;;  %p5975_p1 = scmp.lt.s32.totalorder %s5973_s26, %s5966_s20 }
  0xa0   : > { %p5970_p7 = pneg %p5969_p5  ;;  %p5976_p2 = por %p5975_p1, %p5974_p12 }
  0xa2   : > { %p5977_p13 = pnand %p5976_p2, %p5970_p7 }
  0xa4   : > { %5980 = shalt.err (!%p5977_p13)
}
  0xa5   : > { %s7552_s21 = smov 8   ;;  %s7553_s23 = smov 128  }
  0xa6   : > { %5474 = dma.hbm_to_vmem [thread:$0]  (!%p6350_p11), %s6346_s19, 2048, %s6348_s22, %s335_s25, %s7553_s23, %s7553_s23, %s7552_s21  }
  0xa7   : > { %s5434_s24 = smul.u32 3072, %s6093_s12  ;;  %s360_s20 = scalar_lea.vmem [#allocation5], %s5433_s30 }
  0xa8   : > { %s368_s16 = sshll.u32 %s360_s20, 4  ;;  %s7554_s2 = sand.u32 1, %s6093_s12   ;;  %s6395_s16 = int_to_ptr.vmem [resolvable:$true] %s368_s16 }
  0xa9   : > { %s6393_s0 = scalar_lea.hbm %s7514_s1, %s5434_s24  ;;  %s6399_s3 = scalar_lea.sflag [#allocation6], %s7554_s2 }
  0xaa   : > { %s5981_s6 = scalar_lea.hbm %s6393_s0, 3072  ;;  %s5986_s19 = scalar_lea.hbm %s7514_s1, 6144 }
  0xab   : > { %p5982_p0 = scmp.ne.s32.totalorder %s6393_s0, %s5981_s6  ;;  %p5987_p6 = scmp.lt.u32.totalorder %s6393_s0, %s7514_s1 }
  0xac   : > { %p5988_p3 = scmp.lt.u32.totalorder %s5986_s19, %s5981_s6  ;;  %p5990_p7 = scmp.lt.u32.totalorder %s5981_s6, %s6393_s0 }
  0xad   : > { %p5984_p4 = pnand %p5982_p0, %p5953_p9 }
  0xae   : > { %p5989_p5 = por %p5988_p3, %p5987_p6 }
  0xaf   : > { %p5985_p8 = pneg %p5984_p4 }
  0xb0   : > { %p5991_p12 = por %p5990_p7, %p5989_p5 }
  0xb2   : > { %p5992_p1 = pnand %p5991_p12, %p5985_p8 }
  0xb4   : > { %5995 = shalt.err (!%p5992_p1)
}
  0xb5   : > { %s5996_s2 = scalar_lea.vmem %s6395_s16, 3072  ;;  %s6102_s24 = smov [#allocation5]  }
  0xb6   : > { %p5997_p2 = scmp.ne.s32.totalorder %s6395_s16, %s5996_s2  ;;  %s6001_s20 = sshll.u32 %s6102_s24, 4  ;;  %s6002_s20 = int_to_ptr.vmem [resolvable:$false] %s6001_s20 }
  0xb7   : > { %s6003_s18 = scalar_lea.vmem %s6002_s20, 6144  ;;  %p6004_p4 = scmp.lt.s32.totalorder %s6395_s16, %s6002_s20 }
  0xb8   : > { %p5999_p13 = pnand %p5997_p2, %p5953_p9  ;;  %p6005_p6 = scmp.lt.s32.totalorder %s6003_s18, %s5996_s2 }
  0xba   : > { %p6000_p0 = pneg %p5999_p13  ;;  %p6006_p3 = por %p6005_p6, %p6004_p4 }
  0xbc   : > { %p6007_p5 = pnand %p6006_p3, %p6000_p0 }
  0xbe   : > { %6010 = shalt.err (!%p6007_p5)
}
  0xbf   : > { %5477 = dma.hbm_to_vmem [thread:$0]  (!%p6350_p11), %s6393_s0, 3072, %s6395_s16, %s6399_s3, %s7553_s23, %s7553_s23, %s7552_s21  }
  0xc0   : > { %p7555_p9 = scmp.ne.s32.totalorder %s7542_s17, 0 }
  0xc1   : > { %s6431_s6 = sand.u32 (!%p7555_p9), 1, %s6085_s10   ;;  %p7556_p8 = scmp.ne.s32.totalorder (!%p7555_p9), %s7539_s15, 0 }
  0xc2   : > { %380 = sbr.rel (%p7555_p9) target bundleno = 1800 (0x708), region = 56  ;;  %s4640_s26 = sshll.u32 (!%p7555_p9), %s6431_s6, 7 }
  0xc3   : > { %s383_s25 = scalar_lea.sflag (!%p7555_p9), [#allocation3], %s6431_s6  ;;  %s6435_s29 = scalar_lea.vmem (!%p7555_p9), [#allocation2], %s4640_s26 }
  0xc9   : > { %6056 = dma.done.wait (%p7556_p8), %s383_s25, 2048  }
  0xca   : > { %6058 = vsyncadd (%p7556_p8), %s383_s25, 4294965248  ;;  %s391_s0 = sand.u32 1, %s6180_s13   ;;  %s5435_s3 = smul.u32 192, %s6431_s6 }
  0xcb   : > { %s392_s17 = scalar_lea.sflag [#allocation6], %s391_s0 }
  0xcc   : > { %s6443_s9 = scalar_lea.vmem [#allocation5], %s5435_s3 }
  0xcd   : > { %6060 = dma.done.wait (%p7556_p8), %s392_s17, 3072  }
  0xce   : > { %6062 = vsyncadd (%p7556_p8), %s392_s17, 4294964224  ;;  %p7557_p11 = scmp.eq.s32.totalorder %s6180_s13, 0 }
  0xd0   : > { %6064 = dma.done.wait (%p7557_p11), [#allocation6], 512   ;;  %p7558_p7 = pmov %p7557_p11 }
  0xd2   : > { %6066 = vsyncadd (%p7558_p7), [#allocation6], 4294966784  ;;  %p7559_p12 = pmov %p7558_p7 }
  0xd3   : > { %p7560_p1 = pmov %p7558_p7 }
  0xd4   : > { %6068 = dma.done.wait (%p7559_p12), [#allocation9], 1024  }
  0xd5   : > { %6070 = vsyncadd (%p7560_p1), [#allocation9], 4294966272  ;;  %p7561_p2 = pmov %p7560_p1 }
  0xd6   : > { %p7562_p13 = pmov %p7560_p1 }
  0xd7   : > { %6072 = dma.done.wait (%p7561_p2), [#allocation12], 512  }
  0xd8   : > { %6074 = vsyncadd (%p7562_p13), [#allocation12], 4294966784  ;;  %vm497_vm0 = vcmask 261120   ;;  %v493_v0 = vld [vmem:[#allocation7] sm:$0xff]  ;;  %v494_v1 = vld [vmem:[#allocation7 + $0x8] sm:$0xff]  ;;  %s6103_s15 = smov 96  }
  0xd9   : > { %v495_v2 = vld [vmem:[#allocation7 + $0x10] sm:$0xff]  ;;  %v5301_v3 = vpack.c.bf16 %v494_v1, %v493_v0  ;;  %v496_v4 = vld [vmem:[#allocation7 + $0x18] sm:$0xff]  ;;  %v453_v5 = vld [vmem:[%s6435_s29] sm:$0xff]  ;;  %vm1872_vm2 = vcmask 195584   ;;  %vm6105_vm3 = vmmov 0   ;;  %vm2623_vm4 = vcmask 130048  }
  0xda   : > { %v5305_v6 = vpack.c.bf16 %v496_v4, %v495_v2  ;;  %4963 = vmatprep.mubr.msk.f32.mxu0 %vm497_vm0, %v453_v5  ;;  %v691_v7 = vld [vmem:[#allocation8] sm:$0xff]  ;;  %v692_v8 = vld [vmem:[#allocation8 + $0x8] sm:$0xff]  ;;  %v693_v9 = vld [vmem:[#allocation8 + $0x10] sm:$0xff]  ;;  %s6107_s16 = smov 32   ;;  %vm4298_vm5 = vcmask 1041409   ;;  %vm4300_vm6 = vcmask 1042434  }
  0xdb   : > { %5302 = vmatprep.subr.bf16.mxu0 %v5301_v3  ;;  %v694_v10 = vld [vmem:[#allocation8 + $0x18] sm:$0xff]  ;;  %v454_v11 = vld [vmem:[%s6435_s29 + $0x8] sm:$0xff]  ;;  %v5309_v12 = vpack.c.bf16 %v692_v8, %v691_v7  ;;  %v469_v14 = vld [vmem:[%s6443_s9] sm:$0xff]  ;;  %vm4302_vm7 = vcmask 1043459   ;;  %vm4304_vm8 = vcmask 1044484   ;;  %vm4306_vm9 = vcmask 1045509  }
  0xdc   : > { %5304 = vmatpush3.bf16.msra.mxu0 %v5301_v3  ;;  %v5313_v13 = vpack.c.bf16 %v694_v10, %v693_v9  ;;  %v470_v15 = vld [vmem:[%s6443_s9 + $0x8] sm:$0xff]  ;;  %v455_v16 = vld [vmem:[%s6435_s29 + $0x10] sm:$0xff]  ;;  %4995 = vmatprep.mubr.msk.f32.mxu1 %vm497_vm0, %v469_v14  ;;  %vm6470_vm1 = vmpackc.low %vm497_vm0, %vm497_vm0  ;;  %vm4308_vm10 = vcmask 1046534   ;;  %vm4310_vm11 = vcmask 1047559   ;;  %s4645_s30 = sshll.u32 %s6431_s6, 3  ;;  %s4772_s20 = sshll.u32 %s6180_s13, 7 }
  0xdd   : > { %5306 = vmatprep.subr.bf16.mxu0 %v5305_v6  ;;  %v5317_v17 = vpack.c.bf16 %v470_v15, %v469_v14  ;;  %5310 = vmatprep.subr.bf16.mxu1 %v5309_v12  ;;  %v475_v19 = vld [vmem:[%s6443_s9 + $0x30] sm:$0xff]  ;;  %v476_v20 = vld [vmem:[%s6443_s9 + $0x38] sm:$0xff]  ;;  %v457_v23 = vld [vmem:[%s6435_s29 + $0x20] sm:$0xff]  ;;  %s450_s18 = scalar_lea.vmem [#allocation13], %s4645_s30  ;;  %s7565_s0 = sld [smem:[#allocation26_spill]] }
  0xde   : > { %5312 = vmatpush3.bf16.msra.mxu1 %v5309_v12  ;;  %v456_v21 = vld [vmem:[%s6435_s29 + $0x18] sm:$0xff]  ;;  %v5329_v22 = vpack.c.bf16 %v476_v20, %v475_v19  ;;  %v458_v24 = vld [vmem:[%s6435_s29 + $0x28] sm:$0xff]  ;;  %v471_v25 = vld [vmem:[%s6443_s9 + $0x10] sm:$0xff]  ;;  %s4494_s26 = sshll.u32 %s450_s18, 4  ;;  %s4481_s17 = scalar_lea.sflag [#allocation4], %s6431_s6  ;;  %s7470_s26 = int_to_ptr.vmem [resolvable:$true] %s4494_s26 }
  0xdf   : > { %5314 = vmatprep.subr.bf16.mxu1 %v5313_v13  ;;  %v459_v26 = vld [vmem:[%s6435_s29 + $0x30] sm:$0xff]  ;;  %v472_v27 = vld [vmem:[%s6443_s9 + $0x18] sm:$0xff]  ;;  %v473_v29 = vld [vmem:[%s6443_s9 + $0x20] sm:$0xff]  ;;  %s6108_s13 = smov [#allocation13]  }
  0xe0   : > { %5308 = vmatpush3.bf16.msra.mxu0 %v5305_v6  ;;  %v460_v28 = vld [vmem:[%s6435_s29 + $0x38] sm:$0xff]  ;;  %v461_v30 = vld [vmem:[%s6435_s29 + $0x40] sm:$0xff]  ;;  %v6501_v31 = vpack.c.bf16 %v473_v29, %v472_v27  ;;  %v6506_v32 = vld [vmem:[%s6443_s9 + $0x28] sm:$0xff] }
  0xe1   : > { %5319 = vmatprep.subr.msk.bf16.mxu0 %vm6470_vm1, %v5317_v17  ;;  %v462_v33 = vld [vmem:[%s6435_s29 + $0x48] sm:$0xff]  ;;  %v477_v34 = vld [vmem:[%s6443_s9 + $0x40] sm:$0xff]  ;;  %v463_v35 = vld [vmem:[%s6435_s29 + $0x50] sm:$0xff] }
  0xe2   : > { %5316 = vmatpush3.bf16.msra.mxu1 %v5313_v13  ;;  %v464_v36 = vld [vmem:[%s6435_s29 + $0x58] sm:$0xff]  ;;  %v481_v37 = vld [vmem:[%s6443_s9 + $0x60] sm:$0xff]  ;;  %v482_v38 = vld [vmem:[%s6443_s9 + $0x68] sm:$0xff] }
  0xe3   : > { %4964 = vmatmul.mubr.msk.f32.vlgmr.msra.gmra.mrb[0].mxu0 %vm497_vm0, %v454_v11  ;;  %5331 = vmatprep.subr.msk.bf16.mxu1 %vm6470_vm1, %v5329_v22  ;;  %v465_v39 = vld [vmem:[%s6435_s29 + $0x60] sm:$0xff]  ;;  %v6528_v40 = vpack.c.bf16 %v482_v38, %v481_v37  ;;  %v478_v41 = vld [vmem:[%s6443_s9 + $0x48] sm:$0xff]  ;;  %v479_v43 = vld [vmem:[%s6443_s9 + $0x50] sm:$0xff]  ;;  %s7468_s3 = scalar_lea.hbm %s7565_s0, %s4772_s20 }
  0xe4   : > { %4966 = vmatprep.mubr.msk.f32.mxu0 %vm497_vm0, %v455_v16  ;;  %v466_v42 = vld [vmem:[%s6435_s29 + $0x68] sm:$0xff]  ;;  %v467_v44 = vld [vmem:[%s6435_s29 + $0x70] sm:$0xff]  ;;  %v6546_v45 = vld [vmem:[%s6443_s9 + $0x58] sm:$0xff]  ;;  %v5335_v2 = vpack.c.bf16 %v479_v43, %v478_v41 }
  0xe5   : > { %4996 = vmatmul.mubr.msk.f32.vlgmr.msra.gmra.mrb[0].mxu1 %vm497_vm0, %v470_v15  ;;  %v468_v46 = vld [vmem:[%s6435_s29 + $0x78] sm:$0xff]  ;;  %v6555_v47 = vld [vmem:[%s6443_s9 + $0x70] sm:$0xff]  ;;  %v6564_v49 = vld [vmem:[%s6443_s9 + $0x80] sm:$0xff] }
  0xe6   : > { %4998 = vmatprep.mubr.msk.f32.mxu1 %vm497_vm0, %v471_v25  ;;  %v6561_v48 = vld [vmem:[%s6443_s9 + $0x78] sm:$0xff]  ;;  %v6571_v50 = vld [vmem:[%s6443_s9 + $0x88] sm:$0xff]  ;;  %v487_v51 = vld [vmem:[%s6443_s9 + $0x90] sm:$0xff] }
  0xe7   : > { %4967 = vmatmul.mubr.msk.f32.gmra.mrb[2].mxu0 %vm497_vm0, %v456_v21  ;;  %v488_v52 = vld [vmem:[%s6443_s9 + $0x98] sm:$0xff]  ;;  %v6580_v53 = vld [vmem:[%s6443_s9 + $0xa0] sm:$0xff]  ;;  %v6585_v54 = vld [vmem:[%s6443_s9 + $0xa8] sm:$0xff] }
  0xe8   : > { %4969 = vmatprep.mubr.msk.f32.mxu0 %vm497_vm0, %v457_v23  ;;  %v6590_v55 = vld [vmem:[%s6443_s9 + $0xb0] sm:$0xff]  ;;  %v6595_v56 = vld [vmem:[%s6443_s9 + $0xb8] sm:$0xff]  ;;  %v5353_v14 = vpack.c.bf16 %v488_v52, %v487_v51 }
  0xe9   : > { %5322 = vmatpush3.bf16.xpose.msk.msra.mxu0 %vm6470_vm1, %v5317_v17  ;;  %4999 = vmatmul.mubr.msk.f32.gmra.mrb[2].mxu1 %vm497_vm0, %v472_v27 }
  0xea   : > { %5035 = vmatprep.subr.msk.mxu0 %vm497_vm0, %v471_v25  ;;  %5001 = vmatprep.mubr.msk.f32.mxu1 %vm497_vm0, %v473_v29 }
  0xeb   : > { %4970 = vmatmul.mubr.msk.f32.gmra.mrb[4].mxu0 %vm497_vm0, %v458_v24  ;;  %5334 = vmatpush3.bf16.xpose.msk.msra.mxu1 %vm6470_vm1, %v5329_v22  ;;  %v5347_v22 = vpack.c.bf16 %v6564_v49, %v6561_v48 }
  0xec   : > { %4972 = vmatprep.mubr.msk.f32.mxu0 %vm497_vm0, %v459_v26  ;;  %5053 = vmatprep.subr.msk.mxu1 %vm497_vm0, %v477_v34 }
  0xed   : > { %5002 = vmatmul.mubr.msk.f32.gmra.mrb[4].mxu1 %vm497_vm0, %v6506_v32 }
  0xee   : > { %5004 = vmatprep.mubr.msk.f32.mxu1 %vm497_vm0, %v475_v19 }
  0xef   : > { %4973 = vmatmul.mubr.msk.f32.gmra.mrb[6].mxu0 %vm497_vm0, %v460_v28 }
  0xf0   : > { %4975 = vmatprep.mubr.msk.f32.mxu0 %vm497_vm0, %v461_v30 }
  0xf1   : > { %5036 = vmatpush3.xpose.msk.msra.mxu0 %vm497_vm0, %v471_v25  ;;  %5005 = vmatmul.mubr.msk.f32.gmra.mrb[6].mxu1 %vm497_vm0, %v476_v20 }
  0xf2   : > { %5325 = vmatprep.subr.msk.bf16.mxu0 %vm6470_vm1, %v6501_v31  ;;  %5007 = vmatprep.mubr.msk.f32.mxu1 %vm497_vm0, %v477_v34 }
  0xf3   : > { %4976 = vmatmul.mubr.msk.f32.gmra.mrb[8].mxu0 %vm497_vm0, %v462_v33  ;;  %5054 = vmatpush3.xpose.msk.msra.mxu1 %vm497_vm0, %v477_v34 }
  0xf4   : > { %4978 = vmatprep.mubr.msk.f32.mxu0 %vm497_vm0, %v463_v35  ;;  %5343 = vmatprep.subr.msk.bf16.mxu1 %vm6470_vm1, %v6528_v40 }
  0xf5   : > { %5008 = vmatmul.mubr.msk.f32.gmra.mrb[8].mxu1 %vm497_vm0, %v478_v41 }
  0xf6   : > { %5010 = vmatprep.mubr.msk.f32.mxu1 %vm497_vm0, %v479_v43 }
  0xf7   : > { %4979 = vmatmul.mubr.msk.f32.gmra.mrb[10].mxu0 %vm497_vm0, %v464_v36 }
  0xf8   : > { %4981 = vmatprep.mubr.msk.f32.mxu0 %vm497_vm0, %v465_v39  ;;  %v5359_v39 = vpack.c.bf16 %v6590_v55, %v6585_v54 }
  0xf9   : > { %5011 = vmatmul.mubr.msk.f32.gmra.mrb[10].mxu1 %vm497_vm0, %v6546_v45 }
  0xfa   : > { %5013 = vmatprep.mubr.msk.f32.mxu1 %vm497_vm0, %v481_v37 }
  0xfb   : > { %4982 = vmatmul.mubr.msk.f32.gmra.mrb[12].mxu0 %vm497_vm0, %v466_v42 }
  0xfc   : > { %4984 = vmatprep.mubr.msk.f32.mxu0 %vm497_vm0, %v467_v44 }
  0xfd   : > { %5014 = vmatmul.mubr.msk.f32.gmra.mrb[12].mxu1 %vm497_vm0, %v482_v38 }
  0xfe   : > { %5016 = vmatprep.mubr.msk.f32.mxu1 %vm497_vm0, %v6555_v47 }
  0xff   : > { %4985 = vmatmul.mubr.msk.f32.gmra.mrb[14].mxu0 %vm497_vm0, %v468_v46 }
 0x101   : > { %5017 = vmatmul.mubr.msk.f32.gmra.mrb[14].mxu1 %vm497_vm0, %v6561_v48 }
 0x102   : > { %5019 = vmatprep.mubr.msk.f32.mxu1 %vm497_vm0, %v6564_v49 }
 0x105   : > { %5020 = vmatmul.mubr.msk.f32.gmra.mrb[16].mxu1 %vm497_vm0, %v6571_v50 }
 0x106   : > { %5022 = vmatprep.mubr.msk.f32.mxu1 %vm497_vm0, %v487_v51 }
 0x109   : > { %5023 = vmatmul.mubr.msk.f32.gmra.mrb[18].mxu1 %vm497_vm0, %v488_v52 }
 0x10a   : > { %5025 = vmatprep.mubr.msk.f32.mxu1 %vm497_vm0, %v6580_v53 }
 0x10d   : > { %5026 = vmatmul.mubr.msk.f32.gmra.mrb[20].mxu1 %vm497_vm0, %v6585_v54 }
 0x10e   : > { %5028 = vmatprep.mubr.msk.f32.mxu1 %vm497_vm0, %v6590_v55 }
 0x111   : > { %5029 = vmatmul.mubr.msk.f32.gmra.mrb[22].mxu1 %vm497_vm0, %v6595_v56 }
 0x1b6   : > { %v6599_v57 = vpop.f32.mrb[0].mxu0 }
 0x1b7   : > { %v6601_v58 = vpop.f32.mrb[1].mxu0 }
 0x1b8   : > { %5037 = vmatprep.mubr.msk.f32.mxu0 %vm497_vm0, %v6601_v58  ;;  %v5535_v59 = vpack.i.bf16 %v6599_v57, %v6601_v58  ;;  %v6623_v63 = vpop.f32.mrb[0].mxu1 }
 0x1b9   : > { %5038 = vmatmul.mubr.msk.f32.vlgmr.msra.gmra.mrb[16].mxu0 %vm497_vm0, %v6599_v57  ;;  %v6628_v1 = vpop.f32.mrb[1].mxu1 }
 0x1ba   : > { %5328 = vmatpush3.bf16.xpose.msk.msra.mxu0 %vm6470_vm1, %v6501_v31  ;;  %5536 = vrot.lane.b32.xlu0 %v5535_v59, %s6103_s15  ;;  %v6613_v60 = vpop.f32.mrb[2].mxu0  ;;  %v6634_v4 = vpack.c.bf16 %v6623_v63, %v6628_v1 }
 0x1bb   : > { %v6615_v61 = vpop.f32.mrb[3].mxu0  ;;  %5044 = vmatprep.subr.msk.mxu0 %vm497_vm0, %v6506_v32 }
 0x1bc   : > { %v5540_v62 = vpack.i.bf16 %v6613_v60, %v6615_v61  ;;  %5046 = vmatprep.mubr.msk.f32.mxu0 %vm497_vm0, %v6615_v61  ;;  %v6642_v6 = vpop.f32.mrb[2].mxu1 }
 0x1bd   : > { %v6651_v8 = vpop.f32.mrb[3].mxu1 }
 0x1be   : > { %v6625_v0 = vpop.f32.mrb[4].mxu0  ;;  %5541 = vrot.lane.b32.xlu0 %v5540_v62, %s6103_s15 }
 0x1bf   : > { %v6630_v3 = vpop.f32.mrb[5].mxu0 }
 0x1c0   : > { %5055 = vmatprep.mubr.msk.f32.mxu1 %vm497_vm0, %v6630_v3  ;;  %v5545_v5 = vpack.i.bf16 %v6625_v0, %v6630_v3  ;;  %v6664_v11 = vpop.f32.mrb[4].mxu1 }
 0x1c1   : > { %5056 = vmatmul.mubr.msk.f32.vlgmr.msra.gmra.mrb[24].mxu1 %vm497_vm0, %v6625_v0  ;;  %v6672_v13 = vpop.f32.mrb[5].mxu1 }
 0x1c2   : > { %5045 = vmatpush3.xpose.msk.msra.mxu0 %vm497_vm0, %v6506_v32  ;;  %5346 = vmatpush3.bf16.xpose.msk.msra.mxu1 %vm6470_vm1, %v6528_v40  ;;  %v6649_v7 = vpop.f32.mrb[6].mxu0  ;;  %v6680_v16 = vpack.c.bf16 %v6672_v13, %v6642_v6 }
 0x1c3   : > { %5337 = vmatprep.subr.msk.bf16.mxu0 %vm6470_vm1, %v5335_v2  ;;  %v6655_v9 = vpop.f32.mrb[7].mxu0  ;;  %5071 = vmatprep.subr.msk.mxu1 %vm497_vm0, %v6555_v47 }
 0x1c4   : > { %v5550_v10 = vpack.i.bf16 %v6649_v7, %v6655_v9  ;;  %5546 = vrot.lane.b32.xlu1 %v5545_v5, %s6103_s15  ;;  %v6687_v19 = vpop.f32.mrb[6].mxu1 }
 0x1c5   : > { %5047 = vmatmul.mubr.msk.f32.vlgmr.msra.gmra.mrb[18].mxu0 %vm497_vm0, %v6613_v60  ;;  %v6694_v21 = vpop.f32.mrb[7].mxu1 }
 0x1c6   : > { %5340 = vmatpush3.bf16.xpose.msk.msra.mxu0 %vm6470_vm1, %v5335_v2  ;;  %v6668_v12 = vpop.f32.mrb[8].mxu0  ;;  %5064 = vmatprep.mubr.msk.f32.mxu0 %vm497_vm0, %v6655_v9  ;;  %v5373_v24 = vpack.c.bf16 %v6687_v19, %v6694_v21 }
 0x1c7   : > { %v6674_v15 = vpop.f32.mrb[9].mxu0  ;;  %5062 = vmatprep.subr.msk.mxu0 %vm497_vm0, %v6546_v45 }
 0x1c8   : > { %v5555_v17 = vpack.i.bf16 %v6668_v12, %v6674_v15  ;;  %5073 = vmatprep.mubr.msk.f32.mxu1 %vm497_vm0, %v6674_v15  ;;  %5551 = vrot.lane.b32.xlu1 %v5550_v10, %s6103_s15  ;;  %v6708_v26 = vpop.f32.mrb[8].mxu1 }
 0x1c9   : > { %v6716_v28 = vpop.f32.mrb[9].mxu1 }
 0x1ca   : > { %5072 = vmatpush3.xpose.msk.msra.mxu1 %vm497_vm0, %v6555_v47  ;;  %v6691_v20 = vpop.f32.mrb[10].mxu0  ;;  %5556 = vrot.lane.b32.xlu0 %v5555_v17, %s6103_s15 }
 0x1cb   : > { %5355 = vmatprep.subr.msk.bf16.mxu1 %vm6470_vm1, %v5353_v14  ;;  %v6700_v23 = vpop.f32.mrb[11].mxu0 }
 0x1cc   : > { %v5560_v25 = vpack.i.bf16 %v6691_v20, %v6700_v23  ;;  %v6731_v31 = vpop.f32.mrb[10].mxu1 }
 0x1cd   : > { %5074 = vmatmul.mubr.msk.f32.vlgmr.msra.gmra.mrb[26].mxu1 %vm497_vm0, %v6668_v12  ;;  %v6739_v33 = vpop.f32.mrb[11].mxu1 }
 0x1ce   : > { %5063 = vmatpush3.xpose.msk.msra.mxu0 %vm497_vm0, %v6546_v45  ;;  %5358 = vmatpush3.bf16.xpose.msk.msra.mxu1 %vm6470_vm1, %v5353_v14  ;;  %v6714_v27 = vpop.f32.mrb[12].mxu0  ;;  %v6748_v35 = vpack.c.bf16 %v6739_v33, %v6708_v26 }
 0x1cf   : > { %5349 = vmatprep.subr.msk.bf16.mxu0 %vm6470_vm1, %v5347_v22  ;;  %5089 = vmatprep.subr.msk.mxu1 %vm497_vm0, %v6580_v53  ;;  %v6722_v29 = vpop.f32.mrb[13].mxu0 }
 0x1d0   : > { %v5565_v30 = vpack.i.bf16 %v6714_v27, %v6722_v29  ;;  %5091 = vmatprep.mubr.msk.f32.mxu1 %vm497_vm0, %v6722_v29  ;;  %5561 = vrot.lane.b32.xlu1 %v5560_v25, %s6103_s15  ;;  %v6752_v37 = vpop.f32.mrb[12].mxu1 }
 0x1d1   : > { %5065 = vmatmul.mubr.msk.f32.vlgmr.msra.gmra.mrb[20].mxu0 %vm497_vm0, %v6649_v7  ;;  %v6756_v38 = vpop.f32.mrb[13].mxu1 }
 0x1d2   : > { %5352 = vmatpush3.bf16.xpose.msk.msra.mxu0 %vm6470_vm1, %v5347_v22  ;;  %5082 = vmatprep.mubr.msk.f32.mxu0 %vm497_vm0, %v6700_v23  ;;  %v6737_v32 = vpop.f32.mrb[14].mxu0  ;;  %v6762_v40 = vpack.c.bf16 %v6752_v37, %v6756_v38 }
 0x1d3   : > { %5080 = vmatprep.subr.msk.mxu0 %vm497_vm0, %v6571_v50  ;;  %v6743_v34 = vpop.f32.mrb[15].mxu0  ;;  %5566 = vrot.lane.b32.xlu0 %v5565_v30, %s6103_s15 }
 0x1d4   : > { %v5570_v36 = vpack.i.bf16 %v6737_v32, %v6743_v34  ;;  %v6767_v41 = vpop.f32.mrb[14].mxu1 }
 0x1d5   : > { %v6771_v42 = vpop.f32.mrb[15].mxu1 }
 0x1d6   : > { %5090 = vmatpush3.xpose.msk.msra.mxu1 %vm497_vm0, %v6580_v53 }
 0x1d7   : > { %5366 = vmatprep.subr.bf16.mxu1 %v6634_v4 }
 0x1d8   : > { %v6779_v43 = vpop.f32.mrb[16].mxu1 }
 0x1d9   : > { %5092 = vmatmul.mubr.msk.f32.vlgmr.msra.gmra.mrb[28].mxu1 %vm497_vm0, %v6714_v27  ;;  %v6796_v18 = vpop.f32.mrb[17].mxu1 }
 0x1da   : > { %5081 = vmatpush3.xpose.msk.msra.mxu0 %vm497_vm0, %v6571_v50  ;;  %5368 = vmatpush3.bf16.msra.mxu1 %v6634_v4  ;;  %v6800_v44 = vpack.c.bf16 %v6796_v18, %v6767_v41 }
 0x1db   : > { %5361 = vmatprep.subr.msk.bf16.mxu0 %vm6470_vm1, %v5359_v39  ;;  %5107 = vmatprep.subr.mxu1 %v6651_v8 }
 0x1dc   : > { %v6802_v45 = vpop.f32.mrb[18].mxu1 }
 0x1dd   : > { %5083 = vmatmul.mubr.msk.f32.vlgmr.msra.gmra.mrb[22].mxu0 %vm497_vm0, %v6691_v20  ;;  %v6804_v46 = vpop.f32.mrb[19].mxu1 }
 0x1de   : > { %5364 = vmatpush3.bf16.xpose.msk.msra.mxu0 %vm6470_vm1, %v5359_v39  ;;  %5100 = vmatprep.mubr.msk.f32.mxu0 %vm497_vm0, %v6743_v34  ;;  %v6808_v47 = vpack.c.bf16 %v6802_v45, %v6804_v46 }
 0x1df   : > { %5098 = vmatprep.subr.msk.mxu0 %vm497_vm0, %v6595_v56  ;;  %5108 = vmatpush3.msra.mxu1 %v6651_v8 }
 0x1e0   : > { %5370 = vmatprep.subr.bf16.mxu1 %v6680_v16  ;;  %v6810_v48 = vpop.f32.mrb[20].mxu1 }
 0x1e1   : > { %v6812_v49 = vpop.f32.mrb[21].mxu1 }
 0x1e4   : > { %v6814_v50 = vpop.f32.mrb[22].mxu1 }
 0x1e5   : > { %v6816_v51 = vpop.f32.mrb[23].mxu1 }
 0x1e6   : > { %5099 = vmatpush3.xpose.msk.msra.mxu0 %vm497_vm0, %v6595_v56  ;;  %v6820_v52 = vpack.c.bf16 %v6816_v51, %v6810_v48 }
 0x1e7   : > { %5374 = vmatprep.subr.bf16.mxu0 %v5373_v24 }
 0x1e9   : > { %5101 = vmatmul.mubr.msk.f32.vlgmr.msra.gmra.mrb[24].mxu0 %vm497_vm0, %v6737_v32 }
 0x1ea   : > { %5376 = vmatpush3.bf16.msra.mxu0 %v5373_v24 }
 0x1eb   : > { %5125 = vmatprep.subr.mxu0 %v6716_v28 }
 0x1ee   : > { %5126 = vmatpush3.msra.mxu0 %v6716_v28 }
 0x1ef   : > { %5382 = vmatprep.subr.bf16.mxu0 %v6762_v40 }
 0x28c   : > { %v5039_v53 = vpop.f32.mrb[16].mxu0 }
 0x28d   : > { %v1024_v54 = vpop.f32.mrb[17].mxu0 }
 0x28e   : > { %5575 = vtanh.f32 %v1024_v54 }
 0x28f   : > { %5577 = vtanh.f32 %v5039_v53 }
 0x294   : > { %v5057_v55 = vpop.f32.mrb[24].mxu1 }
 0x295   : > { %5579 = vtanh.f32 %v5057_v55  ;;  %v1186_v56 = vpop.f32.mrb[25].mxu1 }
 0x296   : > { %5581 = vtanh.f32 %v1186_v56 }
 0x298   : > { %v5576_v59 = vpop.eup %5575  ;;  %v5048_v62 = vpop.f32.mrb[18].mxu0 }
 0x299   : > { %v5578_v2 = vpop.eup %5577  ;;  %v1105_v4 = vpop.f32.mrb[19].mxu0  ;;  %1616 = vxpose.xlu0.b32.start [1/2] (short) (narrow) %v5576_v59, 24  ;;  %5109 = vmatprep.mubr.msk.f32.mxu1 %vm1872_vm2, %v5576_v59 }
 0x29a   : > { %5583 = vtanh.f32 %v1105_v4  ;;  %5110 = vmatmul.mubr.msk.f32.vlgmr.msra.gmra.mrb[30].mxu1 %vm1872_vm2, %v5578_v2  ;;  %v5537_v59 = vpop.permute.xlu0 %5536 }
 0x29b   : > { %5585 = vtanh.f32 %v5048_v62  ;;  %5372 = vmatpush3.bf16.msra.mxu1 %v6680_v16  ;;  %v6104_v62 = vmov 0.0|0.0  }
 0x29c   : > { %5116 = vmatprep.subr.mxu1 %v6664_v11 }
 0x29d   : > { %1617 = vxpose.xlu0.b32.end [2/2] (short) (narrow) %v5578_v2, 24  ;;  %v5538_v2 = vunpack.i.l.bf16 %v5537_v59 }
 0x29f   : > { %v5580_v5 = vpop.eup %5579  ;;  %5117 = vmatpush3.msra.mxu1 %v6664_v11 }
 0x2a0   : > { %v5582_v10 = vpop.eup %5581  ;;  %v5075_v14 = vpop.f32.mrb[26].mxu1  ;;  %5378 = vmatprep.subr.bf16.mxu1 %v6748_v35 }
 0x2a1   : > { %5587 = vtanh.f32 %v5075_v14  ;;  %v1348_v17 = vpop.f32.mrb[27].mxu1  ;;  %5127 = vmatprep.mubr.msk.f32.mxu0 %vm1872_vm2, %v5582_v10 }
 0x2a2   : > { %5589 = vtanh.f32 %v1348_v17  ;;  %5128 = vmatmul.mubr.msk.f32.vlgmr.msra.gmra.mrb[26].mxu0 %vm1872_vm2, %v5580_v5  ;;  %1680 = vxpose.xlu0.b32.start [1/2] (short) (narrow) %v5582_v10, 24 }
 0x2a3   : > { %5384 = vmatpush3.bf16.msra.mxu0 %v6762_v40 }
 0x2a4   : > { %v5584_v16 = vpop.eup %5583  ;;  %v5066_v22 = vpop.f32.mrb[20].mxu0  ;;  %5143 = vmatprep.subr.mxu0 %v6771_v42 }
 0x2a5   : > { %v5586_v24 = vpop.eup %5585  ;;  %5591 = vtanh.f32 %v5066_v22  ;;  %1648 = vxpose.xlu1.b32.start [1/2] (short) (narrow) %v5584_v16, 24  ;;  %v1267_v25 = vpop.f32.mrb[21].mxu0  ;;  %5118 = vmatprep.mubr.msk.f32.mxu1 %vm1872_vm2, %v5584_v16 }
 0x2a6   : > { %5593 = vtanh.f32 %v1267_v25  ;;  %5119 = vmatmul.mubr.msk.f32.vlgmr.msra.gmra.mrb[32].mxu1 %vm1872_vm2, %v5586_v24  ;;  %1681 = vxpose.xlu0.b32.end [2/2] (short) (narrow) %v5580_v5, 24 }
 0x2a7   : > { %5380 = vmatpush3.bf16.msra.mxu1 %v6748_v35  ;;  %5144 = vmatpush3.msra.mxu0 %v6771_v42 }
 0x2a8   : > { %5134 = vmatprep.subr.mxu1 %v6731_v31  ;;  %5390 = vmatprep.subr.bf16.mxu0 %v6808_v47 }
 0x2a9   : > { %1649 = vxpose.xlu1.b32.end [2/2] (short) (narrow) %v5586_v24, 24  ;;  %v5542_v24 = vpop.permute.xlu0 %5541 }
 0x2aa   : > { %v5544_v25 = vunpack.i.h.bf16 %v5542_v24 }
 0x2ab   : > { %v5588_v30 = vpop.eup %5587  ;;  %5135 = vmatpush3.msra.mxu1 %v6731_v31 }
 0x2ac   : > { %v5590_v39 = vpop.eup %5589  ;;  %v5093_v40 = vpop.f32.mrb[28].mxu1  ;;  %5386 = vmatprep.subr.bf16.mxu1 %v6800_v44 }
 0x2ad   : > { %5595 = vtanh.f32 %v5093_v40  ;;  %v1510_v53 = vpop.f32.mrb[29].mxu1  ;;  %5145 = vmatprep.mubr.msk.f32.mxu0 %vm1872_vm2, %v5590_v39  ;;  %1744 = vxpose.xlu0.b32.start [1/2] (short) (narrow) %v5590_v39, 24 }
 0x2ae   : > { %5597 = vtanh.f32 %v1510_v53  ;;  %5146 = vmatmul.mubr.msk.f32.vlgmr.msra.gmra.mrb[28].mxu0 %vm1872_vm2, %v5588_v30 }
 0x2af   : > { %v5592_v35 = vpop.eup %5591  ;;  %5392 = vmatpush3.bf16.msra.mxu0 %v6808_v47  ;;  %v5539_v47 = vunpack.i.h.bf16 %v5537_v59 }
 0x2b0   : > { %v5594_v54 = vpop.eup %5593  ;;  %v5084_v55 = vpop.f32.mrb[22].mxu0  ;;  %5161 = vmatprep.subr.mxu0 %v6812_v49 }
 0x2b1   : > { %5599 = vtanh.f32 %v5084_v55  ;;  %v1429_v56 = vpop.f32.mrb[23].mxu0  ;;  %5136 = vmatprep.mubr.msk.f32.mxu1 %vm1872_vm2, %v5594_v54  ;;  %1745 = vxpose.xlu0.b32.end [2/2] (short) (narrow) %v5588_v30, 24  ;;  %v5398_v10 = vpack.c.bf16 %v5539_v47, %v5538_v2  ;;  %v5543_v30 = vunpack.i.l.bf16 %v5542_v24  ;;  %v5547_v55 = vpop.permute.xlu1 %5546 }
 0x2b2   : > { %5601 = vtanh.f32 %v1429_v56  ;;  %5137 = vmatmul.mubr.msk.f32.vlgmr.msra.gmra.mrb[34].mxu1 %vm1872_vm2, %v5592_v35  ;;  %v5549_v56 = vunpack.i.h.bf16 %v5547_v55  ;;  %v5548_v59 = vunpack.i.l.bf16 %v5547_v55 }
 0x2b3   : > { %5162 = vmatpush3.msra.mxu0 %v6812_v49  ;;  %5388 = vmatpush3.bf16.msra.mxu1 %v6800_v44  ;;  %v6106_v44 = vmov 0.0   ;;  %v5401_v53 = vpack.c.bf16 %v5544_v25, %v5543_v30 }
 0x2b4   : > { %5397 = vmatprep.subr.bf16.mxu0 %v6104_v62  ;;  %5152 = vmatprep.subr.mxu1 %v6779_v43  ;;  %v5404_v2 = vpack.c.bf16 %v5549_v56, %v5548_v59 }
 0x2b7   : > { %v5596_v4 = vpop.eup %5595  ;;  %5153 = vmatpush3.msra.mxu1 %v6779_v43 }
 0x2b8   : > { %v5598_v5 = vpop.eup %5597  ;;  %5394 = vmatprep.subr.bf16.mxu1 %v6820_v52 }
 0x2b9   : > { %5163 = vmatprep.mubr.msk.f32.mxu0 %vm1872_vm2, %v5598_v5 }
 0x2ba   : > { %5164 = vmatmul.mubr.msk.f32.vlgmr.msra.gmra.mrb[30].mxu0 %vm1872_vm2, %v5596_v4 }
 0x2bb   : > { %v5600_v14 = vpop.eup %5599  ;;  %5399 = vmatpush3.bf16.msra.mxu0 %v5398_v10  ;;  %5179 = vmatprep.mubr.msk.f32.mxu0 %vm6105_vm3, %v6106_v44 }
 0x2bc   : > { %v5602_v17 = vpop.eup %5601  ;;  %v5102_v16 = vpop.f32.mrb[24].mxu0  ;;  %5403 = vmatprep.subr.bf16.mxu0 %v6104_v62 }
 0x2bd   : > { %5603 = vtanh.f32 %v5102_v16  ;;  %v1591_v22 = vpop.f32.mrb[25].mxu0  ;;  %5154 = vmatprep.mubr.msk.f32.mxu1 %vm1872_vm2, %v5602_v17  ;;  %1776 = vxpose.xlu0.b32.start [1/2] (short) (narrow) %v5602_v17, 24 }
 0x2be   : > { %5605 = vtanh.f32 %v1591_v22  ;;  %5155 = vmatmul.mubr.msk.f32.vlgmr.msra.gmra.mrb[36].mxu1 %vm1872_vm2, %v5600_v14 }
 0x2bf   : > { %5396 = vmatpush3.bf16.msra.mxu1 %v6820_v52  ;;  %v5557_v52 = vpop.permute.xlu0 %5556 }
 0x2c0   : > { %5170 = vmatprep.subr.mxu1 %v6814_v50  ;;  %v5558_v17 = vunpack.i.l.bf16 %v5557_v52 }
 0x2c1   : > { %1777 = vxpose.xlu0.b32.end [2/2] (short) (narrow) %v5600_v14, 24  ;;  %v5559_v14 = vunpack.i.h.bf16 %v5557_v52 }
 0x2c3   : > { %5171 = vmatpush3.msra.mxu1 %v6814_v50  ;;  %v5567_v47 = vpop.permute.xlu0 %5566  ;;  %v5410_v25 = vpack.c.bf16 %v5559_v14, %v5558_v17 }
 0x2c4   : > { %5400 = vmatprep.subr.bf16.mxu1 %v6104_v62  ;;  %v5569_v52 = vunpack.i.h.bf16 %v5567_v47  ;;  %v5568_v55 = vunpack.i.l.bf16 %v5567_v47 }
 0x2c7   : > { %v5604_v39 = vpop.eup %5603 }
 0x2c8   : > { %v5606_v40 = vpop.eup %5605 }
 0x2c9   : > { %5172 = vmatprep.mubr.msk.f32.mxu1 %vm1872_vm2, %v5606_v40  ;;  %1840 = vxpose.xlu0.b32.start [1/2] (short) (narrow) %v5606_v40, 24 }
 0x2ca   : > { %5173 = vmatmul.mubr.msk.f32.vlgmr.msra.gmra.mrb[38].mxu1 %vm1872_vm2, %v5604_v39 }
 0x2cb   : > { %5402 = vmatpush3.bf16.msra.mxu1 %v5401_v53  ;;  %5571 = vrot.lane.b32.xlu1 %v5570_v36, %s6103_s15  ;;  %v5552_v36 = vpop.permute.xlu1 %5551 }
 0x2cc   : > { %5192 = vmatprep.mubr.msk.f32.mxu1 %vm6105_vm3, %v6106_v44  ;;  %5406 = vmatprep.subr.bf16.mxu1 %v6104_v62 }
 0x2cd   : > { %1841 = vxpose.xlu0.b32.end [2/2] (short) (narrow) %v5604_v39, 24 }
 0x2cf   : > { %v5562_v16 = vpop.permute.xlu1 %5561 }
 0x2f4   : > { %1712 = vxpose.xlu1.b32.start [1/2] (short) (narrow) %v5594_v54, 24  ;;  %v4766_v54 = vld [vmem:[%s7517_s4] ss:$0 sm:$0xff] }
 0x2f8   : > { %1713 = vxpose.xlu1.b32.end [2/2] (short) (narrow) %v5592_v35, 24 }
 0x2fd   : > { %1808 = vxpose.xlu1.b32.start [1/2] (short) (narrow) %v5598_v5, 24  ;;  %v5553_v5 = vunpack.i.l.bf16 %v5552_v36 }
 0x301   : > { %1809 = vxpose.xlu1.b32.end [2/2] (short) (narrow) %v5596_v4, 24  ;;  %v5554_v4 = vunpack.i.h.bf16 %v5552_v36 }
 0x303   : > { %v5407_v24 = vpack.c.bf16 %v5554_v4, %v5553_v5  ;;  %v5564_v4 = vunpack.i.h.bf16 %v5562_v16  ;;  %v5563_v5 = vunpack.i.l.bf16 %v5562_v16 }
 0x305   : > { %v5413_v17 = vpack.c.bf16 %v5564_v4, %v5563_v5 }
 0x319   : > { %v1632_v10 = vpop.trf.xlu0 }
 0x31a   : > { %5180 = vmatmul.mubr.msk.f32.vlgmr.msra.gmra.mrb[32].mxu0 %vm2623_vm4, %v1632_v10 }
 0x31b   : > { %5405 = vmatpush3.bf16.msra.mxu0 %v5404_v2  ;;  %5182 = vmatprep.mubr.msk.f32.mxu0 %vm6105_vm3, %v6106_v44  ;;  %v5416_v2 = vpack.c.bf16 %v5569_v52, %v5568_v55 }
 0x31c   : > { %5409 = vmatprep.subr.bf16.mxu0 %v6104_v62 }
 0x31d   : > { %v1633_v35 = vpop.trf.xlu0 }
 0x31e   : > { %5183 = vmatmul.mubr.msk.f32.gmra.mrb[34].mxu0 %vm2623_vm4, %v1633_v35 }
 0x31f   : > { %5185 = vmatprep.mubr.msk.f32.mxu0 %vm6105_vm3, %v6106_v44 }
 0x321   : > { %v1634_v22 = vpop.trf.xlu0 }
 0x322   : > { %5186 = vmatmul.mubr.msk.f32.gmra.mrb[36].mxu0 %vm2623_vm4, %v1634_v22 }
 0x323   : > { %5205 = vmatprep.mubr.msk.f32.mxu0 %vm6105_vm3, %v6106_v44  ;;  %3432 = vrot.lane.b32.xlu1 %v4766_v54, %s6107_s16 }
 0x325   : > { %v1664_v30 = vpop.trf.xlu1  ;;  %v1696_v39 = vpop.trf.xlu0 }
 0x326   : > { %5193 = vmatmul.mubr.msk.f32.vlgmr.msra.gmra.mrb[40].mxu1 %vm2623_vm4, %v1664_v30  ;;  %5206 = vmatmul.mubr.msk.f32.vlgmr.msra.gmra.mrb[38].mxu0 %vm2623_vm4, %v1696_v39 }
 0x327   : > { %5408 = vmatpush3.bf16.msra.mxu1 %v5407_v24  ;;  %5411 = vmatpush3.bf16.msra.mxu0 %v5410_v25 }
 0x328   : > { %5195 = vmatprep.mubr.msk.f32.mxu1 %vm6105_vm3, %v6106_v44  ;;  %5208 = vmatprep.mubr.msk.f32.mxu0 %vm6105_vm3, %v6106_v44 }
 0x329   : > { %v1665_v40 = vpop.trf.xlu1  ;;  %v1697_v53 = vpop.trf.xlu0  ;;  %5415 = vmatprep.subr.bf16.mxu0 %v6104_v62  ;;  %5412 = vmatprep.subr.bf16.mxu1 %v6104_v62 }
 0x32a   : > { %5196 = vmatmul.mubr.msk.f32.gmra.mrb[42].mxu1 %vm2623_vm4, %v1665_v40  ;;  %5209 = vmatmul.mubr.msk.f32.gmra.mrb[40].mxu0 %vm2623_vm4, %v1697_v53 }
 0x32b   : > { %5198 = vmatprep.mubr.msk.f32.mxu1 %vm6105_vm3, %v6106_v44  ;;  %5211 = vmatprep.mubr.msk.f32.mxu0 %vm6105_vm3, %v6106_v44 }
 0x32d   : > { %v1666_v56 = vpop.trf.xlu1  ;;  %v1698_v59 = vpop.trf.xlu0 }
 0x32e   : > { %5199 = vmatmul.mubr.msk.f32.gmra.mrb[44].mxu1 %vm2623_vm4, %v1666_v56  ;;  %5212 = vmatmul.mubr.msk.f32.gmra.mrb[42].mxu0 %vm2623_vm4, %v1698_v59 }
 0x32f   : > { %5231 = vmatprep.mubr.msk.f32.mxu0 %vm6105_vm3, %v6106_v44  ;;  %5218 = vmatprep.mubr.msk.f32.mxu1 %vm6105_vm3, %v6106_v44 }
 0x331   : > { %v1760_v10 = vpop.trf.xlu0 }
 0x332   : > { %5232 = vmatmul.mubr.msk.f32.vlgmr.msra.gmra.mrb[44].mxu0 %vm2623_vm4, %v1760_v10 }
 0x333   : > { %5417 = vmatpush3.bf16.msra.mxu0 %v5416_v2  ;;  %5234 = vmatprep.mubr.msk.f32.mxu0 %vm6105_vm3, %v6106_v44 }
 0x334   : > { %5421 = vmatprep.subr.bf16.mxu0 %v6104_v62 }
 0x335   : > { %v1761_v47 = vpop.trf.xlu0 }
 0x336   : > { %5235 = vmatmul.mubr.msk.f32.gmra.mrb[46].mxu0 %vm2623_vm4, %v1761_v47 }
 0x337   : > { %5237 = vmatprep.mubr.msk.f32.mxu0 %vm6105_vm3, %v6106_v44 }
 0x339   : > { %v1762_v36 = vpop.trf.xlu0 }
 0x33a   : > { %5238 = vmatmul.mubr.msk.f32.gmra.mrb[48].mxu0 %vm2623_vm4, %v1762_v36 }
 0x33b   : > { %5257 = vmatprep.mubr.msk.f32.mxu0 %vm6105_vm3, %v6106_v44 }
 0x33d   : > { %v5572_v14 = vpop.permute.xlu1 %5571  ;;  %v1792_v24 = vpop.trf.xlu0 }
 0x33e   : > { %v5574_v52 = vunpack.i.h.bf16 %v5572_v14  ;;  %v5573_v55 = vunpack.i.l.bf16 %v5572_v14 }
 0x340   : > { %v5419_v59 = vpack.c.bf16 %v5574_v52, %v5573_v55 }
 0x341   : > { %v1793_v53 = vpop.trf.xlu0 }
 0x345   : > { %v1794_v10 = vpop.trf.xlu0 }
 0x349   : > { %v1856_v5 = vpop.trf.xlu0 }
 0x36d   : > { %v5111_v35 = vpop.f32.mrb[30].mxu1 }
 0x36e   : > { %v1945_v54 = vpop.f32.mrb[31].mxu1  ;;  %2539 = vrot.lane.b32.xlu0 %v5111_v35, %s6107_s16 }
 0x36f   : > { %2537 = vrot.lane.b32.xlu1 %v1945_v54, %s6107_s16 }
 0x374   : > { %v1728_v22 = vpop.trf.xlu1 }
 0x375   : > { %5219 = vmatmul.mubr.msk.f32.vlgmr.msra.gmra.mrb[46].mxu1 %vm2623_vm4, %v1728_v22  ;;  %v5129_v25 = vpop.f32.mrb[26].mxu0 }
 0x376   : > { %5414 = vmatpush3.bf16.msra.mxu1 %v5413_v17  ;;  %2547 = vrot.lane.b32.xlu1 %v5129_v25, %s6107_s16  ;;  %v2107_v30 = vpop.f32.mrb[27].mxu0  ;;  %v1857_v17 = vpop.trf.xlu0 }
 0x377   : > { %5221 = vmatprep.mubr.msk.f32.mxu1 %vm6105_vm3, %v6106_v44  ;;  %5418 = vmatprep.subr.bf16.mxu1 %v6104_v62 }
 0x378   : > { %v1729_v39 = vpop.trf.xlu1 }
 0x379   : > { %v5120_v40 = vpop.f32.mrb[32].mxu1  ;;  %5222 = vmatmul.mubr.msk.f32.gmra.mrb[48].mxu1 %vm2623_vm4, %v1729_v39 }
 0x37a   : > { %v2026_v16 = vpop.f32.mrb[33].mxu1  ;;  %2545 = vrot.lane.b32.xlu1 %v2107_v30, %s6107_s16  ;;  %5224 = vmatprep.mubr.msk.f32.mxu1 %vm6105_vm3, %v6106_v44  ;;  %v1858_v39 = vpop.trf.xlu0 }
 0x37c   : > { %v1730_v56 = vpop.trf.xlu1 }
 0x37d   : > { %5225 = vmatmul.mubr.msk.f32.gmra.mrb[50].mxu1 %vm2623_vm4, %v1730_v56 }
 0x37e   : > { %2543 = vrot.lane.b32.xlu1 %v5120_v40, %s6107_s16  ;;  %5244 = vmatprep.mubr.msk.f32.mxu1 %vm6105_vm3, %v6106_v44 }
 0x380   : > { %v1824_v2 = vpop.trf.xlu1 }
 0x381   : > { %v5147_v47 = vpop.f32.mrb[28].mxu0  ;;  %5245 = vmatmul.mubr.msk.f32.vlgmr.msra.gmra.mrb[52].mxu1 %vm2623_vm4, %v1792_v24  ;;  %5258 = vmatmul.mubr.msk.f32.vlgmr.msra.gmra.mrb[50].mxu0 %vm2623_vm4, %v1824_v2 }
 0x382   : > { %5420 = vmatpush3.bf16.msra.mxu1 %v5419_v59  ;;  %2555 = vrot.lane.b32.xlu0 %v5147_v47, %s6107_s16  ;;  %v2269_v36 = vpop.f32.mrb[29].mxu0 }
 0x383   : > { %2541 = vrot.lane.b32.xlu1 %v2026_v16, %s6107_s16  ;;  %5260 = vmatprep.mubr.msk.f32.mxu0 %vm6105_vm3, %v6106_v44 }
 0x384   : > { %v1825_v35 = vpop.trf.xlu1  ;;  %5247 = vmatprep.mubr.msk.f32.mxu1 %vm6105_vm3, %v6106_v44  ;;  %5427 = vmatprep.subr.bf16.mxu1 %v6104_v62 }
 0x385   : > { %v5138_v54 = vpop.f32.mrb[34].mxu1  ;;  %5248 = vmatmul.mubr.msk.f32.gmra.mrb[54].mxu1 %vm2623_vm4, %v1793_v53  ;;  %5261 = vmatmul.mubr.msk.f32.gmra.mrb[52].mxu0 %vm2623_vm4, %v1825_v35 }
 0x386   : > { %2551 = vrot.lane.b32.xlu0 %v5138_v54, %s6107_s16  ;;  %5263 = vmatprep.mubr.msk.f32.mxu0 %vm6105_vm3, %v6106_v44  ;;  %v2188_v4 = vpop.f32.mrb[35].mxu1 }
 0x387   : > { %2553 = vrot.lane.b32.xlu1 %v2269_v36, %s6107_s16  ;;  %5250 = vmatprep.mubr.msk.f32.mxu1 %vm6105_vm3, %v6106_v44 }
 0x388   : > { %v1826_v14 = vpop.trf.xlu1 }
 0x389   : > { %5251 = vmatmul.mubr.msk.f32.gmra.mrb[56].mxu1 %vm2623_vm4, %v1794_v10  ;;  %5264 = vmatmul.mubr.msk.f32.gmra.mrb[54].mxu0 %vm2623_vm4, %v1826_v14 }
 0x38a   : > { %5270 = vmatprep.mubr.msk.f32.mxu1 %vm6105_vm3, %v6106_v44  ;;  %5287 = vmatprep.mubr.msk.f32.mxu0 %vm6105_vm3, %v6106_v44 }
 0x38b   : > { %2549 = vrot.lane.b32.xlu1 %v2188_v4, %s6107_s16 }
 0x38d   : > { %v5165_v22 = vpop.f32.mrb[30].mxu0  ;;  %5271 = vmatmul.mubr.msk.f32.vlgmr.msra.gmra.mrb[58].mxu1 %vm2623_vm4, %v1856_v5 }
 0x38e   : > { %v2431_v24 = vpop.f32.mrb[31].mxu0  ;;  %2563 = vrot.lane.b32.xlu0 %v5165_v22, %s6107_s16  ;;  %5273 = vmatprep.mubr.msk.f32.mxu1 %vm6105_vm3, %v6106_v44 }
 0x38f   : > { %2561 = vrot.lane.b32.xlu1 %v2431_v24, %s6107_s16 }
 0x391   : > { %v5156_v25 = vpop.f32.mrb[36].mxu1  ;;  %5274 = vmatmul.mubr.msk.f32.gmra.mrb[60].mxu1 %vm2623_vm4, %v1857_v17  ;;  %v6988_v17 = vld [vmem:[%s7518_s5] ss:$0 sm:$0xff] }
 0x392   : > { %v2350_v30 = vpop.f32.mrb[37].mxu1  ;;  %2559 = vrot.lane.b32.xlu0 %v5156_v25, %s6107_s16  ;;  %5276 = vmatprep.mubr.msk.f32.mxu1 %vm6105_vm3, %v6106_v44 }
 0x393   : > { %2557 = vrot.lane.b32.xlu1 %v2350_v30, %s6107_s16 }
 0x395   : > { %5277 = vmatmul.mubr.msk.f32.gmra.mrb[62].mxu1 %vm2623_vm4, %v1858_v39  ;;  %v6970_v53 = vpop.permute.xlu1 %3432 }
 0x396   : > { %5298 = vmatprep.mubr.msk.f32.mxu1 %vm6105_vm3, %v6106_v44 }
 0x39d   : > { %v5174_v40 = vpop.f32.mrb[38].mxu1 }
 0x39e   : > { %2567 = vrot.lane.b32.xlu0 %v5174_v40, %s6107_s16  ;;  %v2512_v16 = vpop.f32.mrb[39].mxu1 }
 0x39f   : > { %2565 = vrot.lane.b32.xlu1 %v2512_v16, %s6107_s16 }
 0x3e1   : > { %v6972_v52 = vpop.permute.xlu1 %2537 }
 0x3e8   : > { %v6974_v55 = vpop.permute.xlu1 %2547 }
 0x3ec   : > { %v6976_v56 = vpop.permute.xlu1 %2545 }
 0x3ed   : > { %v2699_v59 = vpop.f32.mrb[32].mxu0 }
 0x3ee   : > { %v3378_v2 = vadd.f32 %v2699_v59, %v6628_v1  ;;  %v5181_v10 = vpop.f32.mrb[33].mxu0 }
 0x3f0   : > { %5607 = vtanh.f32 %v3378_v2  ;;  %v6979_v44 = vpop.permute.xlu1 %2543 }
 0x3f1   : > { %v2704_v47 = vpop.f32.mrb[34].mxu0 }
 0x3f2   : > { %v3379_v36 = vadd.f32 %v6623_v63, %v2704_v47  ;;  %v5184_v35 = vpop.f32.mrb[35].mxu0 }
 0x3f4   : > { %5609 = vtanh.f32 %v3379_v36 }
 0x3f5   : > { %v6982_v54 = vpop.permute.xlu1 %2541  ;;  %v2709_v4 = vpop.f32.mrb[36].mxu0 }
 0x3f6   : > { %v3380_v5 = vadd.f32 %v2709_v4, %v6651_v8  ;;  %v5187_v14 = vpop.f32.mrb[37].mxu0 }
 0x3f8   : > { %5611 = vtanh.f32 %v3380_v5 }
 0x3f9   : > { %v2794_v1 = vpop.f32.mrb[40].mxu1  ;;  %v2889_v25 = vpop.f32.mrb[38].mxu0 }
 0x3fa   : > { %v5608_v22 = vpop.eup %5607  ;;  %v3381_v24 = vadd.f32 %v6642_v6, %v2794_v1  ;;  %v5194_v63 = vpop.f32.mrb[41].mxu1  ;;  %v3384_v39 = vadd.f32 %v2889_v25, %v6694_v21 }
 0x3fb   : > { %v6991_v30 = vpop.permute.xlu1 %2553  ;;  %v5207_v40 = vpop.f32.mrb[39].mxu0  ;;  %v3570_v8 = vmul.f32 %v5608_v22, %v6988_v17 }
 0x3fc   : > { %5613 = vtanh.f32 %v3381_v24 }
 0x3fd   : > { %v2799_v16 = vpop.f32.mrb[42].mxu1  ;;  %v3594_v59 = vsel %vm497_vm0, %v3570_v8, 0.0  ;;  %5615 = vtanh.f32 %v3384_v39  ;;  %v2894_v47 = vpop.f32.mrb[40].mxu0 }
 0x3fe   : > { %v5610_v2 = vpop.eup %5609  ;;  %v3382_v10 = vadd.f32 %v2799_v16, %v6672_v13  ;;  %3595 = vadd.xlane.f32.xlu0 %v3594_v59  ;;  %v5197_v6 = vpop.f32.mrb[43].mxu1  ;;  %v3385_v36 = vadd.f32 %v6687_v19, %v2894_v47 }
 0x3ff   : > { %v5210_v35 = vpop.f32.mrb[41].mxu0  ;;  %v3571_v4 = vmul.f32 %v5610_v2, %v6988_v17  ;;  %v6999_v21 = vpop.permute.xlu1 %2549 }
 0x400   : > { %5617 = vtanh.f32 %v3382_v10 }
 0x401   : > { %v2804_v5 = vpop.f32.mrb[44].mxu1  ;;  %v3597_v14 = vsel %vm497_vm0, %v3571_v4, 0.0  ;;  %5619 = vtanh.f32 %v3385_v36  ;;  %v2899_v22 = vpop.f32.mrb[42].mxu0 }
 0x402   : > { %v3383_v1 = vadd.f32 %v6664_v11, %v2804_v5  ;;  %3598 = vadd.xlane.f32.xlu1 %v3597_v14  ;;  %v5200_v13 = vpop.f32.mrb[45].mxu1  ;;  %v5612_v24 = vpop.eup %5611  ;;  %v3386_v25 = vadd.f32 %v2899_v22, %v6716_v28 }
 0x403   : > { %v5213_v63 = vpop.f32.mrb[43].mxu0  ;;  %v3572_v19 = vmul.f32 %v5612_v24, %v6988_v17  ;;  %v7007_v2 = vpop.permute.xlu1 %2561 }
 0x404   : > { %5621 = vtanh.f32 %v3383_v1 }
 0x405   : > { %v3079_v39 = vpop.f32.mrb[44].mxu0  ;;  %5623 = vtanh.f32 %v3386_v25  ;;  %v3600_v8 = vsel %vm497_vm0, %v3572_v19, 0.0 }
 0x406   : > { %v3390_v40 = vadd.f32 %v3079_v39, %v6756_v38  ;;  %v5233_v16 = vpop.f32.mrb[45].mxu0  ;;  %v5614_v59 = vpop.eup %5613  ;;  %3601 = vadd.xlane.f32.xlu1 %v3600_v8 }
 0x407   : > { %v5616_v11 = vpop.eup %5615  ;;  %v3573_v10 = vmul.f32 %v5614_v59, %v6988_v17  ;;  %v7015_v1 = vpop.permute.xlu1 %2557 }
 0x408   : > { %5625 = vtanh.f32 %v3390_v40  ;;  %v3576_v47 = vmul.f32 %v5616_v11, %v6988_v17 }
 0x409   : > { %v3084_v28 = vpop.f32.mrb[46].mxu0  ;;  %v3603_v36 = vsel %vm497_vm0, %v3573_v10, 0.0 }
 0x40a   : > { %v3391_v6 = vadd.f32 %v6752_v37, %v3084_v28  ;;  %v5236_v35 = vpop.f32.mrb[47].mxu0  ;;  %v5618_v38 = vpop.eup %5617  ;;  %3604 = vadd.xlane.f32.xlu0 %v3603_v36  ;;  %v3612_v4 = vsel %vm497_vm0, %v3576_v47, 0.0 }
 0x40b   : > { %v5620_v5 = vpop.eup %5619  ;;  %3613 = vadd.xlane.f32.xlu1 %v3612_v4  ;;  %v3574_v14 = vmul.f32 %v5618_v38, %v6988_v17 }
 0x40c   : > { %v3577_v37 = vmul.f32 %v5620_v5, %v6988_v17 }
 0x40d   : > { %v3089_v22 = vpop.f32.mrb[48].mxu0  ;;  %v3606_v24 = vsel %vm497_vm0, %v3574_v14, 0.0 }
 0x40e   : > { %v7018_v13 = vadd.f32 %v3089_v22, %v6771_v42  ;;  %v5239_v25 = vpop.f32.mrb[49].mxu0  ;;  %v5622_v63 = vpop.eup %5621  ;;  %3607 = vadd.xlane.f32.xlu0 %v3606_v24  ;;  %v3615_v16 = vsel %vm497_vm0, %v3577_v37, 0.0 }
 0x40f   : > { %v5624_v19 = vpop.eup %5623  ;;  %v3575_v59 = vmul.f32 %v5622_v63, %v6988_v17 }
 0x410   : > { %v3578_v40 = vmul.f32 %v5624_v19, %v6988_v17 }
 0x411   : > { %v2566_v39 = vpop.permute.xlu1 %2565  ;;  %v3609_v10 = vsel %vm497_vm0, %v3575_v59, 0.0 }
 0x412   : > { %v2599_v8 = vadd.f32 %v2566_v39, %v6743_v34  ;;  %v5626_v11 = vpop.eup %5625  ;;  %3616 = vadd.xlane.f32.xlu0 %v3615_v16  ;;  %v3618_v42 = vsel %vm497_vm0, %v3578_v40, 0.0 }
 0x413   : > { %3619 = vadd.xlane.f32.xlu1 %v3618_v42  ;;  %v3582_v28 = vmul.f32 %v5626_v11, %v6988_v17 }
 0x414   : > { %5627 = vtanh.f32 %v2599_v8 }
 0x415   : > { %v3630_v47 = vsel %vm497_vm0, %v3582_v28, 0.0  ;;  %5629 = vtanh.f32 %v3391_v6 }
 0x416   : > { %3610 = vadd.xlane.f32.xlu0 %v3609_v10 }
 0x41a   : > { %3631 = vadd.xlane.f32.xlu0 %v3630_v47 }
 0x41e   : > { %v5628_v36 = vpop.eup %5627 }
 0x41f   : > { %v7031_v34 = vmul.f32 %v5628_v36, %v6970_v53  ;;  %v5630_v63 = vpop.eup %5629 }
 0x420   : > { %v3583_v42 = vmul.f32 %v5630_v63, %v6988_v17 }
 0x448   : > { %v2984_v35 = vpop.f32.mrb[46].mxu1 }
 0x449   : > { %v3387_v38 = vadd.f32 %v6708_v26, %v2984_v35  ;;  %v5220_v4 = vpop.f32.mrb[47].mxu1 }
 0x44a   : > { %v3633_v4 = vsel %vm497_vm0, %v3583_v42, 0.0 }
 0x44b   : > { %5631 = vtanh.f32 %v3387_v38 }
 0x44c   : > { %v2989_v5 = vpop.f32.mrb[48].mxu1 }
 0x44d   : > { %v3388_v14 = vadd.f32 %v2989_v5, %v6739_v33  ;;  %v5223_v22 = vpop.f32.mrb[49].mxu1 }
 0x44f   : > { %5633 = vtanh.f32 %v3388_v14 }
 0x450   : > { %v2994_v24 = vpop.f32.mrb[50].mxu1 }
 0x451   : > { %v3389_v37 = vadd.f32 %v6731_v31, %v2994_v24  ;;  %v5226_v25 = vpop.f32.mrb[51].mxu1 }
 0x452   : > { %v2540_v25 = vpop.permute.xlu0 %2539 }
 0x453   : > { %5635 = vtanh.f32 %v3389_v37 }
 0x454   : > { %v3174_v19 = vpop.f32.mrb[52].mxu1  ;;  %v3269_v39 = vpop.f32.mrb[50].mxu0 }
 0x455   : > { %v5632_v40 = vpop.eup %5631  ;;  %v3393_v8 = vadd.f32 %v6767_v41, %v3174_v19  ;;  %v7038_v26 = vadd.f32 %v3269_v39, %v6804_v46  ;;  %v5246_v6 = vpop.f32.mrb[53].mxu1 }
 0x456   : > { %v5259_v16 = vpop.f32.mrb[51].mxu0  ;;  %v3579_v33 = vmul.f32 %v5632_v40, %v6988_v17  ;;  %v2556_v42 = vpop.permute.xlu0 %2555 }
 0x457   : > { %5637 = vtanh.f32 %v3393_v8 }
 0x458   : > { %v3179_v59 = vpop.f32.mrb[54].mxu1  ;;  %v3274_v11 = vpop.f32.mrb[52].mxu0  ;;  %v3621_v31 = vsel %vm497_vm0, %v3579_v33, 0.0 }
 0x459   : > { %v5634_v10 = vpop.eup %5633  ;;  %v3394_v28 = vadd.f32 %v3179_v59, %v6796_v18  ;;  %v7045_v47 = vadd.f32 %v6802_v45, %v3274_v11  ;;  %3622 = vadd.xlane.f32.xlu1 %v3621_v31  ;;  %v5249_v41 = vpop.f32.mrb[55].mxu1 }
 0x45a   : > { %v5262_v46 = vpop.f32.mrb[53].mxu0  ;;  %v3580_v36 = vmul.f32 %v5634_v10, %v6988_v17 }
 0x45b   : > { %5639 = vtanh.f32 %v3394_v28  ;;  %v2585_v46 = vadd.f32 %v6972_v52, %v6601_v58 }
 0x45c   : > { %v3184_v35 = vpop.f32.mrb[56].mxu1  ;;  %v3279_v38 = vpop.f32.mrb[54].mxu0  ;;  %v3624_v5 = vsel %vm497_vm0, %v3580_v36, 0.0 }
 0x45d   : > { %v5636_v14 = vpop.eup %5635  ;;  %v7051_v22 = vadd.f32 %v6779_v43, %v3184_v35  ;;  %v7054_v18 = vadd.f32 %v3279_v38, %v6812_v49  ;;  %3634 = vadd.xlane.f32.xlu1 %v3633_v4  ;;  %3625 = vadd.xlane.f32.xlu0 %v3624_v5  ;;  %v5252_v45 = vpop.f32.mrb[57].mxu1  ;;  %v2586_v49 = vadd.f32 %v6599_v57, %v2540_v25 }
 0x45e   : > { %v5265_v24 = vpop.f32.mrb[55].mxu0  ;;  %v3581_v37 = vmul.f32 %v5636_v14, %v6988_v17  ;;  %v2552_v36 = vpop.permute.xlu0 %2551 }
 0x45f   : > { %5641 = vtanh.f32 %v2586_v49  ;;  %v2592_v38 = vadd.f32 %v6649_v7, %v2552_v36 }
 0x460   : > { %v3364_v63 = vpop.f32.mrb[58].mxu1  ;;  %v3627_v19 = vsel %vm497_vm0, %v3581_v37, 0.0 }
 0x461   : > { %v5638_v39 = vpop.eup %5637  ;;  %v7059_v40 = vadd.f32 %v6810_v48, %v3364_v63  ;;  %3628 = vadd.xlane.f32.xlu0 %v3627_v19  ;;  %v5272_v43 = vpop.f32.mrb[59].mxu1  ;;  %v2590_v48 = vadd.f32 %v6625_v0, %v6974_v55  ;;  %v2594_v0 = vadd.f32 %v6668_v12, %v2556_v42  ;;  %v2589_v55 = vadd.f32 %v6976_v56, %v6630_v3 }
 0x462   : > { %v3585_v8 = vmul.f32 %v5638_v39, %v6988_v17  ;;  %v2593_v3 = vadd.f32 %v6991_v30, %v6674_v15 }
 0x463   : > { %5643 = vtanh.f32 %v2590_v48 }
 0x464   : > { %v3369_v6 = vpop.f32.mrb[60].mxu1  ;;  %v3639_v16 = vsel %vm497_vm0, %v3585_v8, 0.0 }
 0x465   : > { %v5640_v33 = vpop.eup %5639  ;;  %v7065_v59 = vadd.f32 %v3369_v6, %v6816_v51  ;;  %3640 = vadd.xlane.f32.xlu1 %v3639_v16  ;;  %v5275_v11 = vpop.f32.mrb[61].mxu1  ;;  %v2588_v51 = vadd.f32 %v6613_v60, %v6979_v44  ;;  %v2587_v60 = vadd.f32 %v6982_v54, %v6615_v61  ;;  %v2591_v54 = vadd.f32 %v6999_v21, %v6655_v9 }
 0x466   : > { %v3586_v31 = vmul.f32 %v5640_v33, %v6988_v17 }
 0x467   : > { %5645 = vtanh.f32 %v2588_v51 }
 0x468   : > { %v3374_v10 = vpop.f32.mrb[62].mxu1  ;;  %v3642_v28 = vsel %vm497_vm0, %v3586_v31, 0.0  ;;  %5647 = vtanh.f32 %v2585_v46 }
 0x469   : > { %v7072_v57 = vadd.f32 %v6814_v50, %v3374_v10  ;;  %3643 = vadd.xlane.f32.xlu0 %v3642_v28  ;;  %v5278_v41 = vpop.f32.mrb[63].mxu1  ;;  %v5642_v35 = vpop.eup %5641  ;;  %5649 = vtanh.f32 %v2594_v0 }
 0x46a   : > { %v2564_v50 = vpop.permute.xlu0 %2563  ;;  %5651 = vtanh.f32 %v2589_v55  ;;  %v3436_v44 = vmul.f32 %v5642_v35, %v6970_v53 }
 0x46b   : > { %5653 = vtanh.f32 %v2592_v38  ;;  %v2598_v12 = vadd.f32 %v6714_v27, %v2564_v50 }
 0x46c   : > { %5655 = vtanh.f32 %v2587_v60 }
 0x46d   : > { %v5644_v58 = vpop.eup %5643  ;;  %5657 = vtanh.f32 %v2598_v12 }
 0x46e   : > { %v2560_v52 = vpop.permute.xlu0 %2559  ;;  %v3440_v56 = vmul.f32 %v5644_v58, %v6970_v53  ;;  %5659 = vtanh.f32 %v2593_v3 }
 0x46f   : > { %v2596_v61 = vadd.f32 %v6691_v20, %v2560_v52  ;;  %v2597_v20 = vadd.f32 %v7007_v2, %v6722_v29 }
 0x471   : > { %v5646_v7 = vpop.eup %5645  ;;  %5661 = vtanh.f32 %v2596_v61 }
 0x472   : > { %v5648_v4 = vpop.eup %5647  ;;  %v2568_v5 = vpop.permute.xlu0 %2567  ;;  %v3438_v27 = vmul.f32 %v5646_v7, %v6970_v53  ;;  %5663 = vtanh.f32 %v2591_v54 }
 0x473   : > { %v5650_v14 = vpop.eup %5649  ;;  %v3435_v15 = vmul.f32 %v5648_v4, %v6970_v53  ;;  %v2600_v45 = vadd.f32 %v6737_v32, %v2568_v5  ;;  %v2595_v32 = vadd.f32 %v7015_v1, %v6700_v23 }
 0x474   : > { %v5652_v30 = vpop.eup %5651  ;;  %v3444_v9 = vmul.f32 %v5650_v14, %v6970_v53 }
 0x475   : > { %v5654_v21 = vpop.eup %5653  ;;  %v3439_v24 = vmul.f32 %v5652_v30, %v6970_v53  ;;  %5665 = vtanh.f32 %v2600_v45 }
 0x476   : > { %3469 = vrot.lane.b32.xlu1 %v3436_v44, %s6103_s15  ;;  %v5656_v37 = vpop.eup %5655  ;;  %5667 = vtanh.f32 %v2597_v20  ;;  %v3442_v25 = vmul.f32 %v5654_v21, %v6970_v53 }
 0x477   : > { %v5658_v63 = vpop.eup %5657  ;;  %v3437_v29 = vmul.f32 %v5656_v37, %v6970_v53  ;;  %5669 = vtanh.f32 %v2595_v32 }
 0x478   : > { %v5660_v2 = vpop.eup %5659  ;;  %v3448_v19 = vmul.f32 %v5658_v63, %v6970_v53  ;;  %5671 = vtanh.f32 %v7018_v13 }
 0x479   : > { %v3443_v43 = vmul.f32 %v5660_v2, %v6970_v53  ;;  %5673 = vtanh.f32 %v7038_v26 }
 0x47a   : > { %3477 = vrot.lane.b32.xlu1 %v3440_v56, %s6103_s15  ;;  %5675 = vtanh.f32 %v7045_v47 }
 0x47b   : > { %v5662_v39 = vpop.eup %5661 }
 0x47c   : > { %v5664_v8 = vpop.eup %5663  ;;  %v3446_v23 = vmul.f32 %v5662_v39, %v6970_v53 }
 0x47d   : > { %v3441_v49 = vmul.f32 %v5664_v8, %v6970_v53 }
 0x47e   : > { %3473 = vrot.lane.b32.xlu1 %v3438_v27, %s6103_s15 }
 0x47f   : > { %3467 = vrot.lane.b32.xlu0 %v3435_v15, %s6103_s15  ;;  %v5666_v1 = vpop.eup %5665 }
 0x480   : > { %v5668_v6 = vpop.eup %5667  ;;  %v3450_v31 = vmul.f32 %v5666_v1, %v6970_v53 }
 0x481   : > { %v3447_v48 = vmul.f32 %v5668_v6, %v6970_v53  ;;  %v5670_v42 = vpop.eup %5669 }
 0x482   : > { %3485 = vrot.lane.b32.xlu1 %v3444_v9, %s6103_s15  ;;  %v3445_v41 = vmul.f32 %v5670_v42, %v6970_v53  ;;  %v5672_v20 = vpop.eup %5671 }
 0x483   : > { %3475 = vrot.lane.b32.xlu0 %v3439_v24, %s6103_s15  ;;  %v5674_v24 = vpop.eup %5673  ;;  %v3584_v32 = vmul.f32 %v5672_v20, %v6988_v17 }
 0x486   : > { %3481 = vrot.lane.b32.xlu1 %v3442_v25, %s6103_s15  ;;  %v5676_v25 = vpop.eup %5675 }
 0x487   : > { %3471 = vrot.lane.b32.xlu0 %v3437_v29, %s6103_s15 }
 0x48a   : > { %3493 = vrot.lane.b32.xlu1 %v3448_v19, %s6103_s15  ;;  %v3588_v19 = vmul.f32 %v5674_v24, %v6988_v17 }
 0x48b   : > { %3483 = vrot.lane.b32.xlu0 %v3443_v43, %s6103_s15  ;;  %v3596_v16 = vpop.xlane.xlu0 %3595 }
 0x48e   : > { %3489 = vrot.lane.b32.xlu1 %v3446_v23, %s6103_s15  ;;  %v3636_v23 = vsel %vm497_vm0, %v3584_v32, 0.0 }
 0x48f   : > { %3479 = vrot.lane.b32.xlu0 %v3441_v49, %s6103_s15  ;;  %v3599_v33 = vpop.xlane.xlu1 %3598 }
 0x490   : > { %v3850_v11 = vmax.f32 %v3596_v16, %v3599_v33 }
 0x492   : > { %3497 = vrot.lane.b32.xlu1 %v3450_v31, %s6103_s15 }
 0x493   : > { %3491 = vrot.lane.b32.xlu0 %v3447_v48, %s6103_s15  ;;  %v3602_v10 = vpop.xlane.xlu1 %3601 }
 0x494   : > { %v3851_v28 = vmax.f32 %v3850_v11, %v3602_v10 }
 0x496   : > { %v3852_v51 = vrot.slane %v3851_v28, 4 }
 0x497   : > { %3487 = vrot.lane.b32.xlu0 %v3445_v41, %s6103_s15  ;;  %v3605_v46 = vpop.xlane.xlu0 %3604 }
 0x498   : > { %v3853_v36 = vmax.f32 %v3851_v28, %v3852_v51  ;;  %v3614_v50 = vpop.xlane.xlu1 %3613  ;;  %v3589_v28 = vmul.f32 %v5676_v25, %v6988_v17 }
 0x49a   : > { %v3854_v0 = vrot.slane %v3853_v36, 2 }
 0x49b   : > { %v7125_v55 = vpop.xlane.xlu0 %3607 }
 0x49c   : > { %v3855_v35 = vmax.f32 %v3853_v36, %v3854_v0  ;;  %v3858_v38 = vmax.f32 %v3605_v46, %v7125_v55 }
 0x49e   : > { %v3856_v60 = vrot.slane %v3855_v35, 1 }
 0x49f   : > { %v3617_v44 = vpop.xlane.xlu0 %3616 }
 0x4a0   : > { %v3857_v58 = vmax.f32 %v3855_v35, %v3856_v60  ;;  %v3866_v12 = vmax.f32 %v3614_v50, %v3617_v44  ;;  %v3620_v3 = vpop.xlane.xlu1 %3619 }
 0x4a2   : > { %v3914_v53 = vsub.f32 %v3596_v16, %v3857_v58  ;;  %v3915_v52 = vsub.f32 %v3599_v33, %v3857_v58  ;;  %v3916_v56 = vsub.f32 %v3602_v10, %v3857_v58  ;;  %v3867_v7 = vmax.f32 %v3866_v12, %v3620_v3 }
 0x4a3   : > { %v3611_v4 = vpop.xlane.xlu0 %3610  ;;  %v3648_v10 = vsel %vm497_vm0, %v3588_v19, 0.0 }
 0x4a4   : > { %v3938_v61 = vmul.f32 1.442695, %v3914_v53  ;;  %v3940_v54 = vmul.f32 1.442695, %v3915_v52  ;;  %v3859_v5 = vmax.f32 %v3858_v38, %v3611_v4  ;;  %v3942_v27 = vmul.f32 1.442695, %v3916_v56 }
 0x4a5   : > { %v3868_v14 = vrot.slane %v3867_v7, 4 }
 0x4a6   : > { %5677 = vpow2.f32 %v3938_v61  ;;  %v3860_v15 = vrot.slane %v3859_v5, 4 }
 0x4a7   : > { %5679 = vpow2.f32 %v3940_v54  ;;  %v3869_v13 = vmax.f32 %v3867_v7, %v3868_v14 }
 0x4a8   : > { %v3861_v30 = vmax.f32 %v3859_v5, %v3860_v15  ;;  %5681 = vpow2.f32 %v3942_v27 }
 0x4a9   : > { %v3870_v45 = vrot.slane %v3869_v13, 2  ;;  %5683 = vtanh.f32 %v7059_v40 }
 0x4aa   : > { %v3862_v9 = vrot.slane %v3861_v30, 2  ;;  %5685 = vtanh.f32 %v7054_v18 }
 0x4ab   : > { %v3871_v26 = vmax.f32 %v3869_v13, %v3870_v45 }
 0x4ac   : > { %v3863_v21 = vmax.f32 %v3861_v30, %v3862_v9 }
 0x4ad   : > { %v3872_v37 = vrot.slane %v3871_v26, 1 }
 0x4ae   : > { %v3864_v47 = vrot.slane %v3863_v21, 1 }
 0x4af   : > { %v3873_v63 = vmax.f32 %v3871_v26, %v3872_v37 }
 0x4b0   : > { %v7134_v29 = vpop.eup %5677  ;;  %v3865_v2 = vmax.f32 %v3863_v21, %v3864_v47 }
 0x4b1   : > { %v7137_v39 = vpop.eup %5679  ;;  %v3920_v43 = vsub.f32 %v3614_v50, %v3873_v63  ;;  %v3921_v40 = vsub.f32 %v3617_v44, %v3873_v63  ;;  %v3922_v8 = vsub.f32 %v3620_v3, %v3873_v63 }
 0x4b2   : > { %v3986_v1 = vadd.f32 %v7137_v39, %v7134_v29  ;;  %v3917_v49 = vsub.f32 %v3605_v46, %v3865_v2  ;;  %v3918_v6 = vsub.f32 %v7125_v55, %v3865_v2  ;;  %v3919_v18 = vsub.f32 %v3611_v4, %v3865_v2  ;;  %v5682_v16 = vpop.eup %5681  ;;  %v5799_v2 = vld [vmem:[%s6443_s9] sm:$0xff] }
 0x4b3   : > { %v3950_v33 = vmul.f32 1.442695, %v3920_v43  ;;  %v3952_v11 = vmul.f32 1.442695, %v3921_v40  ;;  %v3954_v31 = vmul.f32 1.442695, %v3922_v8  ;;  %v5684_v41 = vpop.eup %5683 }
 0x4b4   : > { %v3987_v48 = vadd.f32 %v5682_v16, %v3986_v1  ;;  %v3944_v42 = vmul.f32 1.442695, %v3917_v49  ;;  %v3946_v51 = vmul.f32 1.442695, %v3918_v6  ;;  %v3948_v46 = vmul.f32 1.442695, %v3919_v18  ;;  %v5686_v50 = vpop.eup %5685 }
 0x4b5   : > { %5687 = vpow2.f32 %v3950_v33  ;;  %v3651_v55 = vsel %vm497_vm0, %v3589_v28, 0.0  ;;  %v3591_v35 = vmul.f32 %v5684_v41, %v6988_v17  ;;  %v3590_v58 = vmul.f32 %v5686_v50, %v6988_v17  ;;  %v5800_v43 = vld [vmem:[%s6443_s9 + $0x8] sm:$0xff]  ;;  %v5801_v8 = vld [vmem:[%s6443_s9 + $0x10] sm:$0xff] }
 0x4b6   : > { %3637 = vadd.xlane.f32.xlu1 %v3636_v23  ;;  %3649 = vadd.xlane.f32.xlu0 %v3648_v10  ;;  %v3988_v36 = vrot.slane %v3987_v48, 4  ;;  %5689 = vpow2.f32 %v3952_v11  ;;  %v5802_v28 = vld [vmem:[%s6443_s9 + $0x30] sm:$0xff] }
 0x4b7   : > { %5691 = vpow2.f32 %v3954_v31  ;;  %v3657_v44 = vsel %vm497_vm0, %v3591_v35, 0.0  ;;  %v3654_v56 = vsel %vm497_vm0, %v3590_v58, 0.0  ;;  %v5806_v58 = vld [vmem:[%s6443_s9 + $0x20] sm:$0xff] }
 0x4b8   : > { %v3989_v0 = vadd.f32 %v3988_v36, %v3987_v48  ;;  %5693 = vpow2.f32 %v3944_v42 }
 0x4b9   : > { %5695 = vpow2.f32 %v3946_v51  ;;  %v5803_v51 = vld [vmem:[%s6443_s9 + $0x38] sm:$0xff] }
 0x4ba   : > { %3652 = vadd.xlane.f32.xlu1 %v3651_v55  ;;  %v3990_v38 = vrot.slane %v3989_v0, 2  ;;  %5697 = vpow2.f32 %v3948_v46  ;;  %v5804_v46 = vld [vmem:[%s6443_s9 + $0x40] sm:$0xff] }
 0x4bc   : > { %v3991_v60 = vadd.f32 %v3990_v38, %v3989_v0 }
 0x4be   : > { %3658 = vadd.xlane.f32.xlu1 %v3657_v44  ;;  %v3992_v12 = vrot.slane %v3991_v60, 1 }
 0x4bf   : > { %v5688_v3 = vpop.eup %5687 }
 0x4c0   : > { %v5690_v53 = vpop.eup %5689  ;;  %v3993_v52 = vadd.f32 %v3992_v12, %v3991_v60  ;;  %v5805_v60 = vld [vmem:[%s6443_s9 + $0x18] sm:$0xff] }
 0x4c1   : > { %v5692_v7 = vpop.eup %5691  ;;  %v4002_v4 = vadd.f32 %v5690_v53, %v5688_v3 }
 0x4c2   : > { %3655 = vadd.xlane.f32.xlu1 %v3654_v56  ;;  %v5694_v61 = vpop.eup %5693  ;;  %5699 = vrcp.f32 %v3993_v52 }
 0x4c3   : > { %v5696_v54 = vpop.eup %5695  ;;  %v4003_v5 = vadd.f32 %v5692_v7, %v4002_v4 }
 0x4c4   : > { %v3994_v27 = vadd.f32 %v5696_v54, %v5694_v61  ;;  %v5698_v14 = vpop.eup %5697 }
 0x4c5   : > { %v4004_v15 = vrot.slane %v4003_v5, 4 }
 0x4c6   : > { %v3995_v13 = vadd.f32 %v5698_v14, %v3994_v27 }
 0x4c7   : > { %v4005_v30 = vadd.f32 %v4004_v15, %v4003_v5 }
 0x4c8   : > { %v3996_v45 = vrot.slane %v3995_v13, 4 }
 0x4c9   : > { %v4006_v20 = vrot.slane %v4005_v30, 2 }
 0x4ca   : > { %v3997_v9 = vadd.f32 %v3996_v45, %v3995_v13 }
 0x4cb   : > { %v4007_v26 = vadd.f32 %v4006_v20, %v4005_v30 }
 0x4cc   : > { %3495 = vrot.lane.b32.xlu0 %v7031_v34, %s6103_s15  ;;  %v5700_v21 = vpop.eup %5699  ;;  %v3998_v24 = vrot.slane %v3997_v9, 2  ;;  %s6015_s15 = sshll.u32 %s6108_s13, 4  ;;  %s6016_s15 = int_to_ptr.vmem [resolvable:$false] %s6015_s15 }
 0x4cd   : > { %v4058_v37 = vmul.f32 %v5700_v21, %v7134_v29  ;;  %v4059_v32 = vmul.f32 %v5700_v21, %v7137_v39  ;;  %v4060_v47 = vmul.f32 %v5700_v21, %v5682_v16  ;;  %v4008_v25 = vrot.slane %v4007_v26, 1  ;;  %s6017_s21 = scalar_lea.vmem %s6016_s15, 256  ;;  %p6018_p3 = scmp.lt.s32.totalorder %s7470_s26, %s6016_s15 }
 0x4ce   : > { %v3999_v63 = vadd.f32 %v3998_v24, %v3997_v9 }
 0x4cf   : > { %v4170_v19 = vmul.f32 %v5799_v2, %v4058_v37  ;;  %v4171_v40 = vmul.f32 %v5800_v43, %v4059_v32  ;;  %v4172_v23 = vmul.f32 %v5801_v8, %v4060_v47  ;;  %v4009_v1 = vadd.f32 %v4008_v25, %v4007_v26 }
 0x4d0   : > { %v4000_v49 = vrot.slane %v3999_v63, 1 }
 0x4d1   : > { %v4194_v6 = vsel %vm497_vm0, %v4170_v19, 0.0  ;;  %v4195_v34 = vsel %vm497_vm0, %v4171_v40, 0.0  ;;  %5701 = vrcp.f32 %v4009_v1  ;;  %v4197_v18 = vsel %vm497_vm0, %v4172_v23, 0.0 }
 0x4d2   : > { %v4196_v29 = vadd.f32 %v4195_v34, %v4194_v6  ;;  %v4001_v39 = vadd.f32 %v4000_v49, %v3999_v63 }
 0x4d4   : > { %v4198_v16 = vadd.f32 %v4197_v18, %v4196_v29  ;;  %5703 = vrcp.f32 %v4001_v39 }
 0x4d5   : > { %5705 = vtanh.f32 %v7051_v22 }
 0x4d6   : > { %5707 = vtanh.f32 %v7065_v59  ;;  %v4199_v10 = vrot.slane %v4198_v16, 4 }
 0x4d7   : > { %5709 = vtanh.f32 %v7072_v57 }
 0x4d8   : > { %v4200_v56 = vadd.f32 %v4199_v10, %v4198_v16 }
 0x4da   : > { %v4201_v30 = vrot.slane %v4200_v56, 2 }
 0x4db   : > { %v5702_v33 = vpop.eup %5701 }
 0x4dc   : > { %v4064_v11 = vmul.f32 %v5702_v33, %v5688_v3  ;;  %v4065_v31 = vmul.f32 %v5702_v33, %v5690_v53  ;;  %v4066_v48 = vmul.f32 %v5702_v33, %v5692_v7  ;;  %v5807_v3 = vld [vmem:[%s6443_s9 + $0x28] sm:$0xff]  ;;  %v4202_v25 = vadd.f32 %v4201_v30, %v4200_v56 }
 0x4de   : > { %v5704_v42 = vpop.eup %5703  ;;  %v4176_v41 = vmul.f32 %v5802_v28, %v4064_v11  ;;  %v4177_v36 = vmul.f32 %v5803_v51, %v4065_v31  ;;  %v4178_v0 = vmul.f32 %v5804_v46, %v4066_v48  ;;  %v4203_v49 = vrot.slane %v4202_v25, 1 }
 0x4df   : > { %v4061_v55 = vmul.f32 %v5704_v42, %v5694_v61  ;;  %v4062_v35 = vmul.f32 %v5704_v42, %v5696_v54  ;;  %v4063_v22 = vmul.f32 %v5704_v42, %v5698_v14  ;;  %v5706_v52 = vpop.eup %5705  ;;  %v7175_v14 = vpop.xlane.xlu0 %3631 }
 0x4e0   : > { %v4216_v59 = vsel %vm497_vm0, %v4176_v41, 0.0  ;;  %v4217_v50 = vsel %vm497_vm0, %v4177_v36, 0.0  ;;  %v4219_v7 = vsel %vm497_vm0, %v4178_v0, 0.0  ;;  %v3587_v15 = vmul.f32 %v5706_v52, %v6988_v17  ;;  %v5708_v13 = vpop.eup %5707 }
 0x4e1   : > { %v4218_v38 = vadd.f32 %v4217_v50, %v4216_v59  ;;  %v4173_v44 = vmul.f32 %v5805_v60, %v4061_v55  ;;  %v4174_v12 = vmul.f32 %v5806_v58, %v4062_v35  ;;  %v4175_v53 = vmul.f32 %v5807_v3, %v4063_v22  ;;  %v5710_v47 = vpop.eup %5709 }
 0x4e2   : > { %v3645_v37 = vsel %vm497_vm0, %v3587_v15, 0.0  ;;  %v3592_v32 = vmul.f32 %v5708_v13, %v6988_v17  ;;  %v3593_v1 = vmul.f32 %v5710_v47, %v6988_v17  ;;  %v4204_v11 = vadd.f32 %v4203_v49, %v4202_v25 }
 0x4e3   : > { %v4220_v4 = vadd.f32 %v4219_v7, %v4218_v38  ;;  %v4205_v61 = vsel %vm497_vm0, %v4173_v44, 0.0  ;;  %v4206_v57 = vsel %vm497_vm0, %v4174_v12, 0.0  ;;  %v4208_v27 = vsel %vm497_vm0, %v4175_v53, 0.0 }
 0x4e4   : > { %v4207_v54 = vadd.f32 %v4206_v57, %v4205_v61  ;;  %v3660_v23 = vsel %vm497_vm0, %v3592_v32, 0.0  ;;  %v3663_v33 = vsel %vm497_vm0, %v3593_v1, 0.0 }
 0x4e5   : > { %v4221_v5 = vrot.slane %v4220_v4, 4 }
 0x4e6   : > { %v4209_v45 = vadd.f32 %v4208_v27, %v4207_v54  ;;  %v3623_v9 = vpop.xlane.xlu1 %3622 }
 0x4e7   : > { %v4222_v20 = vadd.f32 %v4221_v5, %v4220_v4 }
 0x4e8   : > { %v4210_v26 = vrot.slane %v4209_v45, 4 }
 0x4e9   : > { %v4223_v21 = vrot.slane %v4222_v20, 2 }
 0x4ea   : > { %v3626_v24 = vpop.xlane.xlu0 %3625  ;;  %v4211_v63 = vadd.f32 %v4210_v26, %v4209_v45  ;;  %v7180_v40 = vpop.xlane.xlu1 %3634 }
 0x4eb   : > { %v3874_v2 = vmax.f32 %v3623_v9, %v3626_v24  ;;  %3646 = vadd.xlane.f32.xlu0 %v3645_v37  ;;  %v4224_v19 = vadd.f32 %v4223_v21, %v4222_v20 }
 0x4ec   : > { %v4212_v43 = vrot.slane %v4211_v63, 2 }
 0x4ed   : > { %v4225_v29 = vrot.slane %v4224_v19, 1 }
 0x4ee   : > { %v3629_v8 = vpop.xlane.xlu0 %3628  ;;  %v4213_v6 = vadd.f32 %v4212_v43, %v4211_v63 }
 0x4ef   : > { %v3875_v34 = vmax.f32 %v3874_v2, %v3629_v8  ;;  %3661 = vadd.xlane.f32.xlu0 %v3660_v23  ;;  %v4226_v42 = vadd.f32 %v4225_v29, %v4224_v19 }
 0x4f0   : > { %v4214_v39 = vrot.slane %v4213_v6, 1 }
 0x4f1   : > { %v3876_v18 = vrot.slane %v3875_v34, 4 }
 0x4f2   : > { %v7184_v16 = vpop.xlane.xlu1 %3640  ;;  %v4215_v31 = vadd.f32 %v4214_v39, %v4213_v6 }
 0x4f3   : > { %v3877_v48 = vmax.f32 %v3875_v34, %v3876_v18  ;;  %3664 = vadd.xlane.f32.xlu0 %v3663_v33 }
 0x4f4   : > { %v4299_v17 = vsel %vm4298_vm5, %v4215_v31, %v4204_v11 }
 0x4f5   : > { %v3878_v10 = vrot.slane %v3877_v48, 2  ;;  %v7191_v51 = vsel %vm4300_vm6, %v4226_v42, %v4299_v17 }
 0x4f6   : > { %v3470_v28 = vpop.permute.xlu1 %3469  ;;  %v7188_v41 = vpop.xlane.xlu0 %3643 }
 0x4f7   : > { %v3879_v36 = vmax.f32 %v3877_v48, %v3878_v10  ;;  %v3518_v46 = vsel %vm497_vm0, %v3470_v28, 0.0  ;;  %v5808_v48 = vld [vmem:[%s6443_s9 + $0x48] sm:$0xff]  ;;  %v5809_v10 = vld [vmem:[%s6443_s9 + $0x50] sm:$0xff]  ;;  %v5810_v28 = vld [vmem:[%s6443_s9 + $0x58] sm:$0xff] }
 0x4f8   : > { %3519 = vadd.xlane.f32.xlu1 %v3518_v46 }
 0x4f9   : > { %v3880_v0 = vrot.slane %v3879_v36, 1 }
 0x4fa   : > { %v3478_v55 = vpop.permute.xlu1 %3477  ;;  %v3468_v35 = vpop.permute.xlu0 %3467 }
 0x4fb   : > { %v3881_v22 = vmax.f32 %v3879_v36, %v3880_v0  ;;  %v3515_v59 = vsel %vm497_vm0, %v3468_v35, 0.0  ;;  %v3530_v53 = vsel %vm497_vm0, %v3478_v55, 0.0 }
 0x4fc   : > { %3516 = vadd.xlane.f32.xlu0 %v3515_v59 }
 0x4fd   : > { %v3923_v50 = vsub.f32 %v3623_v9, %v3881_v22  ;;  %v3924_v38 = vsub.f32 %v3626_v24, %v3881_v22  ;;  %v3925_v60 = vsub.f32 %v3629_v8, %v3881_v22 }
 0x4fe   : > { %v3474_v44 = vpop.permute.xlu1 %3473  ;;  %v3476_v58 = vpop.permute.xlu0 %3475 }
 0x4ff   : > { %v3956_v12 = vmul.f32 1.442695, %v3923_v50  ;;  %v3958_v3 = vmul.f32 1.442695, %v3924_v38  ;;  %v3960_v52 = vmul.f32 1.442695, %v3925_v60 }
 0x500   : > { %v3527_v56 = vsel %vm497_vm0, %v3476_v58, 0.0  ;;  %3531 = vadd.xlane.f32.xlu0 %v3530_v53  ;;  %v3524_v57 = vsel %vm497_vm0, %v3474_v44, 0.0 }
 0x501   : > { %5711 = vpow2.f32 %v3956_v12  ;;  %3528 = vadd.xlane.f32.xlu1 %v3527_v56 }
 0x502   : > { %5713 = vpow2.f32 %v3958_v3  ;;  %v3486_v7 = vpop.permute.xlu1 %3485  ;;  %v3472_v4 = vpop.permute.xlu0 %3471  ;;  %v3882_v3 = vmax.f32 %v7175_v14, %v7180_v40 }
 0x503   : > { %v3521_v61 = vsel %vm497_vm0, %v3472_v4, 0.0  ;;  %5715 = vpow2.f32 %v3960_v52  ;;  %v3542_v27 = vsel %vm497_vm0, %v3486_v7, 0.0 }
 0x504   : > { %3522 = vadd.xlane.f32.xlu0 %v3521_v61 }
 0x505   : > { %3525 = vadd.xlane.f32.xlu1 %v3524_v57 }
 0x506   : > { %v3482_v54 = vpop.permute.xlu1 %3481  ;;  %v3484_v5 = vpop.permute.xlu0 %3483 }
 0x507   : > { %v3539_v15 = vsel %vm497_vm0, %v3484_v5, 0.0  ;;  %v3536_v26 = vsel %vm497_vm0, %v3482_v54, 0.0 }
 0x508   : > { %3543 = vadd.xlane.f32.xlu0 %v3542_v27 }
 0x509   : > { %3540 = vadd.xlane.f32.xlu1 %v3539_v15 }
 0x50a   : > { %v3494_v13 = vpop.permute.xlu1 %3493  ;;  %v3480_v30 = vpop.permute.xlu0 %3479 }
 0x50b   : > { %v5712_v45 = vpop.eup %5711  ;;  %v3533_v20 = vsel %vm497_vm0, %v3480_v30, 0.0  ;;  %v3554_v25 = vsel %vm497_vm0, %v3494_v13, 0.0 }
 0x50c   : > { %v5714_v9 = vpop.eup %5713  ;;  %3534 = vadd.xlane.f32.xlu0 %v3533_v20 }
 0x50d   : > { %v4010_v21 = vadd.f32 %v5714_v9, %v5712_v45  ;;  %3537 = vadd.xlane.f32.xlu1 %v3536_v26  ;;  %v5716_v24 = vpop.eup %5715  ;;  %v4287_v26 = vld [vmem:[#allocation11 + $0x8] sm:$0xff] }
 0x50e   : > { %v3490_v37 = vpop.permute.xlu1 %3489  ;;  %v3492_v32 = vpop.permute.xlu0 %3491 }
 0x50f   : > { %v4011_v47 = vadd.f32 %v5716_v24, %v4010_v21  ;;  %v3551_v63 = vsel %vm497_vm0, %v3492_v32, 0.0  ;;  %v3548_v8 = vsel %vm497_vm0, %v3490_v37, 0.0 }
 0x510   : > { %3555 = vadd.xlane.f32.xlu0 %v3554_v25 }
 0x511   : > { %v4012_v2 = vrot.slane %v4011_v47, 4  ;;  %3552 = vadd.xlane.f32.xlu1 %v3551_v63 }
 0x512   : > { %v3488_v19 = vpop.permute.xlu0 %3487  ;;  %v3498_v1 = vpop.permute.xlu1 %3497 }
 0x513   : > { %v4013_v43 = vadd.f32 %v4012_v2, %v4011_v47  ;;  %v3545_v23 = vsel %vm497_vm0, %v3488_v19, 0.0  ;;  %v3560_v34 = vsel %vm497_vm0, %v3498_v1, 0.0 }
 0x514   : > { %3549 = vadd.xlane.f32.xlu0 %v3548_v8  ;;  %v4289_v8 = vld [vmem:[#allocation11 + $0x18] sm:$0xff] }
 0x515   : > { %v4014_v49 = vrot.slane %v4013_v43, 2  ;;  %3546 = vadd.xlane.f32.xlu1 %v3545_v23 }
 0x517   : > { %v4015_v6 = vadd.f32 %v4014_v49, %v4013_v43  ;;  %v4288_v43 = vld [vmem:[#allocation11 + $0x10] sm:$0xff] }
 0x518   : > { %3561 = vadd.xlane.f32.xlu0 %v3560_v34  ;;  %v5425_v1 = vpack.c.bf16 %v4289_v8, %v4288_v43 }
 0x519   : > { %v4016_v29 = vrot.slane %v4015_v6, 1 }
 0x51b   : > { %v4017_v39 = vadd.f32 %v4016_v29, %v4015_v6 }
 0x51d   : > { %5717 = vrcp.f32 %v4017_v39 }
 0x527   : > { %v5718_v18 = vpop.eup %5717 }
 0x528   : > { %v4067_v33 = vmul.f32 %v5718_v18, %v5712_v45  ;;  %v4068_v11 = vmul.f32 %v5718_v18, %v5714_v9  ;;  %v4069_v31 = vmul.f32 %v5718_v18, %v5716_v24  ;;  %v4286_v9 = vld [vmem:[#allocation11] sm:$0xff] }
 0x529   : > { %v5422_v21 = vpack.c.bf16 %v4287_v26, %v4286_v9 }
 0x52a   : > { %v4179_v42 = vmul.f32 %v5808_v48, %v4067_v33  ;;  %v4180_v17 = vmul.f32 %v5809_v10, %v4068_v11  ;;  %v4181_v36 = vmul.f32 %v5810_v28, %v4069_v31 }
 0x52b   : > { %5423 = vmatpush3.bf16.msra.mxu0 %v5422_v21 }
 0x52c   : > { %v4227_v46 = vsel %vm497_vm0, %v4179_v42, 0.0  ;;  %v4228_v0 = vsel %vm497_vm0, %v4180_v17, 0.0  ;;  %v4230_v35 = vsel %vm497_vm0, %v4181_v36, 0.0  ;;  %5424 = vmatprep.subr.bf16.mxu0 %v6104_v62 }
 0x52d   : > { %v4229_v55 = vadd.f32 %v4228_v0, %v4227_v46 }
 0x52f   : > { %v4231_v22 = vadd.f32 %v4230_v35, %v4229_v55  ;;  %5426 = vmatpush3.bf16.msra.mxu0 %v5425_v1 }
 0x531   : > { %v4232_v59 = vrot.slane %v4231_v22, 4 }
 0x533   : > { %v4233_v50 = vadd.f32 %v4232_v59, %v4231_v22 }
 0x535   : > { %v4234_v38 = vrot.slane %v4233_v50, 2 }
 0x537   : > { %v4235_v60 = vadd.f32 %v4234_v38, %v4233_v50 }
 0x539   : > { %v4236_v44 = vrot.slane %v4235_v60, 1 }
 0x53b   : > { %v4237_v58 = vadd.f32 %v4236_v44, %v4235_v60 }
 0x53d   : > { %v7216_v12 = vsel %vm4302_vm7, %v4237_v58, %v7191_v51 }
 0x543   : > { %v3638_v53 = vpop.xlane.xlu1 %3637  ;;  %v3650_v52 = vpop.xlane.xlu0 %3649 }
 0x544   : > { %v3883_v56 = vmax.f32 %v3882_v3, %v3638_v53  ;;  %v3890_v3 = vmax.f32 %v7184_v16, %v7188_v41 }
 0x546   : > { %v3884_v7 = vrot.slane %v3883_v56, 4 }
 0x547   : > { %v3653_v4 = vpop.xlane.xlu1 %3652  ;;  %v3496_v61 = vpop.permute.xlu0 %3495 }
 0x548   : > { %v3885_v57 = vmax.f32 %v3883_v56, %v3884_v7  ;;  %v3557_v54 = vsel %vm497_vm0, %v3496_v61, 0.0  ;;  %v3898_v51 = vmax.f32 %v3650_v52, %v3653_v4 }
 0x549   : > { %3558 = vadd.xlane.f32.xlu1 %v3557_v54 }
 0x54a   : > { %v3886_v5 = vrot.slane %v3885_v57, 2 }
 0x54b   : > { %v7221_v27 = vpop.xlane.xlu1 %3658 }
 0x54c   : > { %v3887_v15 = vmax.f32 %v3885_v57, %v3886_v5 }
 0x54e   : > { %v3888_v13 = vrot.slane %v3887_v15, 1 }
 0x54f   : > { %v3656_v30 = vpop.xlane.xlu1 %3655 }
 0x550   : > { %v3889_v45 = vmax.f32 %v3887_v15, %v3888_v13  ;;  %v3899_v20 = vmax.f32 %v3898_v51, %v3656_v30  ;;  %v5811_v13 = vld [vmem:[%s6443_s9 + $0x60] sm:$0xff] }
 0x552   : > { %v3926_v24 = vsub.f32 %v7175_v14, %v3889_v45  ;;  %v3927_v37 = vsub.f32 %v7180_v40, %v3889_v45  ;;  %v3928_v32 = vsub.f32 %v3638_v53, %v3889_v45  ;;  %v3900_v47 = vrot.slane %v3899_v20, 4 }
 0x554   : > { %v3962_v25 = vmul.f32 1.442695, %v3926_v24  ;;  %v3964_v63 = vmul.f32 1.442695, %v3927_v37  ;;  %v3901_v2 = vmax.f32 %v3899_v20, %v3900_v47  ;;  %v3966_v19 = vmul.f32 1.442695, %v3928_v32 }
 0x556   : > { %5719 = vpow2.f32 %v3962_v25  ;;  %v3902_v23 = vrot.slane %v3901_v2, 2 }
 0x557   : > { %5721 = vpow2.f32 %v3964_v63 }
 0x558   : > { %v3903_v49 = vmax.f32 %v3901_v2, %v3902_v23  ;;  %5723 = vpow2.f32 %v3966_v19  ;;  %v5813_v19 = vld [vmem:[%s6443_s9 + $0x70] sm:$0xff] }
 0x55a   : > { %v3904_v14 = vrot.slane %v3903_v49, 1 }
 0x55c   : > { %v3905_v40 = vmax.f32 %v3903_v49, %v3904_v14 }
 0x55e   : > { %v3932_v6 = vsub.f32 %v3650_v52, %v3905_v40  ;;  %v3933_v34 = vsub.f32 %v3653_v4, %v3905_v40  ;;  %v3934_v29 = vsub.f32 %v3656_v30, %v3905_v40  ;;  %v5812_v30 = vld [vmem:[%s6443_s9 + $0x68] sm:$0xff] }
 0x560   : > { %v5720_v39 = vpop.eup %5719  ;;  %v3974_v18 = vmul.f32 1.442695, %v3932_v6  ;;  %v3976_v33 = vmul.f32 1.442695, %v3933_v34  ;;  %v3978_v31 = vmul.f32 1.442695, %v3934_v29 }
 0x561   : > { %v5722_v11 = vpop.eup %5721 }
 0x562   : > { %v4018_v48 = vadd.f32 %v5722_v11, %v5720_v39  ;;  %5725 = vpow2.f32 %v3974_v18  ;;  %v5724_v42 = vpop.eup %5723 }
 0x563   : > { %5727 = vpow2.f32 %v3976_v33 }
 0x564   : > { %v4019_v10 = vadd.f32 %v5724_v42, %v4018_v48  ;;  %5729 = vpow2.f32 %v3978_v31 }
 0x566   : > { %v4020_v17 = vrot.slane %v4019_v10, 4 }
 0x568   : > { %v4021_v28 = vadd.f32 %v4020_v17, %v4019_v10 }
 0x56a   : > { %v4022_v36 = vrot.slane %v4021_v28, 2 }
 0x56c   : > { %v7226_v46 = vpop.eup %5725  ;;  %v4023_v0 = vadd.f32 %v4022_v36, %v4021_v28 }
 0x56d   : > { %v7228_v55 = vpop.eup %5727 }
 0x56e   : > { %v4024_v35 = vrot.slane %v4023_v0, 1  ;;  %v4034_v22 = vadd.f32 %v7228_v55, %v7226_v46  ;;  %v7232_v59 = vpop.eup %5729 }
 0x570   : > { %v4025_v50 = vadd.f32 %v4024_v35, %v4023_v0  ;;  %v4035_v38 = vadd.f32 %v7232_v59, %v4034_v22 }
 0x572   : > { %5731 = vrcp.f32 %v4025_v50  ;;  %v4036_v60 = vrot.slane %v4035_v38, 4 }
 0x574   : > { %v4037_v44 = vadd.f32 %v4036_v60, %v4035_v38 }
 0x576   : > { %v4038_v58 = vrot.slane %v4037_v44, 2 }
 0x578   : > { %v3647_v53 = vpop.xlane.xlu0 %3646  ;;  %v4039_v52 = vadd.f32 %v4038_v58, %v4037_v44 }
 0x579   : > { %v3891_v56 = vmax.f32 %v3890_v3, %v3647_v53 }
 0x57a   : > { %v4040_v5 = vrot.slane %v4039_v52, 1 }
 0x57b   : > { %v3892_v7 = vrot.slane %v3891_v56, 4 }
 0x57c   : > { %v5732_v4 = vpop.eup %5731  ;;  %v3662_v61 = vpop.xlane.xlu0 %3661  ;;  %v4041_v24 = vadd.f32 %v4040_v5, %v4039_v52 }
 0x57d   : > { %v4070_v57 = vmul.f32 %v5732_v4, %v5720_v39  ;;  %v4071_v54 = vmul.f32 %v5732_v4, %v5722_v11  ;;  %v3893_v15 = vmax.f32 %v3891_v56, %v3892_v7  ;;  %v3906_v9 = vmax.f32 %v7221_v27, %v3662_v61 }
 0x57e   : > { %v4072_v21 = vmul.f32 %v5732_v4, %v5724_v42  ;;  %5733 = vrcp.f32 %v4041_v24 }
 0x57f   : > { %v4182_v51 = vmul.f32 %v5811_v13, %v4070_v57  ;;  %v4183_v45 = vmul.f32 %v5812_v30, %v4071_v54  ;;  %v3894_v20 = vrot.slane %v3893_v15, 2  ;;  %v4285_v30 = vld [vmem:[#allocation10 + $0x18] sm:$0xff] }
 0x580   : > { %v3665_v26 = vpop.xlane.xlu0 %3664  ;;  %v4184_v43 = vmul.f32 %v5813_v19, %v4072_v21 }
 0x581   : > { %v3895_v37 = vmax.f32 %v3893_v15, %v3894_v20  ;;  %v3907_v32 = vmax.f32 %v3906_v9, %v3665_v26  ;;  %v4238_v47 = vsel %vm497_vm0, %v4182_v51, 0.0  ;;  %v4239_v25 = vsel %vm497_vm0, %v4183_v45, 0.0  ;;  %v4284_v15 = vld [vmem:[#allocation10 + $0x10] sm:$0xff] }
 0x582   : > { %v4240_v23 = vadd.f32 %v4239_v25, %v4238_v47  ;;  %v4241_v34 = vsel %vm497_vm0, %v4184_v43, 0.0 }
 0x583   : > { %v3896_v63 = vrot.slane %v3895_v37, 1  ;;  %v3908_v2 = vrot.slane %v3907_v32, 4 }
 0x584   : > { %v4242_v18 = vadd.f32 %v4241_v34, %v4240_v23 }
 0x585   : > { %v3897_v8 = vmax.f32 %v3895_v37, %v3896_v63  ;;  %v3909_v1 = vmax.f32 %v3907_v32, %v3908_v2  ;;  %v7248_v48 = vpop.xlane.xlu1 %3519  ;;  %v5814_v32 = vld [vmem:[%s6443_s9 + $0x90] sm:$0xff] }
 0x586   : > { %v4243_v10 = vrot.slane %v4242_v18, 4 }
 0x587   : > { %v3929_v49 = vsub.f32 %v7184_v16, %v3897_v8  ;;  %v3930_v14 = vsub.f32 %v7188_v41, %v3897_v8  ;;  %v3931_v40 = vsub.f32 %v3647_v53, %v3897_v8  ;;  %v3910_v6 = vrot.slane %v3909_v1, 2  ;;  %v5815_v8 = vld [vmem:[%s6443_s9 + $0x98] sm:$0xff] }
 0x588   : > { %v5734_v0 = vpop.eup %5733  ;;  %v4244_v3 = vadd.f32 %v4243_v10, %v4242_v18 }
 0x589   : > { %v3968_v29 = vmul.f32 1.442695, %v3929_v49  ;;  %v7246_v39 = vpop.xlane.xlu0 %3516  ;;  %v3970_v33 = vmul.f32 1.442695, %v3930_v14  ;;  %v3972_v11 = vmul.f32 1.442695, %v3931_v40  ;;  %v3911_v31 = vmax.f32 %v3909_v1, %v3910_v6 }
 0x58a   : > { %v3666_v16 = vmax.f32 %v7246_v39, %v7248_v48  ;;  %v4076_v53 = vmul.f32 %v5734_v0, %v7226_v46  ;;  %v4077_v13 = vmul.f32 %v5734_v0, %v7228_v55  ;;  %v4078_v51 = vmul.f32 %v5734_v0, %v7232_v59 }
 0x58b   : > { %5735 = vpow2.f32 %v3968_v29  ;;  %v3912_v42 = vrot.slane %v3911_v31, 1  ;;  %v4245_v37 = vrot.slane %v4244_v3, 2  ;;  %v5431_v59 = vpack.c.bf16 %v4285_v30, %v4284_v15  ;;  %v5816_v29 = vld [vmem:[%s6443_s9 + $0xa0] sm:$0xff] }
 0x58c   : > { %5737 = vpow2.f32 %v3970_v33  ;;  %v3667_v28 = vrot.slane %v3666_v16, 4  ;;  %v4188_v47 = vmul.f32 %v5814_v32, %v4076_v53  ;;  %v4189_v23 = vmul.f32 %v5815_v8, %v4077_v13 }
 0x58d   : > { %v7252_v41 = vpop.xlane.xlu0 %3531  ;;  %5739 = vpow2.f32 %v3972_v11  ;;  %v3913_v17 = vmax.f32 %v3911_v31, %v3912_v42  ;;  %v7289_v18 = vmul.f32 %v5816_v29, %v4078_v51  ;;  %v7294_v31 = vadd.f32 %v4245_v37, %v4244_v3 }
 0x58e   : > { %v7254_v36 = vpop.xlane.xlu1 %3528  ;;  %v3668_v60 = vmax.f32 %v3666_v16, %v3667_v28  ;;  %v4260_v33 = vsel %vm497_vm0, %v4188_v47, 0.0  ;;  %v4261_v28 = vsel %vm497_vm0, %v4189_v23, 0.0 }
 0x58f   : > { %v3680_v35 = vmax.f32 %v7254_v36, %v7252_v41  ;;  %v3935_v22 = vsub.f32 %v7221_v27, %v3913_v17  ;;  %v3936_v50 = vsub.f32 %v3662_v61, %v3913_v17  ;;  %v3937_v38 = vsub.f32 %v3665_v26, %v3913_v17  ;;  %v4282_v27 = vld [vmem:[#allocation10] sm:$0xff]  ;;  %v4283_v61 = vld [vmem:[#allocation10 + $0x8] sm:$0xff] }
 0x590   : > { %v3669_v57 = vrot.slane %v3668_v60, 2  ;;  %v5428_v46 = vpack.c.bf16 %v4283_v61, %v4282_v27 }
 0x591   : > { %v3681_v44 = vrot.slane %v3680_v35, 4  ;;  %v7259_v58 = vpop.xlane.xlu0 %3522  ;;  %v3980_v52 = vmul.f32 1.442695, %v3935_v22  ;;  %v3982_v56 = vmul.f32 1.442695, %v3936_v50 }
 0x592   : > { %v7262_v7 = vpop.xlane.xlu1 %3525  ;;  %v3984_v4 = vmul.f32 1.442695, %v3937_v38  ;;  %v3670_v20 = vmax.f32 %v3668_v60, %v3669_v57  ;;  %5429 = vmatpush3.bf16.msra.mxu1 %v5428_v46 }
 0x593   : > { %v3682_v54 = vmax.f32 %v3680_v35, %v3681_v44  ;;  %v3673_v5 = vmax.f32 %v7259_v58, %v7262_v7  ;;  %5741 = vpow2.f32 %v3980_v52  ;;  %5430 = vmatprep.subr.bf16.mxu1 %v6104_v62 }
 0x594   : > { %5743 = vpow2.f32 %v3982_v56  ;;  %v3671_v63 = vrot.slane %v3670_v20, 1 }
 0x595   : > { %v7268_v45 = vpop.eup %5735  ;;  %v3683_v9 = vrot.slane %v3682_v54, 2  ;;  %v3674_v26 = vrot.slane %v3673_v5, 4  ;;  %v7270_v21 = vpop.xlane.xlu0 %3543  ;;  %5745 = vpow2.f32 %v3984_v4 }
 0x596   : > { %v7272_v24 = vpop.eup %5737  ;;  %v7275_v55 = vpop.xlane.xlu1 %3540  ;;  %v3672_v14 = vmax.f32 %v3670_v20, %v3671_v63  ;;  %5432 = vmatpush3.bf16.msra.mxu1 %v5431_v59 }
 0x597   : > { %v4026_v25 = vadd.f32 %v7272_v24, %v7268_v45  ;;  %v3684_v2 = vmax.f32 %v3682_v54, %v3683_v9  ;;  %v3675_v19 = vmax.f32 %v3673_v5, %v3674_v26  ;;  %v7280_v43 = vpop.eup %5739  ;;  %v3694_v1 = vmax.f32 %v7275_v55, %v7270_v21 }
 0x598   : > { %v3722_v16 = vsub.f32 %v7246_v39, %v3672_v14  ;;  %v3723_v10 = vsub.f32 %v7248_v48, %v3672_v14 }
 0x599   : > { %v4027_v49 = vadd.f32 %v7280_v43, %v4026_v25  ;;  %v3685_v40 = vrot.slane %v3684_v2, 1  ;;  %v3676_v6 = vrot.slane %v3675_v19, 2  ;;  %v7286_v34 = vpop.xlane.xlu0 %3534  ;;  %v3695_v62 = vrot.slane %v3694_v1, 4 }
 0x59a   : > { %v7292_v11 = vpop.xlane.xlu1 %3537  ;;  %v3738_v38 = vmul.f32 1.442695, %v3722_v16  ;;  %v3740_v60 = vmul.f32 1.442695, %v3723_v10 }
 0x59b   : > { %v4028_v42 = vrot.slane %v4027_v49, 4  ;;  %v3686_v17 = vmax.f32 %v3684_v2, %v3685_v40  ;;  %v3677_v0 = vmax.f32 %v3675_v19, %v3676_v6  ;;  %v3696_v35 = vmax.f32 %v3694_v1, %v3695_v62 }
 0x59c   : > { %v3687_v22 = vmax.f32 %v7286_v34, %v7292_v11  ;;  %5747 = vpow2.f32 %v3738_v38  ;;  %v4262_v40 = vadd.f32 %v4261_v28, %v4260_v33 }
 0x59d   : > { %v4029_v50 = vadd.f32 %v4028_v42, %v4027_v49  ;;  %v3726_v44 = vsub.f32 %v7254_v36, %v3686_v17  ;;  %v7302_v3 = vpop.xlane.xlu0 %3555  ;;  %v7304_v53 = vpop.eup %5741  ;;  %v3727_v39 = vsub.f32 %v7252_v41, %v3686_v17  ;;  %v3678_v48 = vrot.slane %v3677_v0, 1 }
 0x59e   : > { %v3697_v52 = vrot.slane %v3696_v35, 2  ;;  %v3688_v56 = vrot.slane %v3687_v22, 4  ;;  %v7307_v4 = vpop.xlane.xlu1 %3552  ;;  %v7309_v57 = vpop.eup %5743  ;;  %5749 = vpow2.f32 %v3740_v60 }
 0x59f   : > { %v4030_v54 = vrot.slane %v4029_v50, 2  ;;  %v3746_v5 = vmul.f32 1.442695, %v3726_v44  ;;  %v3708_v27 = vmax.f32 %v7307_v4, %v7302_v3  ;;  %v7313_v36 = vpop.eup %5745  ;;  %v4042_v61 = vadd.f32 %v7309_v57, %v7304_v53 }
 0x5a0   : > { %v3748_v41 = vmul.f32 1.442695, %v3727_v39  ;;  %v3679_v15 = vmax.f32 %v3677_v0, %v3678_v48  ;;  %v3698_v51 = vmax.f32 %v3696_v35, %v3697_v52  ;;  %v3689_v46 = vmax.f32 %v3687_v22, %v3688_v56 }
 0x5a1   : > { %v4031_v13 = vadd.f32 %v4030_v54, %v4029_v50  ;;  %5751 = vpow2.f32 %v3746_v5  ;;  %v7317_v30 = vpop.xlane.xlu0 %3549  ;;  %v4043_v20 = vadd.f32 %v7313_v36, %v4042_v61  ;;  %v3709_v25 = vrot.slane %v3708_v27, 4 }
 0x5a2   : > { %5753 = vpow2.f32 %v3748_v41  ;;  %v3724_v9 = vsub.f32 %v7259_v58, %v3679_v15  ;;  %v3725_v26 = vsub.f32 %v7262_v7, %v3679_v15  ;;  %v7322_v37 = vpop.xlane.xlu1 %3546  ;;  %v3699_v47 = vrot.slane %v3698_v51, 1 }
 0x5a3   : > { %v4032_v32 = vrot.slane %v4031_v13, 1  ;;  %v3690_v59 = vrot.slane %v3689_v46, 2  ;;  %v4044_v63 = vrot.slane %v4043_v20, 4  ;;  %v3701_v8 = vmax.f32 %v7322_v37, %v7317_v30 }
 0x5a4   : > { %v3742_v2 = vmul.f32 1.442695, %v3724_v9  ;;  %v3744_v19 = vmul.f32 1.442695, %v3725_v26  ;;  %v3700_v1 = vmax.f32 %v3698_v51, %v3699_v47  ;;  %v3710_v14 = vmax.f32 %v3708_v27, %v3709_v25 }
 0x5a5   : > { %v4033_v23 = vadd.f32 %v4032_v32, %v4031_v13  ;;  %v3691_v49 = vmax.f32 %v3689_v46, %v3690_v59  ;;  %v4045_v58 = vadd.f32 %v4044_v63, %v4043_v20  ;;  %v3702_v7 = vrot.slane %v3701_v8, 4 }
 0x5a6   : > { %5755 = vpow2.f32 %v3742_v2  ;;  %v3730_v6 = vsub.f32 %v7275_v55, %v3700_v1  ;;  %v3731_v29 = vsub.f32 %v7270_v21, %v3700_v1  ;;  %v3711_v16 = vrot.slane %v3710_v14, 2  ;;  %v7328_v17 = vpop.eup %5747 }
 0x5a7   : > { %5757 = vrcp.f32 %v4033_v23  ;;  %v3692_v62 = vrot.slane %v3691_v49, 1  ;;  %v4046_v42 = vrot.slane %v4045_v58, 2  ;;  %v3703_v10 = vmax.f32 %v3701_v8, %v3702_v7  ;;  %v5818_v7 = vld [vmem:[%s6443_s9 + $0x80] sm:$0xff] }
 0x5a8   : > { %5759 = vpow2.f32 %v3744_v19  ;;  %v4263_v0 = vsel %vm497_vm0, %v7289_v18, 0.0  ;;  %v3754_v35 = vmul.f32 1.442695, %v3730_v6  ;;  %v3756_v33 = vmul.f32 1.442695, %v3731_v29  ;;  %v7332_v22 = vpop.eup %5749  ;;  %v5819_v29 = vld [vmem:[%s6443_s9 + $0x88] sm:$0xff] }
 0x5a9   : > { %v3693_v28 = vmax.f32 %v3691_v49, %v3692_v62  ;;  %v4264_v50 = vadd.f32 %v4263_v0, %v4262_v40  ;;  %v4047_v38 = vadd.f32 %v4046_v42, %v4045_v58  ;;  %v3712_v55 = vmax.f32 %v3710_v14, %v3711_v16  ;;  %v5817_v40 = vld [vmem:[%s6443_s9 + $0x78] sm:$0xff] }
 0x5aa   : > { %v3704_v60 = vrot.slane %v3703_v10, 2  ;;  %v3770_v44 = vadd.f32 %v7332_v22, %v7328_v17  ;;  %5761 = vpow2.f32 %v3754_v35 }
 0x5ab   : > { %v7334_v21 = vpop.eup %5751  ;;  %v3728_v39 = vsub.f32 %v7286_v34, %v3693_v28  ;;  %v3729_v48 = vsub.f32 %v7292_v11, %v3693_v28  ;;  %v4048_v52 = vrot.slane %v4047_v38, 1  ;;  %5763 = vpow2.f32 %v3756_v33 }
 0x5ac   : > { %v7340_v18 = vpop.eup %5753  ;;  %v3713_v56 = vrot.slane %v3712_v55, 1  ;;  %v3705_v54 = vmax.f32 %v3703_v10, %v3704_v60  ;;  %v3771_v5 = vrot.slane %v3770_v44, 4  ;;  %v4247_v34 = vrot.slane %v7294_v31, 1 }
 0x5ad   : > { %v3784_v27 = vadd.f32 %v7340_v18, %v7334_v21  ;;  %v3750_v61 = vmul.f32 1.442695, %v3728_v39  ;;  %v3752_v41 = vmul.f32 1.442695, %v3729_v48  ;;  %v4049_v15 = vadd.f32 %v4048_v52, %v4047_v38 }
 0x5ae   : > { %v3714_v13 = vmax.f32 %v3712_v55, %v3713_v56  ;;  %v3706_v51 = vrot.slane %v3705_v54, 1  ;;  %v3772_v46 = vadd.f32 %v3771_v5, %v3770_v44  ;;  %v4265_v9 = vrot.slane %v4264_v50, 4 }
 0x5af   : > { %v3785_v20 = vrot.slane %v3784_v27, 4  ;;  %5765 = vpow2.f32 %v3750_v61 }
 0x5b0   : > { %v7345_v11 = vpop.eup %5755  ;;  %5767 = vrcp.f32 %v4049_v15  ;;  %v3734_v26 = vsub.f32 %v7307_v4, %v3714_v13  ;;  %v3735_v32 = vsub.f32 %v7302_v3, %v3714_v13  ;;  %v3773_v59 = vrot.slane %v3772_v46, 2 }
 0x5b1   : > { %v5758_v47 = vpop.eup %5757  ;;  %v3786_v25 = vadd.f32 %v3785_v20, %v3784_v27  ;;  %5769 = vpow2.f32 %v3752_v41  ;;  %v3707_v63 = vmax.f32 %v3705_v54, %v3706_v51  ;;  %v4266_v33 = vadd.f32 %v4265_v9, %v4264_v50 }
 0x5b2   : > { %v7349_v2 = vpop.eup %5759  ;;  %v4073_v19 = vmul.f32 %v5758_v47, %v7268_v45  ;;  %v4074_v8 = vmul.f32 %v5758_v47, %v7272_v24  ;;  %v4075_v23 = vmul.f32 %v5758_v47, %v7280_v43  ;;  %v3762_v1 = vmul.f32 1.442695, %v3734_v26  ;;  %v5820_v47 = vld [vmem:[%s6443_s9 + $0xa8] sm:$0xff] }
 0x5b3   : > { %v3774_v4 = vadd.f32 %v3773_v59, %v3772_v46  ;;  %v3787_v49 = vrot.slane %v3786_v25, 2  ;;  %v3777_v3 = vadd.f32 %v7349_v2, %v7345_v11  ;;  %v3764_v14 = vmul.f32 1.442695, %v3735_v32 }
 0x5b4   : > { %v4185_v58 = vmul.f32 %v5817_v40, %v4073_v19  ;;  %v4186_v6 = vmul.f32 %v5818_v7, %v4074_v8  ;;  %v4187_v62 = vmul.f32 %v5819_v29, %v4075_v23  ;;  %5771 = vpow2.f32 %v3762_v1  ;;  %v7359_v42 = vpop.eup %5761  ;;  %v5822_v19 = vld [vmem:[%s6443_s9 + $0xb8] sm:$0xff] }
 0x5b5   : > { %v3775_v45 = vrot.slane %v3774_v4, 1  ;;  %v3788_v24 = vadd.f32 %v3787_v49, %v3786_v25  ;;  %v3778_v16 = vrot.slane %v3777_v3, 4  ;;  %5773 = vpow2.f32 %v3764_v14  ;;  %v7361_v43 = vpop.eup %5763  ;;  %v5821_v25 = vld [vmem:[%s6443_s9 + $0xb0] sm:$0xff]  ;;  %s6011_s9 = scalar_lea.vmem %s7470_s26, 128 }
 0x5b6   : > { %v4249_v10 = vsel %vm497_vm0, %v4185_v58, 0.0  ;;  %v4250_v0 = vsel %vm497_vm0, %v4186_v6, 0.0  ;;  %v3732_v35 = vsub.f32 %v7322_v37, %v3707_v63  ;;  %v4252_v44 = vsel %vm497_vm0, %v4187_v62, 0.0  ;;  %p6012_p0 = scmp.ne.s32.totalorder %s7470_s26, %s6011_s9  ;;  %p6019_p5 = scmp.lt.s32.totalorder %s6017_s21, %s6011_s9 }
 0x5b7   : > { %v4251_v28 = vadd.f32 %v4250_v0, %v4249_v10  ;;  %v3776_v38 = vadd.f32 %v3775_v45, %v3774_v4  ;;  %v3789_v55 = vrot.slane %v3788_v24, 1  ;;  %v3779_v60 = vadd.f32 %v3778_v16, %v3777_v3 }
 0x5b8   : > { %v3798_v39 = vadd.f32 %v7361_v43, %v7359_v42  ;;  %v3733_v48 = vsub.f32 %v7317_v30, %v3707_v63  ;;  %v3758_v52 = vmul.f32 1.442695, %v3732_v35  ;;  %v4267_v41 = vrot.slane %v4266_v33, 2  ;;  %p6013_p4 = pnand %p6012_p0, %p6330_p10  ;;  %p6020_p9 = por %p6019_p5, %p6018_p3 }
 0x5b9   : > { %v7370_v56 = vpop.eup %5765  ;;  %v4253_v54 = vadd.f32 %v4252_v44, %v4251_v28  ;;  %5775 = vrcp.f32 %v3776_v38  ;;  %v3790_v5 = vadd.f32 %v3789_v55, %v3788_v24  ;;  %v3780_v27 = vrot.slane %v3779_v60, 2 }
 0x5ba   : > { %v5768_v37 = vpop.eup %5767  ;;  %v3799_v50 = vrot.slane %v3798_v39, 4  ;;  %5777 = vpow2.f32 %v3758_v52  ;;  %v3760_v61 = vmul.f32 1.442695, %v3733_v48  ;;  %v4268_v14 = vadd.f32 %v4267_v41, %v4266_v33  ;;  %p6014_p6 = pneg %p6013_p4 }
 0x5bb   : > { %v7372_v15 = vpop.eup %5769  ;;  %v4254_v13 = vrot.slane %v4253_v54, 4  ;;  %v4079_v30 = vmul.f32 %v5768_v37, %v7304_v53  ;;  %v4080_v51 = vmul.f32 %v5768_v37, %v7309_v57  ;;  %v4081_v46 = vmul.f32 %v5768_v37, %v7313_v36 }
 0x5bc   : > { %5779 = vrcp.f32 %v3790_v5  ;;  %v3781_v20 = vadd.f32 %v3780_v27, %v3779_v60  ;;  %v3800_v9 = vadd.f32 %v3799_v50, %v3798_v39  ;;  %v3791_v26 = vadd.f32 %v7372_v15, %v7370_v56  ;;  %p6021_p8 = pnand %p6020_p9, %p6014_p6 }
 0x5bd   : > { %v4255_v32 = vadd.f32 %v4254_v13, %v4253_v54  ;;  %v4191_v59 = vmul.f32 %v5820_v47, %v4079_v30  ;;  %v4192_v63 = vmul.f32 %v5821_v25, %v4080_v51  ;;  %v4193_v8 = vmul.f32 %v5822_v19, %v4081_v46  ;;  %v5825_v25 = vld [vmem:[%s6435_s29 + $0x20] sm:$0xff] }
 0x5be   : > { %v7382_v23 = vpop.eup %5771  ;;  %v3782_v53 = vrot.slane %v3781_v20, 1  ;;  %v3801_v1 = vrot.slane %v3800_v9, 2  ;;  %v3792_v57 = vrot.slane %v3791_v26, 4  ;;  %5781 = vpow2.f32 %v3760_v61 }
 0x5bf   : > { %v7384_v36 = vpop.eup %5773  ;;  %v4271_v4 = vsel %vm497_vm0, %v4191_v59, 0.0  ;;  %v4272_v49 = vsel %vm497_vm0, %v4192_v63, 0.0  ;;  %v4256_v3 = vrot.slane %v4255_v32, 2  ;;  %v4274_v29 = vsel %vm497_vm0, %v4193_v8, 0.0  ;;  %v5826_v8 = vld [vmem:[%s6435_s29 + $0x28] sm:$0xff] }
 0x5c0   : > { %v4273_v40 = vadd.f32 %v4272_v49, %v4271_v4  ;;  %v3783_v58 = vadd.f32 %v3782_v53, %v3781_v20  ;;  %v3802_v7 = vadd.f32 %v3801_v1, %v3800_v9  ;;  %v3793_v6 = vadd.f32 %v3792_v57, %v3791_v26  ;;  %v5823_v26 = vld [vmem:[%s6435_s29] sm:$0xff] }
 0x5c1   : > { %v3812_v62 = vadd.f32 %v7384_v36, %v7382_v23  ;;  %v4248_v45 = vadd.f32 %v4247_v34, %v7294_v31  ;;  %v4257_v24 = vadd.f32 %v4256_v3, %v4255_v32  ;;  %v4269_v38 = vrot.slane %v4268_v14, 1 }
 0x5c2   : > { %v4275_v16 = vadd.f32 %v4274_v29, %v4273_v40  ;;  %5783 = vrcp.f32 %v3783_v58  ;;  %v3803_v10 = vrot.slane %v3802_v7, 1  ;;  %v3794_v0 = vrot.slane %v3793_v6, 2  ;;  %v5827_v40 = vld [vmem:[%s6435_s29 + $0x10] sm:$0xff] }
 0x5c3   : > { %v5776_v35 = vpop.eup %5775  ;;  %v3813_v33 = vrot.slane %v3812_v62, 4  ;;  %v4258_v28 = vrot.slane %v4257_v24, 1  ;;  %v4305_v34 = vsel %vm4304_vm8, %v4248_v45, %v7216_v12  ;;  %v4270_v37 = vadd.f32 %v4269_v38, %v4268_v14  ;;  %v5829_v38 = vld [vmem:[%s6435_s29 + $0x40] sm:$0xff] }
 0x5c4   : > { %v7394_v55 = vpop.eup %5777  ;;  %v3804_v60 = vadd.f32 %v3803_v10, %v3802_v7  ;;  %v3795_v44 = vadd.f32 %v3794_v0, %v3793_v6  ;;  %v4276_v52 = vrot.slane %v4275_v16, 4  ;;  %v3834_v5 = vmul.f32 %v5776_v35, %v7328_v17  ;;  %v5828_v7 = vld [vmem:[%s6435_s29 + $0x18] sm:$0xff] }
 0x5c5   : > { %v3814_v39 = vadd.f32 %v3813_v33, %v3812_v62  ;;  %v4259_v48 = vadd.f32 %v4258_v28, %v4257_v24  ;;  %v3835_v41 = vmul.f32 %v5776_v35, %v7332_v22 }
 0x5c6   : > { %v5780_v54 = vpop.eup %5779  ;;  %5785 = vrcp.f32 %v3804_v60  ;;  %v3796_v31 = vrot.slane %v3795_v44, 1  ;;  %v4277_v50 = vadd.f32 %v4276_v52, %v4275_v16  ;;  %v4082_v32 = vmul.f32 %v5823_v26, %v3834_v5 }
 0x5c7   : > { %v3815_v27 = vrot.slane %v3814_v39, 2  ;;  %v3838_v13 = vmul.f32 %v5780_v54, %v7334_v21  ;;  %v4307_v51 = vsel %vm4306_vm9, %v4259_v48, %v4305_v34  ;;  %v3839_v12 = vmul.f32 %v5780_v54, %v7340_v18  ;;  %v5824_v21 = vld [vmem:[%s6435_s29 + $0x8] sm:$0xff] }
 0x5c8   : > { %v7399_v61 = vpop.eup %5781  ;;  %v3797_v30 = vadd.f32 %v3796_v31, %v3795_v44  ;;  %v4278_v20 = vrot.slane %v4277_v50, 2  ;;  %v4309_v9 = vsel %vm4308_vm10, %v4270_v37, %v4307_v51  ;;  %v4083_v59 = vmul.f32 %v5824_v21, %v3835_v41  ;;  %v5830_v54 = vld [vmem:[%s6435_s29 + $0x48] sm:$0xff] }
 0x5c9   : > { %v3816_v46 = vadd.f32 %v3815_v27, %v3814_v39  ;;  %v3805_v17 = vadd.f32 %v7399_v61, %v7394_v55  ;;  %v4086_v63 = vmul.f32 %v5825_v25, %v3838_v13  ;;  %v4087_v53 = vmul.f32 %v5826_v8, %v3839_v12  ;;  %v5832_v12 = vld [vmem:[%s6435_s29 + $0x38] sm:$0xff]  ;;  %v5833_v8 = vld [vmem:[%s6435_s29 + $0x60] sm:$0xff] }
 0x5ca   : > { %5787 = vrcp.f32 %v3797_v30  ;;  %v4279_v19 = vadd.f32 %v4278_v20, %v4277_v50  ;;  %v4098_v14 = vsel %vm497_vm0, %v4082_v32, 0.0  ;;  %v4099_v62 = vsel %vm497_vm0, %v4083_v59, 0.0  ;;  %v3562_v50 = vpop.xlane.xlu0 %3561  ;;  %v5831_v30 = vld [vmem:[%s6435_s29 + $0x30] sm:$0xff] }
 0x5cb   : > { %v3817_v22 = vrot.slane %v3816_v46, 1  ;;  %v3806_v18 = vrot.slane %v3805_v17, 4  ;;  %v4116_v45 = vsel %vm497_vm0, %v4086_v63, 0.0  ;;  %v4117_v24 = vsel %vm497_vm0, %v4087_v53, 0.0 }
 0x5cc   : > { %v5784_v47 = vpop.eup %5783  ;;  %v4280_v3 = vrot.slane %v4279_v19, 1  ;;  %v4100_v48 = vadd.f32 %v4099_v62, %v4098_v14  ;;  %v4118_v52 = vadd.f32 %v4117_v24, %v4116_v45 }
 0x5cd   : > { %v3836_v1 = vmul.f32 %v5784_v47, %v7345_v11  ;;  %v3837_v57 = vmul.f32 %v5784_v47, %v7349_v2  ;;  %v3818_v4 = vadd.f32 %v3817_v22, %v3816_v46  ;;  %v3807_v49 = vadd.f32 %v3806_v18, %v3805_v17 }
 0x5ce   : > { %v4281_v2 = vadd.f32 %v4280_v3, %v4279_v19  ;;  %v4101_v20 = vrot.slane %v4100_v48, 4 }
 0x5cf   : > { %v4084_v58 = vmul.f32 %v5827_v40, %v3836_v1  ;;  %v4085_v6 = vmul.f32 %v5828_v7, %v3837_v57  ;;  %5789 = vrcp.f32 %v3818_v4  ;;  %v3808_v11 = vrot.slane %v3807_v49, 2  ;;  %v5834_v1 = vld [vmem:[%s6435_s29 + $0x68] sm:$0xff] }
 0x5d0   : > { %v5786_v29 = vpop.eup %5785  ;;  %v4311_v44 = vsel %vm4310_vm11, %v4281_v2, %v4309_v9  ;;  %v4119_v9 = vrot.slane %v4118_v52, 4  ;;  %v4102_v18 = vadd.f32 %v4101_v20, %v4100_v48 }
 0x5d1   : > { %v4107_v16 = vsel %vm497_vm0, %v4084_v58, 0.0  ;;  %v4108_v10 = vsel %vm497_vm0, %v4085_v6, 0.0  ;;  %v3842_v0 = vmul.f32 %v5786_v29, %v7359_v42  ;;  %v3843_v33 = vmul.f32 %v5786_v29, %v7361_v43  ;;  %5288 = vmatmul.mubr.msk.f32.vlgmr.msra.gmra.mrb[56].mxu0 %vm497_vm0, %v4311_v44  ;;  %v5836_v44 = vld [vmem:[%s6435_s29 + $0x58] sm:$0xff] }
 0x5d2   : > { %v4109_v35 = vadd.f32 %v4108_v10, %v4107_v16  ;;  %v3809_v28 = vadd.f32 %v3808_v11, %v3807_v49  ;;  %v4120_v4 = vadd.f32 %v4119_v9, %v4118_v52 }
 0x5d3   : > { %v4090_v60 = vmul.f32 %v5829_v38, %v3842_v0  ;;  %v4091_v31 = vmul.f32 %v5830_v54, %v3843_v33  ;;  %v5835_v38 = vld [vmem:[%s6435_s29 + $0x50] sm:$0xff] }
 0x5d4   : > { %v5788_v39 = vpop.eup %5787  ;;  %v3810_v34 = vrot.slane %v3809_v28, 1  ;;  %v4110_v5 = vrot.slane %v4109_v35, 4  ;;  %v4121_v11 = vrot.slane %v4120_v4, 2 }
 0x5d5   : > { %v3840_v42 = vmul.f32 %v5788_v39, %v7370_v56  ;;  %v3841_v43 = vmul.f32 %v5788_v39, %v7372_v15  ;;  %v4134_v27 = vsel %vm497_vm0, %v4090_v60, 0.0  ;;  %v4135_v13 = vsel %vm497_vm0, %v4091_v31, 0.0 }
 0x5d6   : > { %v3811_v37 = vadd.f32 %v3810_v34, %v3809_v28  ;;  %v3559_v41 = vpop.xlane.xlu1 %3558  ;;  %v4111_v26 = vadd.f32 %v4110_v5, %v4109_v35  ;;  %v4136_v47 = vadd.f32 %v4135_v13, %v4134_v27  ;;  %v4122_v54 = vadd.f32 %v4121_v11, %v4120_v4  ;;  %v5838_v11 = vld [vmem:[%s6435_s29 + $0x78] sm:$0xff] }
 0x5d7   : > { %v4088_v51 = vmul.f32 %v5831_v30, %v3840_v42  ;;  %v4089_v46 = vmul.f32 %v5832_v12, %v3841_v43  ;;  %v3715_v17 = vmax.f32 %v3559_v41, %v3562_v50 }
 0x5d8   : > { %5791 = vrcp.f32 %v3811_v37  ;;  %v4112_v49 = vrot.slane %v4111_v26, 2  ;;  %v4137_v14 = vrot.slane %v4136_v47, 4 }
 0x5d9   : > { %v5790_v56 = vpop.eup %5789  ;;  %v4125_v15 = vsel %vm497_vm0, %v4088_v51, 0.0  ;;  %v4126_v32 = vsel %vm497_vm0, %v4089_v46, 0.0  ;;  %v3716_v22 = vrot.slane %v3715_v17, 4 }
 0x5da   : > { %v4127_v21 = vadd.f32 %v4126_v32, %v4125_v15  ;;  %v3846_v59 = vmul.f32 %v5790_v56, %v7382_v23  ;;  %v3847_v25 = vmul.f32 %v5790_v56, %v7384_v36  ;;  %v4103_v36 = vrot.slane %v4102_v18, 2 }
 0x5db   : > { %v3717_v63 = vmax.f32 %v3715_v17, %v3716_v22  ;;  %v4113_v2 = vadd.f32 %v4112_v49, %v4111_v26  ;;  %v4138_v24 = vadd.f32 %v4137_v14, %v4136_v47 }
 0x5dc   : > { %v4128_v19 = vrot.slane %v4127_v21, 4  ;;  %v4094_v53 = vmul.f32 %v5833_v8, %v3846_v59  ;;  %v4095_v57 = vmul.f32 %v5834_v1, %v3847_v25  ;;  %v4104_v33 = vadd.f32 %v4103_v36, %v4102_v18 }
 0x5dd   : > { %v3718_v3 = vrot.slane %v3717_v63, 2  ;;  %v4114_v31 = vrot.slane %v4113_v2, 1  ;;  %v4139_v34 = vrot.slane %v4138_v24, 2 }
 0x5de   : > { %v4129_v40 = vadd.f32 %v4128_v19, %v4127_v21  ;;  %v4152_v58 = vsel %vm497_vm0, %v4094_v53, 0.0  ;;  %v4153_v7 = vsel %vm497_vm0, %v4095_v57, 0.0 }
 0x5df   : > { %v4154_v23 = vadd.f32 %v4153_v7, %v4152_v58  ;;  %v3719_v6 = vmax.f32 %v3717_v63, %v3718_v3  ;;  %v4115_v30 = vadd.f32 %v4114_v31, %v4113_v2 }
 0x5e0   : > { %v4130_v16 = vrot.slane %v4129_v40, 2 }
 0x5e1   : > { %v4155_v29 = vrot.slane %v4154_v23, 4  ;;  %v3720_v62 = vrot.slane %v3719_v6, 1 }
 0x5e2   : > { %v5792_v45 = vpop.eup %5791  ;;  %v4131_v5 = vadd.f32 %v4130_v16, %v4129_v40 }
 0x5e3   : > { %v3844_v10 = vmul.f32 %v5792_v45, %v7394_v55  ;;  %v3845_v0 = vmul.f32 %v5792_v45, %v7399_v61  ;;  %v3721_v35 = vmax.f32 %v3719_v6, %v3720_v62  ;;  %v4156_v28 = vadd.f32 %v4155_v29, %v4154_v23  ;;  %v5837_v62 = vld [vmem:[%s6435_s29 + $0x70] sm:$0xff] }
 0x5e4   : > { %v4105_v61 = vrot.slane %v4104_v33, 1  ;;  %v4132_v12 = vrot.slane %v4131_v5, 1 }
 0x5e5   : > { %v4092_v60 = vmul.f32 %v5835_v38, %v3844_v10  ;;  %v4093_v39 = vmul.f32 %v5836_v44, %v3845_v0  ;;  %v3736_v48 = vsub.f32 %v3559_v41, %v3721_v35  ;;  %v3737_v52 = vsub.f32 %v3562_v50, %v3721_v35 }
 0x5e6   : > { %v4157_v13 = vrot.slane %v4156_v28, 2  ;;  %v4123_v41 = vrot.slane %v4122_v54, 1  ;;  %v4140_v50 = vadd.f32 %v4139_v34, %v4138_v24  ;;  %v4106_v46 = vadd.f32 %v4105_v61, %v4104_v33 }
 0x5e7   : > { %v4143_v42 = vsel %vm497_vm0, %v4092_v60, 0.0  ;;  %v4144_v43 = vsel %vm497_vm0, %v4093_v39, 0.0  ;;  %v3766_v55 = vmul.f32 1.442695, %v3736_v48  ;;  %v3768_v27 = vmul.f32 1.442695, %v3737_v52 }
 0x5e8   : > { %v4145_v37 = vadd.f32 %v4144_v43, %v4143_v42  ;;  %v4158_v20 = vadd.f32 %v4157_v13, %v4156_v28  ;;  %v4133_v9 = vadd.f32 %v4132_v12, %v4131_v5  ;;  %v4392_v26 = vsel %vm4298_vm5, %v4115_v30, %v4106_v46 }
 0x5e9   : > { %5793 = vpow2.f32 %v3766_v55  ;;  %v4124_v15 = vadd.f32 %v4123_v41, %v4122_v54  ;;  %v4141_v32 = vrot.slane %v4140_v50, 1  ;;  %v4770_v54 = vld [vmem:[%s7521_s8] ss:$0 sm:$0xff] }
 0x5ea   : > { %v4146_v51 = vrot.slane %v4145_v37, 4  ;;  %5795 = vpow2.f32 %v3768_v27  ;;  %v4159_v47 = vrot.slane %v4158_v20, 1 }
 0x5eb   : > { %v4393_v21 = vsel %vm4300_vm6, %v4124_v15, %v4392_v26  ;;  %v4142_v18 = vadd.f32 %v4141_v32, %v4140_v50 }
 0x5ec   : > { %v4147_v17 = vadd.f32 %v4146_v51, %v4145_v37  ;;  %v4394_v25 = vsel %vm4302_vm7, %v4133_v9, %v4393_v21  ;;  %v4160_v1 = vadd.f32 %v4159_v47, %v4158_v20 }
 0x5ed   : > { %v4395_v57 = vsel %vm4304_vm8, %v4142_v18, %v4394_v25 }
 0x5ee   : > { %v4148_v56 = vrot.slane %v4147_v17, 2 }
 0x5f0   : > { %v4149_v22 = vadd.f32 %v4148_v56, %v4147_v17 }
 0x5f2   : > { %v4150_v59 = vrot.slane %v4149_v22, 1 }
 0x5f3   : > { %v5794_v63 = vpop.eup %5793 }
 0x5f4   : > { %v5796_v19 = vpop.eup %5795  ;;  %v4151_v8 = vadd.f32 %v4150_v59, %v4149_v22 }
 0x5f5   : > { %v3819_v53 = vadd.f32 %v5796_v19, %v5794_v63 }
 0x5f6   : > { %v4396_v4 = vsel %vm4306_vm9, %v4151_v8, %v4395_v57 }
 0x5f7   : > { %v3820_v49 = vrot.slane %v3819_v53, 4  ;;  %v4397_v3 = vsel %vm4308_vm10, %v4160_v1, %v4396_v4 }
 0x5f9   : > { %v3821_v14 = vadd.f32 %v3820_v49, %v3819_v53 }
 0x5fb   : > { %v3822_v40 = vrot.slane %v3821_v14, 2 }
 0x5fd   : > { %v3823_v58 = vadd.f32 %v3822_v40, %v3821_v14 }
 0x5ff   : > { %v3824_v7 = vrot.slane %v3823_v58, 1 }
 0x601   : > { %v3825_v23 = vadd.f32 %v3824_v7, %v3823_v58 }
 0x603   : > { %5797 = vrcp.f32 %v3825_v23 }
 0x60d   : > { %v5798_v6 = vpop.eup %5797 }
 0x60e   : > { %v3848_v36 = vmul.f32 %v5798_v6, %v5794_v63  ;;  %v3849_v29 = vmul.f32 %v5798_v6, %v5796_v19 }
 0x610   : > { %v4096_v45 = vmul.f32 %v5837_v62, %v3848_v36  ;;  %v4097_v2 = vmul.f32 %v5838_v11, %v3849_v29 }
 0x612   : > { %v4161_v24 = vsel %vm497_vm0, %v4096_v45, 0.0  ;;  %v4162_v16 = vsel %vm497_vm0, %v4097_v2, 0.0 }
 0x613   : > { %v4163_v10 = vadd.f32 %v4162_v16, %v4161_v24 }
 0x615   : > { %v4164_v0 = vrot.slane %v4163_v10, 4 }
 0x617   : > { %v4165_v35 = vadd.f32 %v4164_v0, %v4163_v10 }
 0x619   : > { %v4166_v33 = vrot.slane %v4165_v35, 2 }
 0x61b   : > { %v4167_v28 = vadd.f32 %v4166_v33, %v4165_v35 }
 0x61d   : > { %v4168_v38 = vrot.slane %v4167_v28, 1 }
 0x61f   : > { %v4169_v60 = vadd.f32 %v4168_v38, %v4167_v28 }
 0x621   : > { %v4398_v44 = vsel %vm4310_vm11, %v4169_v60, %v4397_v3 }
 0x622   : > { %5299 = vmatmul.mubr.msk.f32.vlgmr.msra.gmra.mrb[64].mxu1 %vm497_vm0, %v4398_v44 }
 0x6a4   : > { %v4380_v39 = vpop.f32.mrb[56].mxu0 }
 0x6a5   : > { %v5289_v48 = vpop.f32.mrb[57].mxu0 }
 0x6f5   : > { %v4467_v52 = vpop.f32.mrb[64].mxu1 }
 0x6f6   : > { %v4468_v31 = vadd.f32 %v4467_v52, %v4380_v39  ;;  %v5300_v34 = vpop.f32.mrb[65].mxu1 }
 0x6f8   : > { %v4478_v5 = vadd.f32 %v4770_v54, %v4468_v31 }
 0x6fa   : > { %4479 = vst.msk [vmem:[%s450_s18] sm:$0xff] %vm497_vm0, %v4478_v5 }
 0x6fb   : > { %6024 = shalt.err (!%p6021_p8)
}
 0x6fc   : > { %s6025_s6 = scalar_lea.hbm %s7468_s3, 128  ;;  %s6029_s19 = scalar_lea.hbm %s7565_s0, 256 }
 0x6fd   : > { %p6026_p11 = scmp.ne.s32.totalorder %s7468_s3, %s6025_s6  ;;  %p6030_p1 = scmp.lt.u32.totalorder %s7468_s3, %s7565_s0 }
 0x6fe   : > { %p6031_p2 = scmp.lt.u32.totalorder %s6029_s19, %s6025_s6  ;;  %p6033_p0 = scmp.lt.u32.totalorder %s6025_s6, %s7468_s3 }
 0x6ff   : > { %p6027_p7 = pnand %p6026_p11, %p6330_p10 }
 0x700   : > { %p6032_p13 = por %p6031_p2, %p6030_p1 }
 0x701   : > { %p6028_p12 = pneg %p6027_p7 }
 0x702   : > { %p6034_p4 = por %p6033_p0, %p6032_p13 }
 0x704   : > { %p6035_p6 = pnand %p6034_p4, %p6028_p12 }
 0x706   : > { %6038 = shalt.err (!%p6035_p6)
}
 0x707   : > { %5456 = dma.vmem_to_hbm [thread:$0]  (%p6330_p10), %s7470_s26, 128, %s7468_s3, %s4481_s17  }
 0x708 PF: > { %s7566_s2 = sld [smem:[#allocation20_spill]]  ;;  %s7567_s24 = sld [smem:[#allocation21_spill]] }
 0x709   : > { %p7569_p5 = scmp.ge.s32.totalorder %s6093_s12, 2 }
 0x70e   : > { %s4506_s20 = sand.u32 1, %s7566_s2   ;;  %p7568_p3 = scmp.ne.s32.totalorder %s7567_s24, 0 }
 0x70f   : > { %s4507_s18 = scalar_lea.sflag [#allocation4], %s4506_s20 }
 0x710   : > { %p5479_p9 = pnand %p7569_p5, %p7568_p3 }
 0x712   : > { %6076 = dma.done.wait (!%p5479_p9), %s4507_s18, 128  }
 0x713   : > { %6078 = vsyncadd (!%p5479_p9), %s4507_s18, 4294967168  ;;  %p27_p8 = scmp.ge.s32.totalorder %s6320_s14, 4   ;;  %s7570_s30 = smov %s6085_s10 }
 0x714   : > { %s7571_s10 = smov %s6089_s11  ;;  %s7572_s11 = smov %s6336_s28 }
 0x715   : > { %s7573_s12 = smov %s6320_s14  ;;  %29 = sbr.rel (!%p27_p8) target bundleno = 15 (0xf), region = 130 }
 0x71c   :  { %4512 = vsyncpa [#allocation3], 1 }
 0x71d   :  { %4514 = vsyncpa [#allocation3 + $0x1], 1 }
 0x71e   :  { %4515 = vsyncpa [#allocation6], 1 }
 0x71f   :  { %4517 = vsyncpa [#allocation6 + $0x1], 1 }
 0x720   :  { %4518 = vsyncpa [#allocation9], 1 }
 0x721   :  { %4519 = vsyncpa [#allocation12], 1 }
 0x722   :  { %4520 = vsyncpa [#allocation4], 1 }
 0x723   :  { %4522 = vsyncpa [#allocation4 + $0x1], 1 }

</bundles_post_ra>
